<compile_context>
chip_gen: v7x
topology: tpu7x:2x2x1
jax: 0.10.0
libtpu: 0.0.40
codegen_flags: <defaults>
</compile_context>

<pallas_src>
import functools

import jax
import jax.numpy as jnp
import numpy as np
from jax.experimental import pallas as pl
from jax.experimental.pallas import tpu as pltpu


def _round_up(x, m):
    return ((x + m - 1) // m) * m


def _prepare_params(params, state_dim, compute_dtype):
    """Pad hidden dims to multiples of 128 and fuse the two Q-heads.

    Returns (ws, wa, b14, w25, b25, w36, b36, H2P) where
      ws : [state_dim,  2*H1P]   layer-1 weight rows for `state`
      wa : [action_dim, 2*H1P]   layer-1 weight rows for `action`
      b14: [1, 2*H1P]            fused layer-1 bias
      w25: [2*H1P, 2*H2P]        block-diagonal fused layer-2 weight
      b25: [1, 2*H2P]            fused layer-2 bias
      w36: [1, 2*H2P]            fused layer-3 weight rows (for VPU reduce)
      b36: [1, 2]                (b3, b6)
    """
    (w1, b1, w2, b2, w3, b3, w4, b4, w5, b5, w6, b6) = params
    d_in, h1 = w1.shape          # (state_dim + action_dim, 400)
    h2 = w2.shape[1]             # 300
    H1P = _round_up(h1, 128)     # 512
    H2P = _round_up(h2, 128)     # 384

    def pad2(m, rows, cols):
        return jnp.pad(m, ((0, rows - m.shape[0]), (0, cols - m.shape[1])))

    # Layer 1/4: shared input -> concatenate along output axis.
    w14 = jnp.concatenate([pad2(w1, d_in, H1P), pad2(w4, d_in, H1P)], axis=1)
    ws = w14[:state_dim].astype(compute_dtype)
    wa = w14[state_dim:].astype(compute_dtype)
    b14 = jnp.concatenate([pad2(b1, 1, H1P), pad2(b4, 1, H1P)],
                          axis=1).astype(jnp.float32)

    # Layer 2/5: block-diagonal fusion.
    w25 = jnp.zeros((2 * H1P, 2 * H2P), dtype=jnp.float32)
    w25 = w25.at[:H1P, :H2P].set(pad2(w2, H1P, H2P))
    w25 = w25.at[H1P:, H2P:].set(pad2(w5, H1P, H2P))
    w25 = w25.astype(compute_dtype)
    b25 = jnp.concatenate([pad2(b2, 1, H2P), pad2(b5, 1, H2P)],
                          axis=1).astype(jnp.float32)

    # Layer 3/6: single weight row per head (VPU multiply + lane reduce).
    w36 = jnp.concatenate([pad2(w3.T, 1, H2P), pad2(w6.T, 1, H2P)],
                          axis=1).astype(jnp.float32)
    b36 = jnp.concatenate([b3, b6], axis=1).astype(jnp.float32)  # [1, 2]
    return ws, wa, b14, w25, b25, w36, b36, H2P


def critic_forward(state, action, params, *,
                   batch_tile=256, compute_dtype=jnp.float32):
    """Pallas implementation of Critic.forward(state, action) -> (q1, q2).

    batch_tile: 256 for v6e/v7x, 128 recommended on v5e.
    compute_dtype: jnp.bfloat16 is the fast MXU path on v6e/v7x (f32 accumulate);
                   keep jnp.float32 on v5e or when exact f32 math is required.
    """
    B, state_dim = state.shape
    action_dim = action.shape[1]

    ws, wa, b14, w25, b25, w36, b36, H2P = _prepare_params(
        params, state_dim, compute_dtype)
    H1F = ws.shape[1]     # 2 * padded hidden-1
    H2F = w25.shape[1]    # 2 * padded hidden-2

    # Pad batch to full-sublane / full-tile rows; slice back afterwards.
    tb = min(batch_tile, _round_up(B, 8))
    Bp = _round_up(B, tb)
    s = state.astype(compute_dtype)
    a = action.astype(compute_dtype)
    if Bp != B:
        s = jnp.pad(s, ((0, Bp - B), (0, 0)))
        a = jnp.pad(a, ((0, Bp - B), (0, 0)))

    def kernel(s_ref, a_ref, ws_ref, wa_ref, b14_ref, w25_ref, b25_ref,
               w36_ref, b36_ref, out_ref):
        # Fused layer 1/4: state @ Ws + action @ Wa (no concat needed).
        h = (jnp.dot(s_ref[...], ws_ref[...], preferred_element_type=jnp.float32)
             + jnp.dot(a_ref[...], wa_ref[...], preferred_element_type=jnp.float32)
             + b14_ref[...])
        h = jnp.maximum(h, 0.0)

        # Fused block-diagonal layer 2/5.
        h = jnp.dot(h.astype(w25_ref.dtype), w25_ref[...],
                    preferred_element_type=jnp.float32) + b25_ref[...]
        h = jnp.maximum(h, 0.0)

        # Layer 3/6 as VPU multiply + lane reduction (MXU N=1 would be wasted).
        prod = h * w36_ref[...]
        q1 = jnp.sum(prod[:, :H2P], axis=-1, keepdims=True) + b36_ref[0:1, 0:1]
        q2 = jnp.sum(prod[:, H2P:], axis=-1, keepdims=True) + b36_ref[0:1, 1:2]
        out_ref[:, 0:1] = q1.astype(out_ref.dtype)
        out_ref[:, 1:2] = q2.astype(out_ref.dtype)

    vmem = pltpu.MemorySpace.VMEM
    grid = (Bp // tb,)
    in_specs = [
        # Batch-tiled activations.
        pl.BlockSpec((tb, state_dim), lambda i: (i, 0), memory_space=vmem),
        pl.BlockSpec((tb, action_dim), lambda i: (i, 0), memory_space=vmem),
        # Weights / biases: constant index_map -> VMEM-resident across steps.
        pl.BlockSpec((state_dim, H1F), lambda i: (0, 0), memory_space=vmem),
        pl.BlockSpec((action_dim, H1F), lambda i: (0, 0), memory_space=vmem),
        pl.BlockSpec((1, H1F), lambda i: (0, 0), memory_space=vmem),
        pl.BlockSpec((H1F, H2F), lambda i: (0, 0), memory_space=vmem),
        pl.BlockSpec((1, H2F), lambda i: (0, 0), memory_space=vmem),
        pl.BlockSpec((1, H2F), lambda i: (0, 0), memory_space=vmem),
        pl.BlockSpec((1, 2), lambda i: (0, 0), memory_space=vmem),
    ]
    out_specs = pl.BlockSpec((tb, 2), lambda i: (i, 0), memory_space=vmem)

    q12 = pl.pallas_call(
        kernel,
        out_shape=jax.ShapeDtypeStruct((Bp, 2), jnp.float32),
        grid=grid,
        in_specs=in_specs,
        out_specs=out_specs,
        compiler_params=pltpu.CompilerParams(
            dimension_semantics=("parallel",)),
    )(s, a, ws, wa, b14, w25, b25, w36, b36)

    q12 = q12[:B]
    return q12[:, 0:1], q12[:, 1:2]


def init_critic_params(key, state_dim, action_dim):
    """Deterministic synthetic parameters matching nn.Linear shapes.

    Weights are stored as [in_features, out_features] (transposed vs PyTorch).
    Biases are stored as [1, out_features].
    """
    d_in = state_dim + action_dim
    sizes = [
        (d_in, 400), (400, 300), (300, 1),   # l1, l2, l3
        (d_in, 400), (400, 300), (300, 1),   # l4, l5, l6
    ]
    params = []
    for i, (fi, fo) in enumerate(sizes):
        kw, kb = jax.random.split(jax.random.fold_in(key, i))
        bound = 1.0 / np.sqrt(fi)  # PyTorch nn.Linear default init range
        w = jax.random.uniform(kw, (fi, fo), jnp.float32, -bound, bound)
        b = jax.random.uniform(kb, (1, fo), jnp.float32, -bound, bound)
        params.extend([w, b])
    return tuple(params)


def critic_forward_ref(state, action, params):
    """Plain-JAX reference (mirrors the PyTorch forward exactly)."""
    x = jnp.concatenate([state, action], axis=1).astype(jnp.float32)
    (w1, b1, w2, b2, w3, b3, w4, b4, w5, b5, w6, b6) = params
    h1 = jax.nn.relu(x @ w1 + b1)
    h1 = jax.nn.relu(h1 @ w2 + b2)
    q1 = h1 @ w3 + b3
    h2 = jax.nn.relu(x @ w4 + b4)
    h2 = jax.nn.relu(h2 @ w5 + b5)
    q2 = h2 @ w6 + b6
    return q1, q2


if __name__ == "__main__":
    key = jax.random.PRNGKey(0)
    k_state, k_action, k_params, k_state2, k_action2 = jax.random.split(key, 5)

    state_dim, action_dim = 8, 8
    params = init_critic_params(k_params, state_dim, action_dim)

    # --- Small batch (B=4 -> padded to 8 rows), exact f32 path. ---
    B = 4
    state = jax.random.normal(k_state, (B, state_dim), jnp.float32)
    action = jax.random.normal(k_action, (B, action_dim), jnp.float32)
    q1, q2 = critic_forward(state, action, params, compute_dtype=jnp.float32)
    jax.block_until_ready((q1, q2))
    q1_ref, q2_ref = critic_forward_ref(state, action, params)
    assert q1.shape == (B, 1) and q2.shape == (B, 1)
    np.testing.assert_allclose(np.asarray(q1), np.asarray(q1_ref), rtol=1e-5, atol=1e-5)
    np.testing.assert_allclose(np.asarray(q2), np.asarray(q2_ref), rtol=1e-5, atol=1e-5)

    # --- Larger batch (exercises the batch grid + remainder padding), bf16 path. ---
    B2 = 300
    state2 = jax.random.normal(k_state2, (B2, state_dim), jnp.float32)
    action2 = jax.random.normal(k_action2, (B2, action_dim), jnp.float32)
    q1b, q2b = critic_forward(state2, action2, params,
                              batch_tile=256, compute_dtype=jnp.bfloat16)
    jax.block_until_ready((q1b, q2b))
    q1b_ref, q2b_ref = critic_forward_ref(state2, action2, params)
    assert q1b.shape == (B2, 1) and q2b.shape == (B2, 1)
    np.testing.assert_allclose(np.asarray(q1b), np.asarray(q1b_ref), rtol=5e-2, atol=5e-2)
    np.testing.assert_allclose(np.asarray(q2b), np.asarray(q2b_ref), rtol=5e-2, atol=5e-2)

    print("KERNEL_OK")
</pallas_src>

<mosaic_0001>
module attributes {stable_mosaic.version = 11 : i64} {
  func.func @kernel(%arg0: i32, %arg1: memref<8x8xf32, #tpu.memory_space<vmem>>, %arg2: memref<8x8xf32, #tpu.memory_space<vmem>>, %arg3: memref<8x1024xf32, #tpu.memory_space<vmem>>, %arg4: memref<8x1024xf32, #tpu.memory_space<vmem>>, %arg5: memref<1x1024xf32, #tpu.memory_space<vmem>>, %arg6: memref<1024x768xf32, #tpu.memory_space<vmem>>, %arg7: memref<1x768xf32, #tpu.memory_space<vmem>>, %arg8: memref<1x768xf32, #tpu.memory_space<vmem>>, %arg9: memref<1x2xf32, #tpu.memory_space<vmem>>, %arg10: memref<8x2xf32, #tpu.memory_space<vmem>>) attributes {dimension_semantics = [#tpu.dimension_semantics<parallel>], iteration_bounds = array<i64: 1>, scalar_prefetch = 0 : i64, scratch_operands = 0 : i64, tpu.core_type = #tpu.core_type<tc>, window_params = [{transform_indices = @transform_0, window_bounds = array<i64: 8, 8>}, {transform_indices = @transform_1, window_bounds = array<i64: 8, 8>}, {pipeline_mode = #tpu.pipeline_mode<synchronous>, transform_indices = @transform_2, window_bounds = array<i64: 8, 1024>}, {pipeline_mode = #tpu.pipeline_mode<synchronous>, transform_indices = @transform_3, window_bounds = array<i64: 8, 1024>}, {pipeline_mode = #tpu.pipeline_mode<synchronous>, transform_indices = @transform_4, window_bounds = array<i64: 1, 1024>}, {pipeline_mode = #tpu.pipeline_mode<synchronous>, transform_indices = @transform_5, window_bounds = array<i64: 1024, 768>}, {pipeline_mode = #tpu.pipeline_mode<synchronous>, transform_indices = @transform_6, window_bounds = array<i64: 1, 768>}, {pipeline_mode = #tpu.pipeline_mode<synchronous>, transform_indices = @transform_7, window_bounds = array<i64: 1, 768>}, {pipeline_mode = #tpu.pipeline_mode<synchronous>, transform_indices = @transform_8, window_bounds = array<i64: 1, 2>}, {transform_indices = @transform_9, window_bounds = array<i64: 8, 2>}]} {
    %c0 = arith.constant 0 : index
    %c0_0 = arith.constant 0 : index
    %0 = vector.load %arg1[%c0, %c0_0] : memref<8x8xf32, #tpu.memory_space<vmem>>, vector<8x8xf32>
    %c0_1 = arith.constant 0 : index
    %c0_2 = arith.constant 0 : index
    %1 = vector.load %arg3[%c0_1, %c0_2] : memref<8x1024xf32, #tpu.memory_space<vmem>>, vector<8x1024xf32>
    %cst = arith.constant dense<0.000000e+00> : vector<8x1024xf32>
    %2 = tpu.matmul %0, %1, %cst {dimension_numbers = #tpu.dot_dimension_numbers<[1], [0], [0], [1], [0, 0, 1, 1], [], []>} : vector<8x8xf32>, vector<8x1024xf32>, vector<8x1024xf32> -> vector<8x1024xf32>
    %c0_3 = arith.constant 0 : index
    %c0_4 = arith.constant 0 : index
    %3 = vector.load %arg2[%c0_3, %c0_4] : memref<8x8xf32, #tpu.memory_space<vmem>>, vector<8x8xf32>
    %c0_5 = arith.constant 0 : index
    %c0_6 = arith.constant 0 : index
    %4 = vector.load %arg4[%c0_5, %c0_6] : memref<8x1024xf32, #tpu.memory_space<vmem>>, vector<8x1024xf32>
    %cst_7 = arith.constant dense<0.000000e+00> : vector<8x1024xf32>
    %5 = tpu.matmul %3, %4, %cst_7 {dimension_numbers = #tpu.dot_dimension_numbers<[1], [0], [0], [1], [0, 0, 1, 1], [], []>} : vector<8x8xf32>, vector<8x1024xf32>, vector<8x1024xf32> -> vector<8x1024xf32>
    %6 = arith.addf %2, %5 : vector<8x1024xf32>
    %c0_8 = arith.constant 0 : index
    %c0_9 = arith.constant 0 : index
    %7 = vector.load %arg5[%c0_8, %c0_9] : memref<1x1024xf32, #tpu.memory_space<vmem>>, vector<1x1024xf32>
    %8 = vector.broadcast %7 : vector<1x1024xf32> to vector<8x1024xf32>
    %9 = arith.addf %6, %8 : vector<8x1024xf32>
    %cst_10 = arith.constant 0.000000e+00 : f32
    %10 = vector.broadcast %cst_10 : f32 to vector<8x1024xf32>
    %11 = arith.maximumf %9, %10 : vector<8x1024xf32>
    %c0_11 = arith.constant 0 : index
    %c0_12 = arith.constant 0 : index
    %12 = vector.load %arg6[%c0_11, %c0_12] : memref<1024x768xf32, #tpu.memory_space<vmem>>, vector<1024x768xf32>
    %cst_13 = arith.constant dense<0.000000e+00> : vector<8x768xf32>
    %13 = tpu.matmul %11, %12, %cst_13 {dimension_numbers = #tpu.dot_dimension_numbers<[1], [0], [0], [1], [0, 0, 1, 1], [], []>} : vector<8x1024xf32>, vector<1024x768xf32>, vector<8x768xf32> -> vector<8x768xf32>
    %c0_14 = arith.constant 0 : index
    %c0_15 = arith.constant 0 : index
    %14 = vector.load %arg7[%c0_14, %c0_15] : memref<1x768xf32, #tpu.memory_space<vmem>>, vector<1x768xf32>
    %15 = vector.broadcast %14 : vector<1x768xf32> to vector<8x768xf32>
    %16 = arith.addf %13, %15 : vector<8x768xf32>
    %cst_16 = arith.constant 0.000000e+00 : f32
    %17 = vector.broadcast %cst_16 : f32 to vector<8x768xf32>
    %18 = arith.maximumf %16, %17 : vector<8x768xf32>
    %c0_17 = arith.constant 0 : index
    %c0_18 = arith.constant 0 : index
    %19 = vector.load %arg8[%c0_17, %c0_18] : memref<1x768xf32, #tpu.memory_space<vmem>>, vector<1x768xf32>
    %20 = vector.broadcast %19 : vector<1x768xf32> to vector<8x768xf32>
    %21 = arith.mulf %18, %20 : vector<8x768xf32>
    %22 = vector.extract_strided_slice %21 {offsets = [0, 0], sizes = [8, 384], strides = [1, 1]} : vector<8x768xf32> to vector<8x384xf32>
    %cst_19 = arith.constant dense<0.000000e+00> : vector<8xf32>
    %23 = vector.multi_reduction <add>, %22, %cst_19 [1] : vector<8x384xf32> to vector<8xf32>
    %24 = vector.shape_cast %23 : vector<8xf32> to vector<8x1xf32>
    %c0_20 = arith.constant 0 : index
    %c0_21 = arith.constant 0 : index
    %25 = vector.load %arg9[%c0_20, %c0_21] : memref<1x2xf32, #tpu.memory_space<vmem>>, vector<1x1xf32>
    %26 = vector.broadcast %25 : vector<1x1xf32> to vector<8x1xf32>
    %27 = arith.addf %24, %26 : vector<8x1xf32>
    %28 = vector.extract_strided_slice %21 {offsets = [0, 384], sizes = [8, 384], strides = [1, 1]} : vector<8x768xf32> to vector<8x384xf32>
    %cst_22 = arith.constant dense<0.000000e+00> : vector<8xf32>
    %29 = vector.multi_reduction <add>, %28, %cst_22 [1] : vector<8x384xf32> to vector<8xf32>
    %30 = vector.shape_cast %29 : vector<8xf32> to vector<8x1xf32>
    %c0_23 = arith.constant 0 : index
    %c1 = arith.constant 1 : index
    %31 = vector.load %arg9[%c0_23, %c1] : memref<1x2xf32, #tpu.memory_space<vmem>>, vector<1x1xf32>
    %32 = vector.broadcast %31 : vector<1x1xf32> to vector<8x1xf32>
    %33 = arith.addf %30, %32 : vector<8x1xf32>
    %c0_24 = arith.constant 0 : index
    %c0_25 = arith.constant 0 : index
    %34 = vector.load %arg10[%c0_24, %c0_25] : memref<8x2xf32, #tpu.memory_space<vmem>>, vector<8x1xf32>
    tpu.vector_store %arg10[%c0_24, %c0_25], %27 {strides = array<i32>} : memref<8x2xf32, #tpu.memory_space<vmem>>, vector<8x1xf32>,
    %c0_26 = arith.constant 0 : index
    %c1_27 = arith.constant 1 : index
    %35 = vector.load %arg10[%c0_26, %c1_27] : memref<8x2xf32, #tpu.memory_space<vmem>>, vector<8x1xf32>
    tpu.vector_store %arg10[%c0_26, %c1_27], %33 {strides = array<i32>} : memref<8x2xf32, #tpu.memory_space<vmem>>, vector<8x1xf32>,
    return
  }
  func.func @transform_0(%arg0: i32) -> (i32, i32) {
    %c0_i32 = arith.constant 0 : i32
    %c0_i32_0 = arith.constant 0 : i32
    return %arg0, %c0_i32 : i32, i32
  }
  func.func @transform_1(%arg0: i32) -> (i32, i32) {
    %c0_i32 = arith.constant 0 : i32
    %c0_i32_0 = arith.constant 0 : i32
    return %arg0, %c0_i32 : i32, i32
  }
  func.func @transform_2(%arg0: i32) -> (i32, i32) {
    %c0_i32 = arith.constant 0 : i32
    %c0_i32_0 = arith.constant 0 : i32
    %c0_i32_1 = arith.constant 0 : i32
    return %c0_i32, %c0_i32_0 : i32, i32
  }
  func.func @transform_3(%arg0: i32) -> (i32, i32) {
    %c0_i32 = arith.constant 0 : i32
    %c0_i32_0 = arith.constant 0 : i32
    %c0_i32_1 = arith.constant 0 : i32
    return %c0_i32, %c0_i32_0 : i32, i32
  }
  func.func @transform_4(%arg0: i32) -> (i32, i32) {
    %c0_i32 = arith.constant 0 : i32
    %c0_i32_0 = arith.constant 0 : i32
    %c0_i32_1 = arith.constant 0 : i32
    return %c0_i32, %c0_i32_0 : i32, i32
  }
  func.func @transform_5(%arg0: i32) -> (i32, i32) {
    %c0_i32 = arith.constant 0 : i32
    %c0_i32_0 = arith.constant 0 : i32
    %c0_i32_1 = arith.constant 0 : i32
    return %c0_i32, %c0_i32_0 : i32, i32
  }
  func.func @transform_6(%arg0: i32) -> (i32, i32) {
    %c0_i32 = arith.constant 0 : i32
    %c0_i32_0 = arith.constant 0 : i32
    %c0_i32_1 = arith.constant 0 : i32
    return %c0_i32, %c0_i32_0 : i32, i32
  }
  func.func @transform_7(%arg0: i32) -> (i32, i32) {
    %c0_i32 = arith.constant 0 : i32
    %c0_i32_0 = arith.constant 0 : i32
    %c0_i32_1 = arith.constant 0 : i32
    return %c0_i32, %c0_i32_0 : i32, i32
  }
  func.func @transform_8(%arg0: i32) -> (i32, i32) {
    %c0_i32 = arith.constant 0 : i32
    %c0_i32_0 = arith.constant 0 : i32
    %c0_i32_1 = arith.constant 0 : i32
    return %c0_i32, %c0_i32_0 : i32, i32
  }
  func.func @transform_9(%arg0: i32) -> (i32, i32) {
    %c0_i32 = arith.constant 0 : i32
    %c0_i32_0 = arith.constant 0 : i32
    return %arg0, %c0_i32 : i32, i32
  }
}

</mosaic_0001>

<bundles_post_ra>
// kernel: tpu_custom_call.1
= control target key start
LH: loop header
LB: loop body
LE: loop exit
PB: predicated region body
PF: predicated region fallthrough
CT: control target
= control target key end

     0   :  { %14 = vsyncpa [#allocation3], 0  ;;  %s3831_s0 = inlined_call_operand.hbm [shape: f32[8,8], index: 0, kind: input, shape index: {}]   ;;  %s3832_s1 = inlined_call_operand.hbm [shape: f32[8,8], index: 1, kind: input, shape index: {}]   ;;  %s3833_s2 = inlined_call_operand.hbm [shape: f32[8,1024], index: 2, kind: input, shape index: {}]   ;;  %s3834_s3 = inlined_call_operand.hbm [shape: f32[8,1024], index: 3, kind: input, shape index: {}]   ;;  %s3835_s4 = inlined_call_operand.hbm [shape: f32[1,1024], index: 4, kind: input, shape index: {}]   ;;  %s3836_s5 = inlined_call_operand.hbm [shape: f32[1024,768], index: 5, kind: input, shape index: {}]   ;;  %s3837_s6 = inlined_call_operand.hbm [shape: f32[1,768], index: 6, kind: input, shape index: {}]   ;;  %s3838_s7 = inlined_call_operand.hbm [shape: f32[1,768], index: 7, kind: input, shape index: {}]   ;;  %s3839_s8 = inlined_call_operand.hbm [shape: f32[1,2], index: 8, kind: input, shape index: {}]   ;;  %s3840_s9 = inlined_call_operand.vmem [shape: f32[8,2], index: 9, kind: output, shape index: {}]  }
   0x1   :  { %15 = vsyncpa [#allocation5], 0 }
   0x2   :  { %16 = vsyncpa [#allocation8], 0 }
   0x3   :  { %17 = vsyncpa [#allocation11], 0 }
   0x4   :  { %18 = vsyncpa [#allocation14], 0  ;;  %s3544_s30 = smov [#allocation4]   ;;  %s3545_s11 = smov [#allocation7]  }
   0x5   :  { %s35_s10 = sshll.u32 %s3544_s30, 4  ;;  %s55_s12 = sshll.u32 %s3545_s11, 4  ;;  %s36_s10 = int_to_ptr.vmem [resolvable:$true] %s35_s10  ;;  %s56_s12 = int_to_ptr.vmem [resolvable:$true] %s55_s12 }
   0x6   :  { %s3336_s15 = scalar_lea.hbm %s3832_s1, 128 }
   0x7   :  { %p3337_p0 = scmp.ne.s32.totalorder %s3832_s1, %s3336_s15  ;;  %p3340_p1 = scmp.lt.u32.totalorder %s3336_s15, %s3832_s1 }
   0x9   :  { %p3342_p2 = pnand %p3340_p1, %p3337_p0 }
   0xb   :  { %3345 = shalt.err (!%p3342_p2)
}
   0xc   :  { %s3346_s20 = scalar_lea.vmem %s36_s10, 128  ;;  %p3351_p4 = scmp.lt.s32.totalorder %s36_s10, %s36_s10 }
   0xd   :  { %p3347_p3 = scmp.ne.s32.totalorder %s36_s10, %s3346_s20  ;;  %p3352_p5 = scmp.lt.s32.totalorder %s3346_s20, %s3346_s20 }
   0xf   :  { %p3353_p6 = por %p3352_p5, %p3351_p4 }
  0x11   :  { %p3354_p7 = pnand %p3353_p6, %p3347_p3 }
  0x13   :  { %3357 = shalt.err (!%p3354_p7)
}
  0x14   :  { %38 = dma.hbm_to_vmem [thread:$0]  %s3832_s1, 128, %s36_s10, [#allocation5]  }
  0x15   :  { %s3358_s25 = scalar_lea.hbm %s3834_s3, 1024 }
  0x16   :  { %p3359_p8 = scmp.ne.s32.totalorder %s3834_s3, %s3358_s25  ;;  %p3362_p9 = scmp.lt.u32.totalorder %s3358_s25, %s3834_s3 }
  0x18   :  { %p3364_p10 = pnand %p3362_p9, %p3359_p8 }
  0x1a   :  { %3367 = shalt.err (!%p3364_p10)
}
  0x1b   :  { %s3368_s30 = scalar_lea.vmem %s56_s12, 1024  ;;  %p3373_p12 = scmp.lt.s32.totalorder %s56_s12, %s56_s12 }
  0x1c   :  { %p3369_p11 = scmp.ne.s32.totalorder %s56_s12, %s3368_s30  ;;  %p3374_p13 = scmp.lt.s32.totalorder %s3368_s30, %s3368_s30 }
  0x1e   :  { %p3375_p0 = por %p3374_p13, %p3373_p12 }
  0x20   :  { %p3376_p1 = pnand %p3375_p0, %p3369_p11 }
  0x22   :  { %3379 = shalt.err (!%p3376_p1)
}
  0x23   :  { %58 = dma.hbm_to_vmem [thread:$0]  %s3834_s3, 1024, %s56_s12, [#allocation8]  }
  0x24   :  { %s3546_s11 = smov [#allocation10]   ;;  %s3380_s16 = scalar_lea.hbm %s3836_s5, 98304 }
  0x25   :  { %s74_s13 = sshll.u32 %s3546_s11, 4  ;;  %p3381_p2 = scmp.ne.s32.totalorder %s3836_s5, %s3380_s16  ;;  %s75_s13 = int_to_ptr.vmem [resolvable:$true] %s74_s13 }
  0x26   :  { %p3384_p3 = scmp.lt.u32.totalorder %s3380_s16, %s3836_s5 }
  0x28   :  { %p3386_p4 = pnand %p3384_p3, %p3381_p2 }
  0x2a   :  { %3389 = shalt.err (!%p3386_p4)
}
  0x2b   :  { %s3390_s21 = scalar_lea.vmem %s75_s13, 98304  ;;  %p3395_p6 = scmp.lt.s32.totalorder %s75_s13, %s75_s13 }
  0x2c   :  { %p3391_p5 = scmp.ne.s32.totalorder %s75_s13, %s3390_s21  ;;  %p3396_p7 = scmp.lt.s32.totalorder %s3390_s21, %s3390_s21 }
  0x2e   :  { %p3397_p8 = por %p3396_p7, %p3395_p6 }
  0x30   :  { %p3398_p9 = pnand %p3397_p8, %p3391_p5 }
  0x32   :  { %3401 = shalt.err (!%p3398_p9)
}
  0x33   :  { %s3547_s3 = smov 768   ;;  %s3548_s12 = smov 48  }
  0x34   :  { %80 = dma.hbm_to_vmem [thread:$0]  %s3836_s5, 98304, %s75_s13, [#allocation11], %s3547_s3, %s3547_s3, %s3548_s12  }
  0x35   :  { %s3549_s24 = smov [#allocation13]   ;;  %s3550_s26 = smov [#allocation2]  }
  0x36   :  { %s97_s25 = sshll.u32 %s3549_s24, 4  ;;  %s25_s27 = sshll.u32 %s3550_s26, 4  ;;  %s98_s25 = int_to_ptr.vmem [resolvable:$true] %s97_s25  ;;  %s26_s27 = int_to_ptr.vmem [resolvable:$true] %s25_s27 }
  0x37   :  { %s3402_s30 = scalar_lea.hbm %s3838_s7, 96 }
  0x38   :  { %p3403_p10 = scmp.ne.s32.totalorder %s3838_s7, %s3402_s30  ;;  %p3406_p11 = scmp.lt.u32.totalorder %s3402_s30, %s3838_s7 }
  0x3a   :  { %p3408_p12 = pnand %p3406_p11, %p3403_p10 }
  0x3c   :  { %3411 = shalt.err (!%p3408_p12)
}
  0x3d   :  { %s3412_s5 = scalar_lea.vmem %s98_s25, 96  ;;  %p3417_p0 = scmp.lt.s32.totalorder %s98_s25, %s98_s25 }
  0x3e   :  { %p3413_p13 = scmp.ne.s32.totalorder %s98_s25, %s3412_s5  ;;  %p3418_p1 = scmp.lt.s32.totalorder %s3412_s5, %s3412_s5 }
  0x40   :  { %p3419_p2 = por %p3418_p1, %p3417_p0 }
  0x42   :  { %p3420_p3 = pnand %p3419_p2, %p3413_p13 }
  0x44   :  { %3423 = shalt.err (!%p3420_p3)
}
  0x45   :  { %100 = dma.hbm_to_vmem [thread:$0]  %s3838_s7, 96, %s98_s25, [#allocation14]  }
  0x46   :  { %s3424_s18 = scalar_lea.hbm %s3831_s0, 128 }
  0x47   :  { %p3425_p4 = scmp.ne.s32.totalorder %s3831_s0, %s3424_s18  ;;  %p3428_p5 = scmp.lt.u32.totalorder %s3424_s18, %s3831_s0 }
  0x49   :  { %p3430_p6 = pnand %p3428_p5, %p3425_p4 }
  0x4b   :  { %3433 = shalt.err (!%p3430_p6)
}
  0x4c   :  { %s3434_s12 = scalar_lea.vmem %s26_s27, 128  ;;  %p3439_p8 = scmp.lt.s32.totalorder %s26_s27, %s26_s27 }
  0x4d   :  { %p3435_p7 = scmp.ne.s32.totalorder %s26_s27, %s3434_s12  ;;  %p3440_p9 = scmp.lt.s32.totalorder %s3434_s12, %s3434_s12 }
  0x4f   :  { %p3441_p10 = por %p3440_p9, %p3439_p8 }
  0x51   :  { %p3442_p11 = pnand %p3441_p10, %p3435_p7 }
  0x53   :  { %3445 = shalt.err (!%p3442_p11)
}
  0x54   :  { %28 = dma.hbm_to_vmem [thread:$0]  %s3831_s0, 128, %s26_s27, [#allocation3]  }
  0x55   :  { %s3551_s23 = smov [#allocation6]   ;;  %s3552_s25 = smov [#allocation9]  }
  0x56   :  { %s45_s24 = sshll.u32 %s3551_s23, 4  ;;  %s65_s26 = sshll.u32 %s3552_s25, 4  ;;  %s46_s24 = int_to_ptr.vmem [resolvable:$true] %s45_s24  ;;  %s66_s26 = int_to_ptr.vmem [resolvable:$true] %s65_s26 }
  0x57   :  { %s3446_s30 = scalar_lea.hbm %s3833_s2, 1024 }
  0x58   :  { %p3447_p12 = scmp.ne.s32.totalorder %s3833_s2, %s3446_s30  ;;  %p3450_p13 = scmp.lt.u32.totalorder %s3446_s30, %s3833_s2 }
  0x5a   :  { %p3452_p0 = pnand %p3450_p13, %p3447_p12 }
  0x5c   :  { %3455 = shalt.err (!%p3452_p0)
}
  0x5d   :  { %s3456_s0 = scalar_lea.vmem %s46_s24, 1024  ;;  %p3461_p2 = scmp.lt.s32.totalorder %s46_s24, %s46_s24 }
  0x5e   :  { %p3457_p1 = scmp.ne.s32.totalorder %s46_s24, %s3456_s0  ;;  %p3462_p3 = scmp.lt.s32.totalorder %s3456_s0, %s3456_s0 }
  0x60   :  { %p3463_p4 = por %p3462_p3, %p3461_p2 }
  0x62   :  { %p3464_p5 = pnand %p3463_p4, %p3457_p1 }
  0x64   :  { %3467 = shalt.err (!%p3464_p5)
}
  0x65   :  { %48 = dma.hbm_to_vmem [thread:$0]  %s3833_s2, 1024, %s46_s24, [#allocation5]  }
  0x66   :  { %s3468_s16 = scalar_lea.hbm %s3835_s4, 128 }
  0x67   :  { %p3469_p6 = scmp.ne.s32.totalorder %s3835_s4, %s3468_s16  ;;  %p3472_p7 = scmp.lt.u32.totalorder %s3468_s16, %s3835_s4 }
  0x69   :  { %p3474_p8 = pnand %p3472_p7, %p3469_p6 }
  0x6b   :  { %3477 = shalt.err (!%p3474_p8)
}
  0x6c   :  { %s3478_s21 = scalar_lea.vmem %s66_s26, 128  ;;  %p3483_p10 = scmp.lt.s32.totalorder %s66_s26, %s66_s26 }
  0x6d   :  { %p3479_p9 = scmp.ne.s32.totalorder %s66_s26, %s3478_s21  ;;  %p3484_p11 = scmp.lt.s32.totalorder %s3478_s21, %s3478_s21 }
  0x6f   :  { %p3485_p12 = por %p3484_p11, %p3483_p10 }
  0x71   :  { %p3486_p13 = pnand %p3485_p12, %p3479_p9 }
  0x73   :  { %3489 = shalt.err (!%p3486_p13)
}
  0x74   :  { %68 = dma.hbm_to_vmem [thread:$0]  %s3835_s4, 128, %s66_s26, [#allocation8]  }
  0x75   :  { %s3553_s12 = smov [#allocation12]   ;;  %s3554_s22 = smov [#allocation15]  }
  0x76   :  { %s87_s7 = sshll.u32 %s3553_s12, 4  ;;  %s107_s23 = sshll.u32 %s3554_s22, 4  ;;  %s88_s7 = int_to_ptr.vmem [resolvable:$true] %s87_s7  ;;  %s108_s23 = int_to_ptr.vmem [resolvable:$true] %s107_s23 }
  0x77   :  { %s3490_s28 = scalar_lea.hbm %s3837_s6, 96 }
  0x78   :  { %p3491_p0 = scmp.ne.s32.totalorder %s3837_s6, %s3490_s28  ;;  %p3494_p1 = scmp.lt.u32.totalorder %s3490_s28, %s3837_s6 }
  0x7a   :  { %p3496_p2 = pnand %p3494_p1, %p3491_p0 }
  0x7c   :  { %3499 = shalt.err (!%p3496_p2)
}
  0x7d   :  { %s3500_s4 = scalar_lea.vmem %s88_s7, 96  ;;  %p3505_p4 = scmp.lt.s32.totalorder %s88_s7, %s88_s7 }
  0x7e   :  { %p3501_p3 = scmp.ne.s32.totalorder %s88_s7, %s3500_s4  ;;  %p3506_p5 = scmp.lt.s32.totalorder %s3500_s4, %s3500_s4 }
  0x80   :  { %p3507_p6 = por %p3506_p5, %p3505_p4 }
  0x82   :  { %p3508_p7 = pnand %p3507_p6, %p3501_p3 }
  0x84   :  { %3511 = shalt.err (!%p3508_p7)
}
  0x85   :  { %90 = dma.hbm_to_vmem [thread:$0]  %s3837_s6, 96, %s88_s7, [#allocation11]  }
  0x86   :  { %s3512_s27 = scalar_lea.hbm %s3839_s8, 16 }
  0x87   :  { %p3513_p8 = scmp.ne.s32.totalorder %s3839_s8, %s3512_s27  ;;  %p3516_p9 = scmp.lt.u32.totalorder %s3512_s27, %s3839_s8 }
  0x89   :  { %p3518_p10 = pnand %p3516_p9, %p3513_p8 }
  0x8b   :  { %3521 = shalt.err (!%p3518_p10)
}
  0x8c   :  { %s3522_s17 = scalar_lea.vmem %s108_s23, 16  ;;  %s3526_s18 = scalar_lea.vmem %s108_s23, 32 }
  0x8d   :  { %p3523_p11 = scmp.ne.s32.totalorder %s108_s23, %s3522_s17  ;;  %p3527_p12 = scmp.lt.s32.totalorder %s108_s23, %s108_s23 }
  0x8e   :  { %p3528_p13 = scmp.lt.s32.totalorder %s3526_s18, %s3522_s17 }
  0x90   :  { %p3529_p0 = por %p3528_p13, %p3527_p12 }
  0x92   :  { %p3530_p1 = pnand %p3529_p0, %p3523_p11 }
  0x94   :  { %3533 = shalt.err (!%p3530_p1)
}
  0x95   :  { %110 = dma.hbm_to_vmem [thread:$0]  %s3839_s8, 16, %s108_s23, [#allocation14]  }
  0x96   :  { %3534 = dma.done.wait [#allocation3], 128  }
  0x97   :  { %3535 = vsyncadd [#allocation3], 4294967168 }
  0x98   :  { %3536 = dma.done.wait [#allocation5], 1152  }
  0x99   :  { %3537 = vsyncadd [#allocation5], 4294966144 }
  0x9a   :  { %3538 = dma.done.wait [#allocation8], 1152  }
  0x9b   :  { %3539 = vsyncadd [#allocation8], 4294966144 }
  0x9c   :  { %3540 = dma.done.wait [#allocation11], 98400  }
  0x9d   :  { %3541 = vsyncadd [#allocation11], 4294868896 }
  0x9e   :  { %3542 = dma.done.wait [#allocation14], 112  }
  0x9f   :  { %3543 = vsyncadd [#allocation14], 4294967184  ;;  %v3555_v0 = vmov 0.0   ;;  %v149_v1 = vld [vmem:[#allocation7 + $0x8] sm:$0xff]  ;;  %v148_v2 = vld [vmem:[#allocation7] sm:$0xff]  ;;  %vm156_vm0 = vcmask 64512  }
  0xa0   :  { %224 = vmatprep.mubr.f32.mxu0 %v3555_v0  ;;  %295 = vmatprep.mubr.f32.mxu1 %v3555_v0  ;;  %v147_v3 = vld [vmem:[#allocation4] sm:$0xff]  ;;  %v153_v4 = vld [vmem:[#allocation7 + $0x28] sm:$0xff]  ;;  %v152_v5 = vld [vmem:[#allocation7 + $0x20] sm:$0xff]  ;;  %vm2502_vm1 = vcmask 7168   ;;  %vm2504_vm2 = vcmask 15368  }
  0xa1   :  { %160 = vmatprep.subr.mxu0 %v149_v1  ;;  %v140_v6 = vld [vmem:[#allocation6 + $0x8] sm:$0xff]  ;;  %v151_v7 = vld [vmem:[#allocation7 + $0x18] sm:$0xff]  ;;  %v150_v8 = vld [vmem:[#allocation7 + $0x10] sm:$0xff] }
  0xa2   :  { %161 = vmatpush1.msra.mxu0 %v148_v2  ;;  %v139_v9 = vld [vmem:[#allocation6] sm:$0xff]  ;;  %231 = vmatprep.subr.mxu1 %v151_v7  ;;  %v144_v10 = vld [vmem:[#allocation6 + $0x28] sm:$0xff]  ;;  %v155_v11 = vld [vmem:[#allocation7 + $0x38] sm:$0xff] }
  0xa3   :  { %2515 = vmatmul.mubr.msk.f32.vlgmr.msra.gmra.mrb[0].mxu0 %vm156_vm0, %v147_v3  ;;  %302 = vmatprep.subr.mxu0 %v153_v4  ;;  %v154_v12 = vld [vmem:[#allocation7 + $0x30] sm:$0xff]  ;;  %v1180_v15 = vld [vmem:[#allocation10 + $0xc38] sm:$0xff]  ;;  %v142_v17 = vld [vmem:[#allocation6 + $0x18] sm:$0xff] }
  0xa4   :  { %303 = vmatpush1.msra.mxu0 %v152_v5  ;;  %366 = vmatprep.mubr.f32.mxu0 %v3555_v0  ;;  %v138_v13 = vld [vmem:[#allocation2] sm:$0xff]  ;;  %v143_v16 = vld [vmem:[#allocation6 + $0x20] sm:$0xff]  ;;  %v1173_v21 = vld [vmem:[#allocation10 + $0xc00] sm:$0xff] }
  0xa5   :  { %447 = vmatprep.subr.mxu0 %v140_v6  ;;  %232 = vmatpush1.msra.mxu1 %v150_v8  ;;  %v1174_v14 = vld [vmem:[#allocation10 + $0xc08] sm:$0xff]  ;;  %v1179_v22 = vld [vmem:[#allocation10 + $0xc30] sm:$0xff]  ;;  %v796_v23 = vld [vmem:[#allocation10 + $0x38] sm:$0xff] }
  0xa6   :  { %2516 = vmatmul.mubr.msk.f32.vlgmr.msra.gmra.mrb[0].mxu1 %vm156_vm0, %v147_v3  ;;  %373 = vmatprep.subr.mxu1 %v155_v11  ;;  %v141_v18 = vld [vmem:[#allocation6 + $0x10] sm:$0xff]  ;;  %v2652_v20 = vpack.c.bf16 %v1180_v15, %v1174_v14  ;;  %v1192_v25 = vld [vmem:[#allocation10 + $0xc98] sm:$0xff]  ;;  %v146_v26 = vld [vmem:[#allocation6 + $0x38] sm:$0xff]  ;;  %v2654_v31 = vpack.c.bf16 %v1179_v22, %v1173_v21 }
  0xa7   :  { %2517 = vmatmul.mubr.msk.f32.vlgmr.msra.gmra.mrb[2].mxu0 %vm156_vm0, %v147_v3  ;;  %374 = vmatpush1.msra.mxu1 %v154_v12  ;;  %v790_v19 = vld [vmem:[#allocation10 + $0x8] sm:$0xff]  ;;  %v789_v28 = vld [vmem:[#allocation10] sm:$0xff]  ;;  %v795_v29 = vld [vmem:[#allocation10 + $0x30] sm:$0xff] }
  0xa8   :  { %448 = vmatpush1.msra.mxu0 %v139_v9  ;;  %511 = vmatprep.mubr.f32.mxu0 %v3555_v0  ;;  %v1186_v24 = vld [vmem:[#allocation10 + $0xc68] sm:$0xff]  ;;  %v2524_v32 = vpack.c.bf16 %v796_v23, %v790_v19  ;;  %v808_v33 = vld [vmem:[#allocation10 + $0x98] sm:$0xff]  ;;  %v1185_v35 = vld [vmem:[#allocation10 + $0xc60] sm:$0xff]  ;;  %v2526_v39 = vpack.c.bf16 %v795_v29, %v789_v28 }
  0xa9   :  { %589 = vmatprep.subr.mxu0 %v144_v10  ;;  %437 = vmatprep.mubr.f32.mxu1 %v3555_v0  ;;  %v145_v27 = vld [vmem:[#allocation6 + $0x30] sm:$0xff]  ;;  %v2656_v34 = vpack.c.bf16 %v1192_v25, %v1186_v24  ;;  %v1191_v36 = vld [vmem:[#allocation10 + $0xc90] sm:$0xff]  ;;  %v1204_v38 = vld [vmem:[#allocation10 + $0xcf8] sm:$0xff] }
  0xaa   :  { %2518 = vmatmul.mubr.msk.f32.vlgmr.msra.gmra.mrb[2].mxu1 %vm156_vm0, %v147_v3  ;;  %518 = vmatprep.subr.mxu1 %v142_v17  ;;  %v802_v30 = vld [vmem:[#allocation10 + $0x68] sm:$0xff]  ;;  %v801_v41 = vld [vmem:[#allocation10 + $0x60] sm:$0xff]  ;;  %v807_v42 = vld [vmem:[#allocation10 + $0x90] sm:$0xff]  ;;  %v2658_v44 = vpack.c.bf16 %v1191_v36, %v1185_v35 }
  0xab   :  { %2519 = vmatmul.mubr.msk.f32.vlgmr.msra.gmra.mrb[0].mxu0 %vm156_vm0, %v138_v13  ;;  %582 = vmatprep.mubr.f32.mxu1 %v3555_v0  ;;  %v1198_v37 = vld [vmem:[#allocation10 + $0xcc8] sm:$0xff]  ;;  %v2528_v40 = vpack.c.bf16 %v808_v33, %v802_v30  ;;  %v820_v45 = vld [vmem:[#allocation10 + $0xf8] sm:$0xff]  ;;  %v1197_v47 = vld [vmem:[#allocation10 + $0xcc0] sm:$0xff]  ;;  %v2530_v51 = vpack.c.bf16 %v807_v42, %v801_v41 }
  0xac   :  { %590 = vmatpush1.msra.mxu0 %v143_v16  ;;  %653 = vmatprep.mubr.f32.mxu0 %v3555_v0  ;;  %v814_v43 = vld [vmem:[#allocation10 + $0xc8] sm:$0xff]  ;;  %v2660_v46 = vpack.c.bf16 %v1204_v38, %v1198_v37  ;;  %v1203_v48 = vld [vmem:[#allocation10 + $0xcf0] sm:$0xff]  ;;  %v1216_v50 = vld [vmem:[#allocation10 + $0xd58] sm:$0xff] }
  0xad   :  { %519 = vmatpush1.msra.mxu1 %v141_v18  ;;  %2653 = vmatprep.subr.bf16.mxu0 %v2652_v20  ;;  %v1210_v49 = vld [vmem:[#allocation10 + $0xd28] sm:$0xff]  ;;  %v2532_v52 = vpack.c.bf16 %v820_v45, %v814_v43  ;;  %v813_v53 = vld [vmem:[#allocation10 + $0xc0] sm:$0xff]  ;;  %v819_v54 = vld [vmem:[#allocation10 + $0xf0] sm:$0xff]  ;;  %v2662_v56 = vpack.c.bf16 %v1203_v48, %v1197_v47 }
  0xae   :  { %2520 = vmatmul.mubr.msk.f32.vlgmr.msra.gmra.mrb[0].mxu1 %vm156_vm0, %v138_v13  ;;  %660 = vmatprep.subr.mxu1 %v146_v26  ;;  %v826_v55 = vld [vmem:[#allocation10 + $0x128] sm:$0xff]  ;;  %v832_v57 = vld [vmem:[#allocation10 + $0x158] sm:$0xff]  ;;  %v2664_v58 = vpack.c.bf16 %v1216_v50, %v1210_v49  ;;  %v1209_v59 = vld [vmem:[#allocation10 + $0xd20] sm:$0xff]  ;;  %v2534_v63 = vpack.c.bf16 %v819_v54, %v813_v53 }
  0xaf   :  { %2521 = vmatmul.mubr.msk.f32.vlgmr.msra.gmra.mrb[2].mxu0 %vm156_vm0, %v138_v13  ;;  %724 = vmatprep.mubr.f32.mxu1 %v3555_v0  ;;  %v1215_v60 = vld [vmem:[#allocation10 + $0xd50] sm:$0xff]  ;;  %v1222_v61 = vld [vmem:[#allocation10 + $0xd88] sm:$0xff]  ;;  %v1228_v62 = vld [vmem:[#allocation10 + $0xdb8] sm:$0xff]  ;;  %v2536_v0 = vpack.c.bf16 %v832_v57, %v826_v55 }
  0xb0   :  { %661 = vmatpush1.msra.mxu1 %v145_v27  ;;  %2655 = vmatpush1.bf16.msra.mxu0 %v2654_v31  ;;  %v825_v1 = vld [vmem:[#allocation10 + $0x120] sm:$0xff]  ;;  %v831_v2 = vld [vmem:[#allocation10 + $0x150] sm:$0xff]  ;;  %v838_v3 = vld [vmem:[#allocation10 + $0x188] sm:$0xff]  ;;  %v2666_v4 = vpack.c.bf16 %v1215_v60, %v1209_v59  ;;  %v2668_v6 = vpack.c.bf16 %v1228_v62, %v1222_v61 }
  0xb1   :  { %2525 = vmatprep.subr.bf16.mxu1 %v2524_v32  ;;  %2657 = vmatprep.subr.bf16.mxu0 %v2656_v34  ;;  %v844_v5 = vld [vmem:[#allocation10 + $0x1b8] sm:$0xff]  ;;  %v1221_v7 = vld [vmem:[#allocation10 + $0xd80] sm:$0xff]  ;;  %v1227_v8 = vld [vmem:[#allocation10 + $0xdb0] sm:$0xff]  ;;  %v2538_v11 = vpack.c.bf16 %v831_v2, %v825_v1 }
  0xb2   :  { %2522 = vmatmul.mubr.msk.f32.vlgmr.msra.gmra.mrb[2].mxu1 %vm156_vm0, %v138_v13  ;;  %v1234_v9 = vld [vmem:[#allocation10 + $0xde8] sm:$0xff]  ;;  %v1240_v10 = vld [vmem:[#allocation10 + $0xe18] sm:$0xff]  ;;  %v2540_v12 = vpack.c.bf16 %v844_v5, %v838_v3  ;;  %v837_v13 = vld [vmem:[#allocation10 + $0x180] sm:$0xff]  ;;  %v2670_v16 = vpack.c.bf16 %v1227_v8, %v1221_v7 }
  0xb3   :  { %2527 = vmatpush1.bf16.msra.mxu1 %v2526_v39  ;;  %v843_v14 = vld [vmem:[#allocation10 + $0x1b0] sm:$0xff]  ;;  %v850_v15 = vld [vmem:[#allocation10 + $0x1e8] sm:$0xff]  ;;  %v856_v17 = vld [vmem:[#allocation10 + $0x218] sm:$0xff]  ;;  %v2672_v18 = vpack.c.bf16 %v1240_v10, %v1234_v9 }
  0xb4   :  { %2529 = vmatprep.subr.bf16.mxu1 %v2528_v40  ;;  %2659 = vmatpush1.bf16.msra.mxu0 %v2658_v44  ;;  %v1233_v19 = vld [vmem:[#allocation10 + $0xde0] sm:$0xff]  ;;  %v1239_v20 = vld [vmem:[#allocation10 + $0xe10] sm:$0xff]  ;;  %v1246_v21 = vld [vmem:[#allocation10 + $0xe48] sm:$0xff]  ;;  %v2542_v23 = vpack.c.bf16 %v843_v14, %v837_v13  ;;  %v2544_v24 = vpack.c.bf16 %v856_v17, %v850_v15 }
  0xb5   :  { %2661 = vmatprep.subr.bf16.mxu0 %v2660_v46  ;;  %v1252_v22 = vld [vmem:[#allocation10 + $0xe78] sm:$0xff]  ;;  %v849_v25 = vld [vmem:[#allocation10 + $0x1e0] sm:$0xff]  ;;  %v855_v26 = vld [vmem:[#allocation10 + $0x210] sm:$0xff]  ;;  %v2674_v28 = vpack.c.bf16 %v1239_v20, %v1233_v19 }
  0xb6   :  { %v862_v27 = vld [vmem:[#allocation10 + $0x248] sm:$0xff]  ;;  %v868_v29 = vld [vmem:[#allocation10 + $0x278] sm:$0xff]  ;;  %v2676_v30 = vpack.c.bf16 %v1252_v22, %v1246_v21  ;;  %v1245_v31 = vld [vmem:[#allocation10 + $0xe40] sm:$0xff]  ;;  %v2546_v35 = vpack.c.bf16 %v855_v26, %v849_v25 }
  0xb7   :  { %2531 = vmatpush1.bf16.msra.mxu1 %v2530_v51  ;;  %v1251_v32 = vld [vmem:[#allocation10 + $0xe70] sm:$0xff]  ;;  %v1258_v33 = vld [vmem:[#allocation10 + $0xea8] sm:$0xff]  ;;  %v1264_v34 = vld [vmem:[#allocation10 + $0xed8] sm:$0xff]  ;;  %v2548_v36 = vpack.c.bf16 %v868_v29, %v862_v27 }
  0xb8   :  { %2533 = vmatprep.subr.bf16.mxu1 %v2532_v52  ;;  %2663 = vmatpush1.bf16.msra.mxu0 %v2662_v56  ;;  %v861_v37 = vld [vmem:[#allocation10 + $0x240] sm:$0xff]  ;;  %v867_v38 = vld [vmem:[#allocation10 + $0x270] sm:$0xff]  ;;  %v874_v39 = vld [vmem:[#allocation10 + $0x2a8] sm:$0xff]  ;;  %v2678_v40 = vpack.c.bf16 %v1251_v32, %v1245_v31  ;;  %v2680_v42 = vpack.c.bf16 %v1264_v34, %v1258_v33 }
  0xb9   :  { %2665 = vmatprep.subr.bf16.mxu0 %v2664_v58  ;;  %v880_v41 = vld [vmem:[#allocation10 + $0x2d8] sm:$0xff]  ;;  %v1257_v43 = vld [vmem:[#allocation10 + $0xea0] sm:$0xff]  ;;  %v1263_v44 = vld [vmem:[#allocation10 + $0xed0] sm:$0xff]  ;;  %v2550_v47 = vpack.c.bf16 %v867_v38, %v861_v37 }
  0xba   :  { %v1270_v45 = vld [vmem:[#allocation10 + $0xf08] sm:$0xff]  ;;  %v1276_v46 = vld [vmem:[#allocation10 + $0xf38] sm:$0xff]  ;;  %v2552_v48 = vpack.c.bf16 %v880_v41, %v874_v39  ;;  %v873_v49 = vld [vmem:[#allocation10 + $0x2a0] sm:$0xff]  ;;  %v2682_v52 = vpack.c.bf16 %v1263_v44, %v1257_v43 }
  0xbb   :  { %2535 = vmatpush1.bf16.msra.mxu1 %v2534_v63  ;;  %v879_v50 = vld [vmem:[#allocation10 + $0x2d0] sm:$0xff]  ;;  %v886_v51 = vld [vmem:[#allocation10 + $0x308] sm:$0xff]  ;;  %v892_v53 = vld [vmem:[#allocation10 + $0x338] sm:$0xff]  ;;  %v2684_v54 = vpack.c.bf16 %v1276_v46, %v1270_v45 }
  0xbc   :  { %2537 = vmatprep.subr.bf16.mxu1 %v2536_v0  ;;  %2667 = vmatpush1.bf16.msra.mxu0 %v2666_v4  ;;  %v1269_v55 = vld [vmem:[#allocation10 + $0xf00] sm:$0xff]  ;;  %v1275_v56 = vld [vmem:[#allocation10 + $0xf30] sm:$0xff]  ;;  %v1282_v57 = vld [vmem:[#allocation10 + $0xf68] sm:$0xff]  ;;  %v2554_v59 = vpack.c.bf16 %v879_v50, %v873_v49  ;;  %v2556_v60 = vpack.c.bf16 %v892_v53, %v886_v51 }
  0xbd   :  { %2669 = vmatprep.subr.bf16.mxu0 %v2668_v6  ;;  %v1288_v58 = vld [vmem:[#allocation10 + $0xf98] sm:$0xff]  ;;  %v885_v61 = vld [vmem:[#allocation10 + $0x300] sm:$0xff]  ;;  %v891_v62 = vld [vmem:[#allocation10 + $0x330] sm:$0xff]  ;;  %v2686_v0 = vpack.c.bf16 %v1275_v56, %v1269_v55 }
  0xbe   :  { %v898_v63 = vld [vmem:[#allocation10 + $0x368] sm:$0xff]  ;;  %v904_v1 = vld [vmem:[#allocation10 + $0x398] sm:$0xff]  ;;  %v2688_v2 = vpack.c.bf16 %v1288_v58, %v1282_v57  ;;  %v1281_v3 = vld [vmem:[#allocation10 + $0xf60] sm:$0xff]  ;;  %v2558_v7 = vpack.c.bf16 %v891_v62, %v885_v61 }
  0xbf   :  { %2539 = vmatpush1.bf16.msra.mxu1 %v2538_v11  ;;  %v1287_v4 = vld [vmem:[#allocation10 + $0xf90] sm:$0xff]  ;;  %v1294_v5 = vld [vmem:[#allocation10 + $0xfc8] sm:$0xff]  ;;  %v1300_v6 = vld [vmem:[#allocation10 + $0xff8] sm:$0xff]  ;;  %v2560_v8 = vpack.c.bf16 %v904_v1, %v898_v63 }
  0xc0   :  { %2541 = vmatprep.subr.bf16.mxu1 %v2540_v12  ;;  %2671 = vmatpush1.bf16.msra.mxu0 %v2670_v16  ;;  %v897_v9 = vld [vmem:[#allocation10 + $0x360] sm:$0xff]  ;;  %v903_v10 = vld [vmem:[#allocation10 + $0x390] sm:$0xff]  ;;  %v910_v11 = vld [vmem:[#allocation10 + $0x3c8] sm:$0xff]  ;;  %v2690_v12 = vpack.c.bf16 %v1287_v4, %v1281_v3  ;;  %v2692_v14 = vpack.c.bf16 %v1300_v6, %v1294_v5 }
  0xc1   :  { %2673 = vmatprep.subr.bf16.mxu0 %v2672_v18  ;;  %v916_v13 = vld [vmem:[#allocation10 + $0x3f8] sm:$0xff]  ;;  %v1293_v15 = vld [vmem:[#allocation10 + $0xfc0] sm:$0xff]  ;;  %v1299_v16 = vld [vmem:[#allocation10 + $0xff0] sm:$0xff]  ;;  %v2562_v19 = vpack.c.bf16 %v903_v10, %v897_v9 }
  0xc2   :  { %v1306_v17 = vld [vmem:[#allocation10 + $0x1028] sm:$0xff]  ;;  %v1312_v18 = vld [vmem:[#allocation10 + $0x1058] sm:$0xff]  ;;  %v2564_v20 = vpack.c.bf16 %v916_v13, %v910_v11  ;;  %v909_v21 = vld [vmem:[#allocation10 + $0x3c0] sm:$0xff] }
  0xc3   :  { %2543 = vmatpush1.bf16.msra.mxu1 %v2542_v23  ;;  %v915_v22 = vld [vmem:[#allocation10 + $0x3f0] sm:$0xff]  ;;  %v922_v23 = vld [vmem:[#allocation10 + $0x428] sm:$0xff]  ;;  %v928_v25 = vld [vmem:[#allocation10 + $0x458] sm:$0xff]  ;;  %v2696_v26 = vpack.c.bf16 %v1312_v18, %v1306_v17 }
  0xc4   :  { %2545 = vmatprep.subr.bf16.mxu1 %v2544_v24  ;;  %2675 = vmatpush1.bf16.msra.mxu0 %v2674_v28  ;;  %v2694_v24 = vpack.c.bf16 %v1299_v16, %v1293_v15  ;;  %v1305_v27 = vld [vmem:[#allocation10 + $0x1020] sm:$0xff]  ;;  %v1311_v28 = vld [vmem:[#allocation10 + $0x1050] sm:$0xff]  ;;  %v1318_v29 = vld [vmem:[#allocation10 + $0x1088] sm:$0xff]  ;;  %v2566_v31 = vpack.c.bf16 %v915_v22, %v909_v21  ;;  %v2568_v32 = vpack.c.bf16 %v928_v25, %v922_v23  ;;  %v733_v25 = vlaneseq }
  0xc5   :  { %2677 = vmatprep.subr.bf16.mxu0 %v2676_v30  ;;  %v1324_v30 = vld [vmem:[#allocation10 + $0x10b8] sm:$0xff]  ;;  %v921_v33 = vld [vmem:[#allocation10 + $0x420] sm:$0xff]  ;;  %v927_v34 = vld [vmem:[#allocation10 + $0x450] sm:$0xff] }
  0xc6   :  { %v940_v37 = vld [vmem:[#allocation10 + $0x4b8] sm:$0xff]  ;;  %v2700_v38 = vpack.c.bf16 %v1324_v30, %v1318_v29  ;;  %v1317_v39 = vld [vmem:[#allocation10 + $0x1080] sm:$0xff]  ;;  %v1330_v41 = vld [vmem:[#allocation10 + $0x10e8] sm:$0xff]  ;;  %v2570_v43 = vpack.c.bf16 %v927_v34, %v921_v33 }
  0xc7   :  { %2547 = vmatpush1.bf16.msra.mxu1 %v2546_v35  ;;  %v934_v35 = vld [vmem:[#allocation10 + $0x488] sm:$0xff]  ;;  %v933_v45 = vld [vmem:[#allocation10 + $0x480] sm:$0xff]  ;;  %v939_v46 = vld [vmem:[#allocation10 + $0x4b0] sm:$0xff] }
  0xc8   :  { %2549 = vmatprep.subr.bf16.mxu1 %v2548_v36  ;;  %2679 = vmatpush1.bf16.msra.mxu0 %v2678_v40  ;;  %v2698_v36 = vpack.c.bf16 %v1311_v28, %v1305_v27  ;;  %v1323_v40 = vld [vmem:[#allocation10 + $0x10b0] sm:$0xff]  ;;  %v2572_v44 = vpack.c.bf16 %v940_v37, %v934_v35  ;;  %v952_v49 = vld [vmem:[#allocation10 + $0x518] sm:$0xff]  ;;  %v1329_v51 = vld [vmem:[#allocation10 + $0x10e0] sm:$0xff]  ;;  %v2574_v53 = vpack.c.bf16 %v939_v46, %v933_v45 }
  0xc9   :  { %2681 = vmatprep.subr.bf16.mxu0 %v2680_v42  ;;  %v1336_v42 = vld [vmem:[#allocation10 + $0x1118] sm:$0xff]  ;;  %v945_v55 = vld [vmem:[#allocation10 + $0x4e0] sm:$0xff]  ;;  %v951_v56 = vld [vmem:[#allocation10 + $0x510] sm:$0xff] }
  0xca   :  { %v2704_v50 = vpack.c.bf16 %v1336_v42, %v1330_v41  ;;  %v958_v58 = vld [vmem:[#allocation10 + $0x548] sm:$0xff]  ;;  %v957_v62 = vld [vmem:[#allocation10 + $0x540] sm:$0xff]  ;;  %v963_v63 = vld [vmem:[#allocation10 + $0x570] sm:$0xff] }
  0xcb   :  { %2551 = vmatpush1.bf16.msra.mxu1 %v2550_v47  ;;  %v946_v47 = vld [vmem:[#allocation10 + $0x4e8] sm:$0xff]  ;;  %v1348_v5 = vld [vmem:[#allocation10 + $0x1178] sm:$0xff]  ;;  %v969_v6 = vld [vmem:[#allocation10 + $0x5a0] sm:$0xff] }
  0xcc   :  { %2553 = vmatprep.subr.bf16.mxu1 %v2552_v48  ;;  %2683 = vmatpush1.bf16.msra.mxu0 %v2682_v52  ;;  %v2702_v48 = vpack.c.bf16 %v1323_v40, %v1317_v39  ;;  %v1335_v52 = vld [vmem:[#allocation10 + $0x1110] sm:$0xff]  ;;  %v970_v1 = vld [vmem:[#allocation10 + $0x5a8] sm:$0xff]  ;;  %v1341_v10 = vld [vmem:[#allocation10 + $0x1140] sm:$0xff] }
  0xcd   :  { %2685 = vmatprep.subr.bf16.mxu0 %v2684_v54  ;;  %v2576_v54 = vpack.c.bf16 %v952_v49, %v946_v47  ;;  %v2706_v57 = vpack.c.bf16 %v1335_v52, %v1329_v51  ;;  %v1342_v3 = vld [vmem:[#allocation10 + $0x1148] sm:$0xff]  ;;  %v1347_v11 = vld [vmem:[#allocation10 + $0x1170] sm:$0xff]  ;;  %v1360_v17 = vld [vmem:[#allocation10 + $0x11d8] sm:$0xff] }
  0xce   :  { %v982_v13 = vld [vmem:[#allocation10 + $0x608] sm:$0xff]  ;;  %v1372_v23 = vld [vmem:[#allocation10 + $0x1238] sm:$0xff]  ;;  %v981_v42 = vld [vmem:[#allocation10 + $0x600] sm:$0xff] }
  0xcf   :  { %2555 = vmatpush1.bf16.msra.mxu1 %v2554_v59  ;;  %v964_v59 = vld [vmem:[#allocation10 + $0x578] sm:$0xff]  ;;  %v1354_v15 = vld [vmem:[#allocation10 + $0x11a8] sm:$0xff] }
  0xd0   :  { %2557 = vmatprep.subr.bf16.mxu1 %v2556_v60  ;;  %2687 = vmatpush1.bf16.msra.mxu0 %v2686_v0  ;;  %v2578_v60 = vpack.c.bf16 %v951_v56, %v945_v55  ;;  %v2580_v61 = vpack.c.bf16 %v964_v59, %v958_v58  ;;  %v2582_v0 = vpack.c.bf16 %v963_v63, %v957_v62  ;;  %v1366_v22 = vld [vmem:[#allocation10 + $0x1208] sm:$0xff]  ;;  %v731_v28 = vld [vmem:[#allocation9] sm:$0xff]  ;;  %v999_v55 = vld [vmem:[#allocation10 + $0x690] sm:$0xff] }
  0xd1   :  { %2689 = vmatprep.subr.bf16.mxu0 %v2688_v2  ;;  %v976_v2 = vld [vmem:[#allocation10 + $0x5d8] sm:$0xff]  ;;  %v2712_v18 = vpack.c.bf16 %v1360_v17, %v1354_v15  ;;  %v994_v47 = vld [vmem:[#allocation10 + $0x668] sm:$0xff]  ;;  %v1371_v62 = vld [vmem:[#allocation10 + $0x1230] sm:$0xff] }
  0xd2   :  { %v2584_v4 = vpack.c.bf16 %v976_v2, %v970_v1  ;;  %v1006_v63 = vld [vmem:[#allocation10 + $0x6c8] sm:$0xff] }
  0xd3   :  { %2559 = vmatpush1.bf16.msra.mxu1 %v2558_v7  ;;  %v975_v7 = vld [vmem:[#allocation10 + $0x5d0] sm:$0xff] }
  0xd4   :  { %2561 = vmatprep.subr.bf16.mxu1 %v2560_v8  ;;  %2691 = vmatpush1.bf16.msra.mxu0 %v2690_v12  ;;  %v2708_v8 = vpack.c.bf16 %v1348_v5, %v1342_v3  ;;  %v2586_v9 = vpack.c.bf16 %v975_v7, %v969_v6  ;;  %v2710_v12 = vpack.c.bf16 %v1347_v11, %v1341_v10  ;;  %v1012_v3 = vld [vmem:[#allocation10 + $0x6f8] sm:$0xff]  ;;  %v1005_v11 = vld [vmem:[#allocation10 + $0x6c0] sm:$0xff] }
  0xd5   :  { %2693 = vmatprep.subr.bf16.mxu0 %v2692_v14  ;;  %v988_v14 = vld [vmem:[#allocation10 + $0x638] sm:$0xff] }
  0xd6   :  { %v2588_v16 = vpack.c.bf16 %v988_v14, %v982_v13  ;;  %v1384_v5 = vld [vmem:[#allocation10 + $0x1298] sm:$0xff] }
  0xd7   :  { %2563 = vmatpush1.bf16.msra.mxu1 %v2562_v19  ;;  %v1353_v19 = vld [vmem:[#allocation10 + $0x11a0] sm:$0xff] }
  0xd8   :  { %2565 = vmatprep.subr.bf16.mxu1 %v2564_v20  ;;  %2695 = vmatpush1.bf16.msra.mxu0 %v2694_v24  ;;  %v1359_v20 = vld [vmem:[#allocation10 + $0x11d0] sm:$0xff]  ;;  %v2716_v24 = vpack.c.bf16 %v1372_v23, %v1366_v22  ;;  %v1024_v23 = vld [vmem:[#allocation10 + $0x758] sm:$0xff] }
  0xd9   :  { %2697 = vmatprep.subr.bf16.mxu0 %v2696_v26  ;;  %v2714_v21 = vpack.c.bf16 %v1359_v20, %v1353_v19  ;;  %v734_v26 = vshrl.u32 %v733_v25, 7  ;;  %v1383_v19 = vld [vmem:[#allocation10 + $0x1290] sm:$0xff]  ;;  %v1018_v20 = vld [vmem:[#allocation10 + $0x728] sm:$0xff]  ;;  %v1396_v25 = vld [vmem:[#allocation10 + $0x12f8] sm:$0xff] }
  0xdb   :  { %2567 = vmatpush1.bf16.msra.mxu1 %v2566_v31  ;;  %v759_v27 = vsub.s32 6, %v734_v26  ;;  %v3730_v30 = vsub.s32 0, %v734_v26  ;;  %v3732_v31 = vsub.s32 1, %v734_v26  ;;  %v3735_v33 = vsub.s32 4, %v734_v26 }
  0xdc   :  { %2569 = vmatprep.subr.bf16.mxu1 %v2568_v32  ;;  %2699 = vmatpush1.bf16.msra.mxu0 %v2698_v36  ;;  %v3737_v34 = vsub.s32 2, %v734_v26  ;;  %v3740_v36 = vsub.s32 5, %v734_v26  ;;  %v3742_v37 = vsub.s32 3, %v734_v26 }
  0xdd   :  { %2701 = vmatprep.subr.bf16.mxu0 %v2700_v38  ;;  %v760_v29 = vrot.slane %v731_v28, %v759_v27  ;;  %v736_v32 = vrot.slane %v731_v28, %v3730_v30  ;;  %v740_v35 = vrot.slane %v731_v28, %v3732_v31  ;;  %v752_v41 = vrot.slane %v731_v28, %v3735_v33 }
  0xde   :  { %v756_v46 = vrot.slane %v731_v28, %v3740_v36  ;;  %v748_v49 = vrot.slane %v731_v28, %v3742_v37 }
  0xdf   :  { %2571 = vmatpush1.bf16.msra.mxu1 %v2570_v43  ;;  %v987_v43 = vld [vmem:[#allocation10 + $0x630] sm:$0xff] }
  0xe0   :  { %2573 = vmatprep.subr.bf16.mxu1 %v2572_v44  ;;  %2703 = vmatpush1.bf16.msra.mxu0 %v2702_v48  ;;  %v744_v44 = vrot.slane %v731_v28, %v3737_v34  ;;  %v1000_v48 = vld [vmem:[#allocation10 + $0x698] sm:$0xff] }
  0xe1   :  { %2705 = vmatprep.subr.bf16.mxu0 %v2704_v50  ;;  %v763_v50 = vsub.s32 7, %v734_v26 }
  0xe3   :  { %2575 = vmatpush1.bf16.msra.mxu1 %v2574_v53  ;;  %v2590_v53 = vpack.c.bf16 %v987_v43, %v981_v42  ;;  %v764_v7 = vrot.slane %v731_v28, %v763_v50  ;;  %v1030_v42 = vld [vmem:[#allocation10 + $0x788] sm:$0xff]  ;;  %v1036_v43 = vld [vmem:[#allocation10 + $0x7b8] sm:$0xff] }
  0xe4   :  { %2577 = vmatprep.subr.bf16.mxu1 %v2576_v54  ;;  %2707 = vmatpush1.bf16.msra.mxu0 %v2706_v57  ;;  %v993_v54 = vld [vmem:[#allocation10 + $0x660] sm:$0xff]  ;;  %v2604_v50 = vpack.c.bf16 %v1036_v43, %v1030_v42  ;;  %v1450_v42 = vld [vmem:[#allocation10 + $0x14a8] sm:$0xff]  ;;  %v1456_v43 = vld [vmem:[#allocation10 + $0x14d8] sm:$0xff] }
  0xe5   :  { %2709 = vmatprep.subr.bf16.mxu0 %v2708_v8 }
  0xe7   :  { %2579 = vmatpush1.bf16.msra.mxu1 %v2578_v60  ;;  %v2592_v60 = vpack.c.bf16 %v1000_v48, %v994_v47  ;;  %v1029_v48 = vld [vmem:[#allocation10 + $0x780] sm:$0xff] }
  0xe8   :  { %2581 = vmatprep.subr.bf16.mxu1 %v2580_v61  ;;  %2711 = vmatpush1.bf16.msra.mxu0 %v2710_v12  ;;  %v1365_v61 = vld [vmem:[#allocation10 + $0x1200] sm:$0xff]  ;;  %v1011_v12 = vld [vmem:[#allocation10 + $0x6f0] sm:$0xff] }
  0xe9   :  { %2713 = vmatprep.subr.bf16.mxu0 %v2712_v18  ;;  %v2718_v10 = vpack.c.bf16 %v1371_v62, %v1365_v61  ;;  %v1377_v18 = vld [vmem:[#allocation10 + $0x1260] sm:$0xff]  ;;  %v2598_v27 = vpack.c.bf16 %v1011_v12, %v1005_v11 }
  0xea   :  { %v2722_v28 = vpack.c.bf16 %v1383_v19, %v1377_v18  ;;  %v1041_v62 = vld [vmem:[#allocation10 + $0x7e0] sm:$0xff]  ;;  %v1431_v19 = vld [vmem:[#allocation10 + $0x1410] sm:$0xff] }
  0xeb   :  { %2583 = vmatpush1.bf16.msra.mxu1 %v2582_v0  ;;  %v1053_v12 = vld [vmem:[#allocation10 + $0x840] sm:$0xff] }
  0xec   :  { %2585 = vmatprep.subr.bf16.mxu1 %v2584_v4  ;;  %2715 = vmatpush1.bf16.msra.mxu0 %v2714_v21  ;;  %v1378_v4 = vld [vmem:[#allocation10 + $0x1268] sm:$0xff]  ;;  %v1425_v18 = vld [vmem:[#allocation10 + $0x13e0] sm:$0xff] }
  0xed   :  { %2717 = vmatprep.subr.bf16.mxu0 %v2716_v24  ;;  %v2720_v17 = vpack.c.bf16 %v1384_v5, %v1378_v4  ;;  %v1390_v24 = vld [vmem:[#allocation10 + $0x12c8] sm:$0xff]  ;;  %v1419_v4 = vld [vmem:[#allocation10 + $0x13b0] sm:$0xff] }
  0xee   :  { %v1054_v5 = vld [vmem:[#allocation10 + $0x848] sm:$0xff] }
  0xef   :  { %2587 = vmatpush1.bf16.msra.mxu1 %v2586_v9  ;;  %v2594_v9 = vpack.c.bf16 %v999_v55, %v993_v54  ;;  %v1407_v54 = vld [vmem:[#allocation10 + $0x1350] sm:$0xff]  ;;  %v1042_v55 = vld [vmem:[#allocation10 + $0x7e8] sm:$0xff] }
  0xf0   :  { %2589 = vmatprep.subr.bf16.mxu1 %v2588_v16  ;;  %v2596_v16 = vpack.c.bf16 %v1012_v3, %v1006_v63  ;;  %v1047_v63 = vld [vmem:[#allocation10 + $0x810] sm:$0xff]  ;;  %v1413_v3 = vld [vmem:[#allocation10 + $0x1380] sm:$0xff] }
  0xf1   :  { %v2734_v11 = vpack.c.bf16 %v1419_v4, %v1413_v3  ;;  %v1102_v3 = vld [vmem:[#allocation10 + $0x9c8] sm:$0xff]  ;;  %v1108_v4 = vld [vmem:[#allocation10 + $0x9f8] sm:$0xff] }
 0x17e   :  { %v513_v38 = vpop.f32.mrb[0].mxu0 }
 0x17f   :  { %v773_v39 = vadd.f32 %v736_v32, %v513_v38  ;;  %v515_v40 = vpop.f32.mrb[1].mxu0  ;;  %v1017_v32 = vld [vmem:[#allocation10 + $0x720] sm:$0xff] }
 0x180   :  { %v774_v45 = vadd.f32 %v740_v35, %v515_v40  ;;  %v1023_v35 = vld [vmem:[#allocation10 + $0x750] sm:$0xff]  ;;  %v1389_v40 = vld [vmem:[#allocation10 + $0x12c0] sm:$0xff] }
 0x181   :  { %v584_v56 = vpop.f32.mrb[0].mxu1  ;;  %v3750_v57 = vmax.f32 %v773_v39, 0.0  ;;  %v2724_v39 = vpack.c.bf16 %v1396_v25, %v1390_v24  ;;  %v1444_v24 = vld [vmem:[#allocation10 + $0x1478] sm:$0xff] }
 0x182   :  { %v3748_v51 = vmax.f32 %v774_v45, 0.0  ;;  %v655_v52 = vpop.f32.mrb[2].mxu0  ;;  %v3752_v0 = vadd.f32 %v744_v44, %v584_v56  ;;  %v586_v1 = vpop.f32.mrb[1].mxu1  ;;  %v1402_v44 = vld [vmem:[#allocation10 + $0x1328] sm:$0xff]  ;;  %v1408_v45 = vld [vmem:[#allocation10 + $0x1358] sm:$0xff] }
 0x183   :  { %v777_v58 = vadd.f32 %v752_v41, %v655_v52  ;;  %v657_v59 = vpop.f32.mrb[3].mxu0  ;;  %v776_v6 = vadd.f32 %v748_v49, %v586_v1  ;;  %v1395_v41 = vld [vmem:[#allocation10 + $0x12f0] sm:$0xff]  ;;  %v2728_v52 = vpack.c.bf16 %v1408_v45, %v1402_v44  ;;  %v1048_v56 = vld [vmem:[#allocation10 + $0x818] sm:$0xff] }
 0x184   :  { %v778_v2 = vadd.f32 %v756_v46, %v657_v59  ;;  %1653 = vmatprep.mubr.f32.mxu1 %v3748_v51  ;;  %v2602_v46 = vpack.c.bf16 %v1023_v35, %v1017_v32  ;;  %v2726_v47 = vpack.c.bf16 %v1395_v41, %v1389_v40  ;;  %v1035_v49 = vld [vmem:[#allocation10 + $0x7b0] sm:$0xff]  ;;  %v1420_v59 = vld [vmem:[#allocation10 + $0x13b8] sm:$0xff]  ;;  %v2608_v1 = vpack.c.bf16 %v1048_v56, %v1042_v55  ;;  %v1078_v40 = vld [vmem:[#allocation10 + $0x908] sm:$0xff] }
 0x185   :  { %1654 = vmatmul.mubr.f32.vlgmr.msra.gmra.mrb[4].mxu1 %v3750_v57  ;;  %v3758_v13 = vmax.f32 %v776_v6, 0.0  ;;  %v726_v14 = vpop.f32.mrb[2].mxu1  ;;  %v3760_v15 = vmax.f32 %v777_v58, 0.0  ;;  %v1414_v58 = vld [vmem:[#allocation10 + $0x1388] sm:$0xff]  ;;  %v1060_v6 = vld [vmem:[#allocation10 + $0x878] sm:$0xff] }
 0x186   :  { %v3756_v8 = vmax.f32 %v778_v2, 0.0  ;;  %2591 = vmatpush1.bf16.msra.mxu1 %v2590_v53  ;;  %v3762_v21 = vadd.f32 %v760_v29, %v726_v14  ;;  %v728_v22 = vpop.f32.mrb[3].mxu1  ;;  %v2600_v29 = vpack.c.bf16 %v1024_v23, %v1018_v20  ;;  %v1401_v53 = vld [vmem:[#allocation10 + $0x1320] sm:$0xff]  ;;  %v2732_v2 = vpack.c.bf16 %v1420_v59, %v1414_v58  ;;  %v1059_v14 = vld [vmem:[#allocation10 + $0x870] sm:$0xff]  ;;  %v1066_v20 = vld [vmem:[#allocation10 + $0x8a8] sm:$0xff] }
 0x187   :  { %2593 = vmatprep.subr.bf16.mxu1 %v2592_v60  ;;  %v780_v26 = vadd.f32 %v764_v7, %v728_v22  ;;  %1724 = vmatprep.mubr.f32.mxu1 %v3758_v13  ;;  %v2606_v60 = vpack.c.bf16 %v1035_v49, %v1029_v48  ;;  %v2730_v61 = vpack.c.bf16 %v1407_v54, %v1401_v53  ;;  %v1426_v7 = vld [vmem:[#allocation10 + $0x13e8] sm:$0xff]  ;;  %v1072_v22 = vld [vmem:[#allocation10 + $0x8d8] sm:$0xff] }
 0x188   :  { %1795 = vmatprep.mubr.f32.mxu0 %v3756_v8  ;;  %v1438_v23 = vld [vmem:[#allocation10 + $0x1448] sm:$0xff]  ;;  %v2614_v25 = vpack.c.bf16 %v1059_v14, %v1053_v12  ;;  %v2616_v32 = vpack.c.bf16 %v1072_v22, %v1066_v20  ;;  %v1084_v41 = vld [vmem:[#allocation10 + $0x938] sm:$0xff]  ;;  %v2744_v49 = vpack.c.bf16 %v1456_v43, %v1450_v42  ;;  %v2628_v12 = vpack.c.bf16 %v1108_v4, %v1102_v3 }
 0x189   :  { %1796 = vmatmul.mubr.f32.vlgmr.msra.gmra.mrb[4].mxu0 %v3760_v15  ;;  %v3767_v38 = vmax.f32 %v780_v26, 0.0  ;;  %v2738_v26 = vpack.c.bf16 %v1431_v19, %v1425_v18  ;;  %v2740_v35 = vpack.c.bf16 %v1444_v24, %v1438_v23  ;;  %v2620_v48 = vpack.c.bf16 %v1084_v41, %v1078_v40  ;;  %v1090_v53 = vld [vmem:[#allocation10 + $0x968] sm:$0xff]  ;;  %v1096_v54 = vld [vmem:[#allocation10 + $0x998] sm:$0xff] }
 0x18a   :  { %2595 = vmatpush1.bf16.msra.mxu1 %v2594_v9  ;;  %2719 = vmatpush1.bf16.msra.mxu0 %v2718_v10  ;;  %v1432_v9 = vld [vmem:[#allocation10 + $0x1418] sm:$0xff]  ;;  %v2610_v10 = vpack.c.bf16 %v1047_v63, %v1041_v62  ;;  %v1462_v55 = vld [vmem:[#allocation10 + $0x1508] sm:$0xff]  ;;  %v2624_v62 = vpack.c.bf16 %v1096_v54, %v1090_v53 }
 0x18b   :  { %2597 = vmatprep.subr.bf16.mxu1 %v2596_v16  ;;  %2721 = vmatprep.subr.bf16.mxu0 %v2720_v17  ;;  %v2612_v16 = vpack.c.bf16 %v1060_v6, %v1054_v5  ;;  %v2736_v17 = vpack.c.bf16 %v1432_v9, %v1426_v7  ;;  %v1468_v56 = vld [vmem:[#allocation10 + $0x1538] sm:$0xff]  ;;  %v1474_v5 = vld [vmem:[#allocation10 + $0x1568] sm:$0xff] }
 0x18c   :  { %1866 = vmatprep.mubr.f32.mxu0 %v3767_v38  ;;  %v2748_v63 = vpack.c.bf16 %v1468_v56, %v1462_v55  ;;  %v1480_v6 = vld [vmem:[#allocation10 + $0x1598] sm:$0xff]  ;;  %v1114_v18 = vld [vmem:[#allocation10 + $0xa28] sm:$0xff] }
 0x18d   :  { %v2752_v14 = vpack.c.bf16 %v1480_v6, %v1474_v5  ;;  %v1120_v19 = vld [vmem:[#allocation10 + $0xa58] sm:$0xff]  ;;  %v1486_v20 = vld [vmem:[#allocation10 + $0x15c8] sm:$0xff] }
 0x18e   :  { %2599 = vmatpush1.bf16.msra.mxu1 %v2598_v27  ;;  %2723 = vmatpush1.bf16.msra.mxu0 %v2722_v28  ;;  %v1065_v27 = vld [vmem:[#allocation10 + $0x8a0] sm:$0xff]  ;;  %v1071_v28 = vld [vmem:[#allocation10 + $0x8d0] sm:$0xff]  ;;  %v1492_v22 = vld [vmem:[#allocation10 + $0x15f8] sm:$0xff] }
 0x18f   :  { %2601 = vmatprep.subr.bf16.mxu1 %v2600_v29  ;;  %2725 = vmatprep.subr.bf16.mxu0 %v2724_v39  ;;  %v1437_v29 = vld [vmem:[#allocation10 + $0x1440] sm:$0xff]  ;;  %v1443_v39 = vld [vmem:[#allocation10 + $0x1470] sm:$0xff]  ;;  %v2618_v44 = vpack.c.bf16 %v1071_v28, %v1065_v27  ;;  %v2632_v27 = vpack.c.bf16 %v1120_v19, %v1114_v18  ;;  %v2756_v28 = vpack.c.bf16 %v1492_v22, %v1486_v20  ;;  %v1498_v40 = vld [vmem:[#allocation10 + $0x1628] sm:$0xff] }
 0x190   :  { %v2742_v45 = vpack.c.bf16 %v1443_v39, %v1437_v29  ;;  %v1126_v29 = vld [vmem:[#allocation10 + $0xa88] sm:$0xff]  ;;  %v1132_v39 = vld [vmem:[#allocation10 + $0xab8] sm:$0xff] }
 0x191   :  { %v1504_v41 = vld [vmem:[#allocation10 + $0x1658] sm:$0xff]  ;;  %v1510_v53 = vld [vmem:[#allocation10 + $0x1688] sm:$0xff] }
 0x192   :  { %2603 = vmatpush1.bf16.msra.mxu1 %v2602_v46  ;;  %2727 = vmatpush1.bf16.msra.mxu0 %v2726_v47  ;;  %v1077_v46 = vld [vmem:[#allocation10 + $0x900] sm:$0xff]  ;;  %v1083_v47 = vld [vmem:[#allocation10 + $0x930] sm:$0xff]  ;;  %v1516_v54 = vld [vmem:[#allocation10 + $0x16b8] sm:$0xff] }
 0x193   :  { %2605 = vmatprep.subr.bf16.mxu1 %v2604_v50  ;;  %2729 = vmatprep.subr.bf16.mxu0 %v2728_v52  ;;  %v1449_v50 = vld [vmem:[#allocation10 + $0x14a0] sm:$0xff]  ;;  %v1455_v52 = vld [vmem:[#allocation10 + $0x14d0] sm:$0xff]  ;;  %v2622_v58 = vpack.c.bf16 %v1083_v47, %v1077_v46  ;;  %v2636_v46 = vpack.c.bf16 %v1132_v39, %v1126_v29  ;;  %v2760_v47 = vpack.c.bf16 %v1504_v41, %v1498_v40  ;;  %v1522_v3 = vld [vmem:[#allocation10 + $0x16e8] sm:$0xff] }
 0x194   :  { %v2746_v59 = vpack.c.bf16 %v1455_v52, %v1449_v50  ;;  %v1138_v50 = vld [vmem:[#allocation10 + $0xae8] sm:$0xff]  ;;  %v1144_v52 = vld [vmem:[#allocation10 + $0xb18] sm:$0xff] }
 0x195   :  { %v1528_v4 = vld [vmem:[#allocation10 + $0x1718] sm:$0xff]  ;;  %v1534_v18 = vld [vmem:[#allocation10 + $0x1748] sm:$0xff] }
 0x196   :  { %2607 = vmatpush1.bf16.msra.mxu1 %v2606_v60  ;;  %2731 = vmatpush1.bf16.msra.mxu0 %v2730_v61  ;;  %v1089_v60 = vld [vmem:[#allocation10 + $0x960] sm:$0xff]  ;;  %v1095_v61 = vld [vmem:[#allocation10 + $0x990] sm:$0xff]  ;;  %v1540_v19 = vld [vmem:[#allocation10 + $0x1778] sm:$0xff] }
 0x197   :  { %2609 = vmatprep.subr.bf16.mxu1 %v2608_v1  ;;  %2733 = vmatprep.subr.bf16.mxu0 %v2732_v2  ;;  %v1461_v1 = vld [vmem:[#allocation10 + $0x1500] sm:$0xff]  ;;  %v1467_v2 = vld [vmem:[#allocation10 + $0x1530] sm:$0xff]  ;;  %v2626_v7 = vpack.c.bf16 %v1095_v61, %v1089_v60  ;;  %v2640_v60 = vpack.c.bf16 %v1144_v52, %v1138_v50  ;;  %v2764_v61 = vpack.c.bf16 %v1516_v54, %v1510_v53  ;;  %v792_v29 = vld [vmem:[#allocation10 + $0x18] sm:$0xff] }
 0x198   :  { %v2750_v9 = vpack.c.bf16 %v1467_v2, %v1461_v1  ;;  %v1150_v1 = vld [vmem:[#allocation10 + $0xb48] sm:$0xff]  ;;  %v1156_v2 = vld [vmem:[#allocation10 + $0xb78] sm:$0xff] }
 0x199   :  { %v798_v39 = vld [vmem:[#allocation10 + $0x48] sm:$0xff]  ;;  %v800_v52 = vld [vmem:[#allocation10 + $0x58] sm:$0xff] }
 0x19a   :  { %2611 = vmatpush1.bf16.msra.mxu1 %v2610_v10  ;;  %2735 = vmatpush1.bf16.msra.mxu0 %v2734_v11  ;;  %v1101_v10 = vld [vmem:[#allocation10 + $0x9c0] sm:$0xff]  ;;  %v1107_v11 = vld [vmem:[#allocation10 + $0x9f0] sm:$0xff]  ;;  %v794_v50 = vld [vmem:[#allocation10 + $0x28] sm:$0xff] }
 0x19b   :  { %2613 = vmatprep.subr.bf16.mxu1 %v2612_v16  ;;  %2737 = vmatprep.subr.bf16.mxu0 %v2736_v17  ;;  %v1473_v16 = vld [vmem:[#allocation10 + $0x1560] sm:$0xff]  ;;  %v1479_v17 = vld [vmem:[#allocation10 + $0x1590] sm:$0xff]  ;;  %v2630_v23 = vpack.c.bf16 %v1107_v11, %v1101_v10  ;;  %v2644_v10 = vpack.c.bf16 %v1156_v2, %v1150_v1  ;;  %v2768_v11 = vpack.c.bf16 %v1528_v4, %v1522_v3  ;;  %v822_v1 = vld [vmem:[#allocation10 + $0x108] sm:$0xff] }
 0x19c   :  { %v2754_v24 = vpack.c.bf16 %v1479_v17, %v1473_v16  ;;  %v1162_v16 = vld [vmem:[#allocation10 + $0xba8] sm:$0xff]  ;;  %v1168_v17 = vld [vmem:[#allocation10 + $0xbd8] sm:$0xff] }
 0x19d   :  { %v806_v2 = vld [vmem:[#allocation10 + $0x88] sm:$0xff]  ;;  %v812_v3 = vld [vmem:[#allocation10 + $0xb8] sm:$0xff] }
 0x19e   :  { %2615 = vmatpush1.bf16.msra.mxu1 %v2614_v25  ;;  %2739 = vmatpush1.bf16.msra.mxu0 %v2738_v26  ;;  %v1113_v25 = vld [vmem:[#allocation10 + $0xa20] sm:$0xff]  ;;  %v1119_v26 = vld [vmem:[#allocation10 + $0xa50] sm:$0xff] }
 0x19f   :  { %2617 = vmatprep.subr.bf16.mxu1 %v2616_v32  ;;  %2741 = vmatprep.subr.bf16.mxu0 %v2740_v35  ;;  %v1485_v32 = vld [vmem:[#allocation10 + $0x15c0] sm:$0xff]  ;;  %v1491_v35 = vld [vmem:[#allocation10 + $0x15f0] sm:$0xff]  ;;  %v2634_v42 = vpack.c.bf16 %v1119_v26, %v1113_v25  ;;  %v2648_v25 = vpack.c.bf16 %v1168_v17, %v1162_v16  ;;  %v2772_v26 = vpack.c.bf16 %v1540_v19, %v1534_v18  ;;  %v834_v16 = vld [vmem:[#allocation10 + $0x168] sm:$0xff] }
 0x1a0   :  { %v2758_v43 = vpack.c.bf16 %v1491_v35, %v1485_v32  ;;  %v1546_v32 = vld [vmem:[#allocation10 + $0x17a8] sm:$0xff]  ;;  %v1552_v35 = vld [vmem:[#allocation10 + $0x17d8] sm:$0xff] }
 0x1a1   :  { %v818_v17 = vld [vmem:[#allocation10 + $0xe8] sm:$0xff]  ;;  %v824_v18 = vld [vmem:[#allocation10 + $0x118] sm:$0xff] }
 0x1a2   :  { %2619 = vmatpush1.bf16.msra.mxu1 %v2618_v44  ;;  %2743 = vmatpush1.bf16.msra.mxu0 %v2742_v45  ;;  %v1125_v44 = vld [vmem:[#allocation10 + $0xa80] sm:$0xff]  ;;  %v1131_v45 = vld [vmem:[#allocation10 + $0xab0] sm:$0xff] }
 0x1a3   :  { %2621 = vmatprep.subr.bf16.mxu1 %v2620_v48  ;;  %2745 = vmatprep.subr.bf16.mxu0 %v2744_v49  ;;  %v1497_v48 = vld [vmem:[#allocation10 + $0x1620] sm:$0xff]  ;;  %v1503_v49 = vld [vmem:[#allocation10 + $0x1650] sm:$0xff]  ;;  %v2638_v55 = vpack.c.bf16 %v1131_v45, %v1125_v44  ;;  %v2780_v44 = vpack.c.bf16 %v798_v39, %v792_v29 }
 0x1a4   :  { %v2762_v56 = vpack.c.bf16 %v1503_v49, %v1497_v48  ;;  %v1551_v45 = vld [vmem:[#allocation10 + $0x17d0] sm:$0xff]  ;;  %v804_v48 = vld [vmem:[#allocation10 + $0x78] sm:$0xff]  ;;  %v810_v49 = vld [vmem:[#allocation10 + $0xa8] sm:$0xff] }
 0x1a6   :  { %2623 = vmatpush1.bf16.msra.mxu1 %v2622_v58  ;;  %2747 = vmatpush1.bf16.msra.mxu0 %v2746_v59  ;;  %v1137_v58 = vld [vmem:[#allocation10 + $0xae0] sm:$0xff]  ;;  %v1143_v59 = vld [vmem:[#allocation10 + $0xb10] sm:$0xff] }
 0x1a7   :  { %2625 = vmatprep.subr.bf16.mxu1 %v2624_v62  ;;  %2749 = vmatprep.subr.bf16.mxu0 %v2748_v63  ;;  %v1509_v62 = vld [vmem:[#allocation10 + $0x1680] sm:$0xff]  ;;  %v1515_v63 = vld [vmem:[#allocation10 + $0x16b0] sm:$0xff]  ;;  %v2642_v5 = vpack.c.bf16 %v1143_v59, %v1137_v58  ;;  %v2784_v58 = vpack.c.bf16 %v810_v49, %v804_v48  ;;  %v848_v48 = vld [vmem:[#allocation10 + $0x1d8] sm:$0xff] }
 0x1a8   :  { %v2766_v6 = vpack.c.bf16 %v1515_v63, %v1509_v62  ;;  %v809_v59 = vld [vmem:[#allocation10 + $0xa0] sm:$0xff]  ;;  %v3036_v62 = vpack.c.bf16 %v800_v52, %v794_v50  ;;  %v816_v63 = vld [vmem:[#allocation10 + $0xd8] sm:$0xff]  ;;  %v851_v52 = vld [vmem:[#allocation10 + $0x1f0] sm:$0xff] }
 0x1aa   :  { %2627 = vmatpush1.bf16.msra.mxu1 %v2626_v7  ;;  %2751 = vmatpush1.bf16.msra.mxu0 %v2750_v9  ;;  %v1149_v7 = vld [vmem:[#allocation10 + $0xb40] sm:$0xff]  ;;  %v1155_v9 = vld [vmem:[#allocation10 + $0xb70] sm:$0xff] }
 0x1ab   :  { %2629 = vmatprep.subr.bf16.mxu1 %v2628_v12  ;;  %2753 = vmatprep.subr.bf16.mxu0 %v2752_v14  ;;  %v1521_v12 = vld [vmem:[#allocation10 + $0x16e0] sm:$0xff]  ;;  %v1527_v14 = vld [vmem:[#allocation10 + $0x1710] sm:$0xff]  ;;  %v2646_v20 = vpack.c.bf16 %v1155_v9, %v1149_v7  ;;  %v3775_v7 = vmax.f32 %v3762_v21, 0.0  ;;  %v2788_v9 = vpack.c.bf16 %v822_v1, %v816_v63  ;;  %v860_v63 = vld [vmem:[#allocation10 + $0x238] sm:$0xff] }
 0x1ac   :  { %v2770_v22 = vpack.c.bf16 %v1527_v14, %v1521_v12  ;;  %v828_v12 = vld [vmem:[#allocation10 + $0x138] sm:$0xff]  ;;  %v3040_v14 = vpack.c.bf16 %v812_v3, %v806_v2  ;;  %v827_v21 = vld [vmem:[#allocation10 + $0x130] sm:$0xff] }
 0x1ad   :  { %v863_v3 = vld [vmem:[#allocation10 + $0x250] sm:$0xff] }
 0x1ae   :  { %2631 = vmatpush1.bf16.msra.mxu1 %v2630_v23  ;;  %2755 = vmatpush1.bf16.msra.mxu0 %v2754_v24  ;;  %v1161_v23 = vld [vmem:[#allocation10 + $0xba0] sm:$0xff]  ;;  %v1167_v24 = vld [vmem:[#allocation10 + $0xbd0] sm:$0xff] }
 0x1af   :  { %2633 = vmatprep.subr.bf16.mxu1 %v2632_v27  ;;  %2757 = vmatprep.subr.bf16.mxu0 %v2756_v28  ;;  %v1533_v27 = vld [vmem:[#allocation10 + $0x1740] sm:$0xff]  ;;  %v1539_v28 = vld [vmem:[#allocation10 + $0x1770] sm:$0xff]  ;;  %v2650_v40 = vpack.c.bf16 %v1167_v24, %v1161_v23  ;;  %v2792_v23 = vpack.c.bf16 %v834_v16, %v828_v12  ;;  %v3044_v24 = vpack.c.bf16 %v824_v18, %v818_v17  ;;  %v866_v12 = vld [vmem:[#allocation10 + $0x268] sm:$0xff] }
 0x1b0   :  { %v2774_v41 = vpack.c.bf16 %v1539_v28, %v1533_v27  ;;  %v840_v27 = vld [vmem:[#allocation10 + $0x198] sm:$0xff]  ;;  %v846_v28 = vld [vmem:[#allocation10 + $0x1c8] sm:$0xff]  ;;  %v875_v18 = vld [vmem:[#allocation10 + $0x2b0] sm:$0xff] }
 0x1b2   :  { %2635 = vmatpush1.bf16.msra.mxu1 %v2634_v42  ;;  %2759 = vmatpush1.bf16.msra.mxu0 %v2758_v43  ;;  %v1545_v42 = vld [vmem:[#allocation10 + $0x17a0] sm:$0xff]  ;;  %v2776_v43 = vpack.c.bf16 %v1552_v35, %v1546_v32  ;;  %v830_v32 = vld [vmem:[#allocation10 + $0x148] sm:$0xff]  ;;  %v836_v35 = vld [vmem:[#allocation10 + $0x178] sm:$0xff] }
 0x1b3   :  { %2637 = vmatprep.subr.bf16.mxu1 %v2636_v46  ;;  %2761 = vmatprep.subr.bf16.mxu0 %v2760_v47  ;;  %v791_v46 = vld [vmem:[#allocation10 + $0x10] sm:$0xff]  ;;  %v797_v47 = vld [vmem:[#allocation10 + $0x40] sm:$0xff]  ;;  %v2778_v53 = vpack.c.bf16 %v1551_v45, %v1545_v42  ;;  %v2796_v42 = vpack.c.bf16 %v846_v28, %v840_v27  ;;  %v852_v45 = vld [vmem:[#allocation10 + $0x1f8] sm:$0xff] }
 0x1b4   :  { %v2782_v54 = vpack.c.bf16 %v797_v47, %v791_v46  ;;  %v858_v46 = vld [vmem:[#allocation10 + $0x228] sm:$0xff]  ;;  %v884_v27 = vld [vmem:[#allocation10 + $0x2f8] sm:$0xff] }
 0x1b5   :  { %v842_v47 = vld [vmem:[#allocation10 + $0x1a8] sm:$0xff] }
 0x1b6   :  { %2639 = vmatpush1.bf16.msra.mxu1 %v2638_v55  ;;  %2763 = vmatpush1.bf16.msra.mxu0 %v2762_v56  ;;  %v803_v55 = vld [vmem:[#allocation10 + $0x70] sm:$0xff]  ;;  %v3771_v56 = vmax.f32 %v3752_v0, 0.0  ;;  %v821_v0 = vld [vmem:[#allocation10 + $0x100] sm:$0xff] }
 0x1b7   :  { %2641 = vmatprep.subr.bf16.mxu1 %v2640_v60  ;;  %2765 = vmatprep.subr.bf16.mxu0 %v2764_v61  ;;  %v793_v60 = vld [vmem:[#allocation10 + $0x20] sm:$0xff]  ;;  %v799_v61 = vld [vmem:[#allocation10 + $0x50] sm:$0xff]  ;;  %v2786_v4 = vpack.c.bf16 %v809_v59, %v803_v55  ;;  %v3052_v55 = vpack.c.bf16 %v848_v48, %v842_v47 }
 0x1b8   :  { %v847_v59 = vld [vmem:[#allocation10 + $0x1d0] sm:$0xff] }
 0x1b9   :  { %v899_v48 = vld [vmem:[#allocation10 + $0x370] sm:$0xff] }
 0x1ba   :  { %2643 = vmatpush1.bf16.msra.mxu1 %v2642_v5  ;;  %2767 = vmatpush1.bf16.msra.mxu0 %v2766_v6  ;;  %v3038_v5 = vpack.c.bf16 %v799_v61, %v793_v60  ;;  %v815_v6 = vld [vmem:[#allocation10 + $0xd0] sm:$0xff]  ;;  %v864_v60 = vld [vmem:[#allocation10 + $0x258] sm:$0xff]  ;;  %v870_v61 = vld [vmem:[#allocation10 + $0x288] sm:$0xff] }
 0x1bb   :  { %2645 = vmatprep.subr.bf16.mxu1 %v2644_v10  ;;  %2769 = vmatprep.subr.bf16.mxu0 %v2768_v11  ;;  %v805_v10 = vld [vmem:[#allocation10 + $0x80] sm:$0xff]  ;;  %v811_v11 = vld [vmem:[#allocation10 + $0xb0] sm:$0xff]  ;;  %v2790_v19 = vpack.c.bf16 %v821_v0, %v815_v6 }
 0x1bc   :  { %v853_v0 = vld [vmem:[#allocation10 + $0x200] sm:$0xff] }
 0x1be   :  { %2647 = vmatpush1.bf16.msra.mxu1 %v2646_v20  ;;  %2771 = vmatpush1.bf16.msra.mxu0 %v2770_v22  ;;  %v3042_v20 = vpack.c.bf16 %v811_v11, %v805_v10  ;;  %v833_v22 = vld [vmem:[#allocation10 + $0x160] sm:$0xff]  ;;  %v876_v10 = vld [vmem:[#allocation10 + $0x2b8] sm:$0xff]  ;;  %v882_v11 = vld [vmem:[#allocation10 + $0x2e8] sm:$0xff] }
 0x1bf   :  { %2649 = vmatprep.subr.bf16.mxu1 %v2648_v25  ;;  %2773 = vmatprep.subr.bf16.mxu0 %v2772_v26  ;;  %v817_v25 = vld [vmem:[#allocation10 + $0xe0] sm:$0xff]  ;;  %v823_v26 = vld [vmem:[#allocation10 + $0x110] sm:$0xff]  ;;  %v2794_v29 = vpack.c.bf16 %v833_v22, %v827_v21 }
 0x1c0   :  { %v3046_v39 = vpack.c.bf16 %v823_v26, %v817_v25  ;;  %v865_v22 = vld [vmem:[#allocation10 + $0x260] sm:$0xff]  ;;  %v894_v25 = vld [vmem:[#allocation10 + $0x348] sm:$0xff] }
 0x1c1   :  { %v878_v26 = vld [vmem:[#allocation10 + $0x2c8] sm:$0xff] }
 0x1c2   :  { %2651 = vmatpush1.bf16.msra.mxu1 %v2650_v40  ;;  %2775 = vmatpush1.bf16.msra.mxu0 %v2774_v41  ;;  %v839_v40 = vld [vmem:[#allocation10 + $0x190] sm:$0xff]  ;;  %v845_v41 = vld [vmem:[#allocation10 + $0x1c0] sm:$0xff] }
 0x1c3   :  { %2777 = vmatprep.subr.bf16.mxu0 %v2776_v43  ;;  %2781 = vmatprep.subr.bf16.mxu1 %v2780_v44  ;;  %v829_v43 = vld [vmem:[#allocation10 + $0x140] sm:$0xff]  ;;  %v835_v44 = vld [vmem:[#allocation10 + $0x170] sm:$0xff]  ;;  %v2798_v49 = vpack.c.bf16 %v845_v41, %v839_v40  ;;  %v3064_v40 = vpack.c.bf16 %v884_v27, %v878_v26 }
 0x1c4   :  { %v3050_v50 = vpack.c.bf16 %v835_v44, %v829_v43  ;;  %v877_v41 = vld [vmem:[#allocation10 + $0x2c0] sm:$0xff]  ;;  %v906_v43 = vld [vmem:[#allocation10 + $0x3a8] sm:$0xff]  ;;  %v935_v27 = vld [vmem:[#allocation10 + $0x490] sm:$0xff] }
 0x1c5   :  { %1725 = vmatmul.mubr.f32.vlgmr.msra.gmra.mrb[4].mxu1 %v3771_v56  ;;  %v890_v44 = vld [vmem:[#allocation10 + $0x328] sm:$0xff] }
 0x1c6   :  { %2779 = vmatpush1.bf16.msra.mxu0 %v2778_v53  ;;  %2783 = vmatpush1.bf16.msra.mxu1 %v2782_v54  ;;  %v857_v53 = vld [vmem:[#allocation10 + $0x220] sm:$0xff]  ;;  %v2800_v54 = vpack.c.bf16 %v858_v46, %v852_v45  ;;  %v896_v45 = vld [vmem:[#allocation10 + $0x358] sm:$0xff] }
 0x1c7   :  { %1937 = vmatprep.mubr.f32.mxu1 %v3748_v51  ;;  %2785 = vmatprep.subr.bf16.mxu1 %v2784_v58  ;;  %v841_v58 = vld [vmem:[#allocation10 + $0x1a0] sm:$0xff]  ;;  %v2802_v1 = vpack.c.bf16 %v857_v53, %v851_v52  ;;  %v3068_v52 = vpack.c.bf16 %v896_v45, %v890_v44  ;;  %v947_v45 = vld [vmem:[#allocation10 + $0x4f0] sm:$0xff] }
 0x1c8   :  { %3037 = vmatprep.subr.bf16.mxu0 %v3036_v62  ;;  %v854_v62 = vld [vmem:[#allocation10 + $0x208] sm:$0xff]  ;;  %v3054_v2 = vpack.c.bf16 %v847_v59, %v841_v58  ;;  %v889_v53 = vld [vmem:[#allocation10 + $0x320] sm:$0xff] }
 0x1c9   :  { %1867 = vmatmul.mubr.f32.vlgmr.msra.gmra.mrb[4].mxu0 %v3775_v7  ;;  %v3056_v6 = vpack.c.bf16 %v860_v63, %v854_v62  ;;  %v918_v58 = vld [vmem:[#allocation10 + $0x408] sm:$0xff]  ;;  %v911_v63 = vld [vmem:[#allocation10 + $0x3d0] sm:$0xff] }
 0x1ca   :  { %2787 = vmatpush1.bf16.msra.mxu1 %v2786_v4  ;;  %3039 = vmatpush1.bf16.msra.mxu0 %v3038_v5  ;;  %v869_v4 = vld [vmem:[#allocation10 + $0x280] sm:$0xff]  ;;  %v2804_v5 = vpack.c.bf16 %v870_v61, %v864_v60  ;;  %v902_v59 = vld [vmem:[#allocation10 + $0x388] sm:$0xff]  ;;  %v908_v60 = vld [vmem:[#allocation10 + $0x3b8] sm:$0xff] }
 0x1cb   :  { %2221 = vmatprep.mubr.f32.mxu0 %v3748_v51  ;;  %2789 = vmatprep.subr.bf16.mxu1 %v2788_v9  ;;  %v3048_v51 = vpack.c.bf16 %v836_v35, %v830_v32  ;;  %v859_v9 = vld [vmem:[#allocation10 + $0x230] sm:$0xff]  ;;  %v2806_v16 = vpack.c.bf16 %v869_v4, %v863_v3  ;;  %v3072_v3 = vpack.c.bf16 %v908_v60, %v902_v59  ;;  %v901_v4 = vld [vmem:[#allocation10 + $0x380] sm:$0xff] }
 0x1cc   :  { %3041 = vmatprep.subr.bf16.mxu0 %v3040_v14  ;;  %v872_v14 = vld [vmem:[#allocation10 + $0x298] sm:$0xff]  ;;  %v3058_v17 = vpack.c.bf16 %v859_v9, %v853_v0  ;;  %v887_v35 = vld [vmem:[#allocation10 + $0x310] sm:$0xff]  ;;  %v930_v0 = vld [vmem:[#allocation10 + $0x468] sm:$0xff] }
 0x1cd   :  { %v3060_v21 = vpack.c.bf16 %v872_v14, %v866_v12  ;;  %v914_v9 = vld [vmem:[#allocation10 + $0x3e8] sm:$0xff]  ;;  %v923_v14 = vld [vmem:[#allocation10 + $0x430] sm:$0xff] }
 0x1ce   :  { %2791 = vmatpush1.bf16.msra.mxu1 %v2790_v19  ;;  %3043 = vmatpush1.bf16.msra.mxu0 %v3042_v20  ;;  %v881_v19 = vld [vmem:[#allocation10 + $0x2e0] sm:$0xff]  ;;  %v2808_v20 = vpack.c.bf16 %v882_v11, %v876_v10  ;;  %v920_v10 = vld [vmem:[#allocation10 + $0x418] sm:$0xff]  ;;  %v959_v60 = vld [vmem:[#allocation10 + $0x550] sm:$0xff] }
 0x1cf   :  { %2793 = vmatprep.subr.bf16.mxu1 %v2792_v23  ;;  %3045 = vmatprep.subr.bf16.mxu0 %v3044_v24  ;;  %v871_v23 = vld [vmem:[#allocation10 + $0x290] sm:$0xff]  ;;  %v888_v24 = vld [vmem:[#allocation10 + $0x318] sm:$0xff]  ;;  %v2810_v28 = vpack.c.bf16 %v881_v19, %v875_v18  ;;  %v3076_v18 = vpack.c.bf16 %v920_v10, %v914_v9  ;;  %v913_v19 = vld [vmem:[#allocation10 + $0x3e0] sm:$0xff] }
 0x1d0   :  { %v3062_v32 = vpack.c.bf16 %v871_v23, %v865_v22  ;;  %v942_v22 = vld [vmem:[#allocation10 + $0x4c8] sm:$0xff]  ;;  %v971_v10 = vld [vmem:[#allocation10 + $0x5b0] sm:$0xff] }
 0x1d1   :  { %v926_v23 = vld [vmem:[#allocation10 + $0x448] sm:$0xff] }
 0x1d2   :  { %2795 = vmatpush1.bf16.msra.mxu1 %v2794_v29  ;;  %3047 = vmatpush1.bf16.msra.mxu0 %v3046_v39  ;;  %v893_v29 = vld [vmem:[#allocation10 + $0x340] sm:$0xff]  ;;  %v2812_v39 = vpack.c.bf16 %v894_v25, %v888_v24  ;;  %v932_v24 = vld [vmem:[#allocation10 + $0x478] sm:$0xff] }
 0x1d3   :  { %2797 = vmatprep.subr.bf16.mxu1 %v2796_v42  ;;  %3049 = vmatprep.subr.bf16.mxu0 %v3048_v51  ;;  %v883_v42 = vld [vmem:[#allocation10 + $0x2f0] sm:$0xff]  ;;  %v900_v51 = vld [vmem:[#allocation10 + $0x378] sm:$0xff]  ;;  %v2814_v46 = vpack.c.bf16 %v893_v29, %v887_v35  ;;  %v3080_v35 = vpack.c.bf16 %v932_v24, %v926_v23  ;;  %v925_v29 = vld [vmem:[#allocation10 + $0x440] sm:$0xff] }
 0x1d4   :  { %v3066_v47 = vpack.c.bf16 %v883_v42, %v877_v41  ;;  %v954_v41 = vld [vmem:[#allocation10 + $0x528] sm:$0xff] }
 0x1d5   :  { %v938_v42 = vld [vmem:[#allocation10 + $0x4a8] sm:$0xff] }
 0x1d6   :  { %2799 = vmatpush1.bf16.msra.mxu1 %v2798_v49  ;;  %3051 = vmatpush1.bf16.msra.mxu0 %v3050_v50  ;;  %v905_v49 = vld [vmem:[#allocation10 + $0x3a0] sm:$0xff]  ;;  %v2816_v50 = vpack.c.bf16 %v906_v43, %v900_v51  ;;  %v944_v51 = vld [vmem:[#allocation10 + $0x4d8] sm:$0xff] }
 0x1d7   :  { %2801 = vmatprep.subr.bf16.mxu1 %v2800_v54  ;;  %3053 = vmatprep.subr.bf16.mxu0 %v3052_v55  ;;  %v895_v54 = vld [vmem:[#allocation10 + $0x350] sm:$0xff]  ;;  %v912_v55 = vld [vmem:[#allocation10 + $0x3d8] sm:$0xff]  ;;  %v2818_v61 = vpack.c.bf16 %v905_v49, %v899_v48  ;;  %v3084_v48 = vpack.c.bf16 %v944_v51, %v938_v42  ;;  %v937_v49 = vld [vmem:[#allocation10 + $0x4a0] sm:$0xff] }
 0x1d8   :  { %v3070_v62 = vpack.c.bf16 %v895_v54, %v889_v53  ;;  %v966_v53 = vld [vmem:[#allocation10 + $0x588] sm:$0xff] }
 0x1d9   :  { %v950_v54 = vld [vmem:[#allocation10 + $0x508] sm:$0xff] }
 0x1da   :  { %2803 = vmatpush1.bf16.msra.mxu1 %v2802_v1  ;;  %3055 = vmatpush1.bf16.msra.mxu0 %v3054_v2  ;;  %v917_v1 = vld [vmem:[#allocation10 + $0x400] sm:$0xff]  ;;  %v2820_v2 = vpack.c.bf16 %v918_v58, %v912_v55  ;;  %v956_v55 = vld [vmem:[#allocation10 + $0x538] sm:$0xff] }
 0x1db   :  { %2805 = vmatprep.subr.bf16.mxu1 %v2804_v5  ;;  %3057 = vmatprep.subr.bf16.mxu0 %v3056_v6  ;;  %v907_v5 = vld [vmem:[#allocation10 + $0x3b0] sm:$0xff]  ;;  %v924_v6 = vld [vmem:[#allocation10 + $0x438] sm:$0xff]  ;;  %v2822_v11 = vpack.c.bf16 %v917_v1, %v911_v63  ;;  %v3088_v63 = vpack.c.bf16 %v956_v55, %v950_v54  ;;  %v949_v1 = vld [vmem:[#allocation10 + $0x500] sm:$0xff] }
 0x1dc   :  { %v3074_v12 = vpack.c.bf16 %v907_v5, %v901_v4  ;;  %v978_v4 = vld [vmem:[#allocation10 + $0x5e8] sm:$0xff]  ;;  %v1007_v55 = vld [vmem:[#allocation10 + $0x6d0] sm:$0xff] }
 0x1dd   :  { %v962_v5 = vld [vmem:[#allocation10 + $0x568] sm:$0xff] }
 0x1de   :  { %2807 = vmatpush1.bf16.msra.mxu1 %v2806_v16  ;;  %3059 = vmatpush1.bf16.msra.mxu0 %v3058_v17  ;;  %v929_v16 = vld [vmem:[#allocation10 + $0x460] sm:$0xff]  ;;  %v2824_v17 = vpack.c.bf16 %v930_v0, %v924_v6  ;;  %v968_v6 = vld [vmem:[#allocation10 + $0x598] sm:$0xff] }
 0x1df   :  { %2809 = vmatprep.subr.bf16.mxu1 %v2808_v20  ;;  %3061 = vmatprep.subr.bf16.mxu0 %v3060_v21  ;;  %v919_v20 = vld [vmem:[#allocation10 + $0x410] sm:$0xff]  ;;  %v936_v21 = vld [vmem:[#allocation10 + $0x498] sm:$0xff]  ;;  %v2826_v25 = vpack.c.bf16 %v929_v16, %v923_v14  ;;  %v3092_v14 = vpack.c.bf16 %v968_v6, %v962_v5  ;;  %v961_v16 = vld [vmem:[#allocation10 + $0x560] sm:$0xff] }
 0x1e0   :  { %v3078_v26 = vpack.c.bf16 %v919_v20, %v913_v19  ;;  %v990_v19 = vld [vmem:[#allocation10 + $0x648] sm:$0xff] }
 0x1e1   :  { %v974_v20 = vld [vmem:[#allocation10 + $0x5c8] sm:$0xff] }
 0x1e2   :  { %2811 = vmatpush1.bf16.msra.mxu1 %v2810_v28  ;;  %3063 = vmatpush1.bf16.msra.mxu0 %v3062_v32  ;;  %v941_v28 = vld [vmem:[#allocation10 + $0x4c0] sm:$0xff]  ;;  %v2828_v32 = vpack.c.bf16 %v942_v22, %v936_v21  ;;  %v980_v21 = vld [vmem:[#allocation10 + $0x5f8] sm:$0xff] }
 0x1e3   :  { %2813 = vmatprep.subr.bf16.mxu1 %v2812_v39  ;;  %3065 = vmatprep.subr.bf16.mxu0 %v3064_v40  ;;  %v931_v39 = vld [vmem:[#allocation10 + $0x470] sm:$0xff]  ;;  %v948_v40 = vld [vmem:[#allocation10 + $0x4f8] sm:$0xff]  ;;  %v2830_v43 = vpack.c.bf16 %v941_v28, %v935_v27  ;;  %v989_v27 = vld [vmem:[#allocation10 + $0x640] sm:$0xff] }
 0x1e4   :  { %v3082_v44 = vpack.c.bf16 %v931_v39, %v925_v29  ;;  %v973_v28 = vld [vmem:[#allocation10 + $0x5c0] sm:$0xff]  ;;  %v1002_v29 = vld [vmem:[#allocation10 + $0x6a8] sm:$0xff] }
 0x1e5   :  { %v986_v39 = vld [vmem:[#allocation10 + $0x628] sm:$0xff] }
 0x1e6   :  { %2815 = vmatpush1.bf16.msra.mxu1 %v2814_v46  ;;  %3067 = vmatpush1.bf16.msra.mxu0 %v3066_v47  ;;  %v953_v46 = vld [vmem:[#allocation10 + $0x520] sm:$0xff]  ;;  %v2832_v47 = vpack.c.bf16 %v954_v41, %v948_v40  ;;  %v992_v40 = vld [vmem:[#allocation10 + $0x658] sm:$0xff] }
 0x1e7   :  { %2817 = vmatprep.subr.bf16.mxu1 %v2816_v50  ;;  %3069 = vmatprep.subr.bf16.mxu0 %v3068_v52  ;;  %v943_v50 = vld [vmem:[#allocation10 + $0x4d0] sm:$0xff]  ;;  %v960_v52 = vld [vmem:[#allocation10 + $0x558] sm:$0xff]  ;;  %v2834_v58 = vpack.c.bf16 %v953_v46, %v947_v45  ;;  %v3100_v45 = vpack.c.bf16 %v992_v40, %v986_v39  ;;  %v985_v46 = vld [vmem:[#allocation10 + $0x620] sm:$0xff] }
 0x1e8   :  { %v3086_v59 = vpack.c.bf16 %v943_v50, %v937_v49  ;;  %v1014_v49 = vld [vmem:[#allocation10 + $0x708] sm:$0xff]  ;;  %v1043_v39 = vld [vmem:[#allocation10 + $0x7f0] sm:$0xff]  ;;  %v1049_v40 = vld [vmem:[#allocation10 + $0x820] sm:$0xff] }
 0x1e9   :  { %v998_v50 = vld [vmem:[#allocation10 + $0x688] sm:$0xff] }
 0x1ea   :  { %2819 = vmatpush1.bf16.msra.mxu1 %v2818_v61  ;;  %3071 = vmatpush1.bf16.msra.mxu0 %v3070_v62  ;;  %v965_v61 = vld [vmem:[#allocation10 + $0x580] sm:$0xff]  ;;  %v2836_v62 = vpack.c.bf16 %v966_v53, %v960_v52  ;;  %v1004_v52 = vld [vmem:[#allocation10 + $0x6b8] sm:$0xff] }
 0x1eb   :  { %2821 = vmatprep.subr.bf16.mxu1 %v2820_v2  ;;  %3073 = vmatprep.subr.bf16.mxu0 %v3072_v3  ;;  %v955_v2 = vld [vmem:[#allocation10 + $0x530] sm:$0xff]  ;;  %v972_v3 = vld [vmem:[#allocation10 + $0x5b8] sm:$0xff]  ;;  %v2838_v0 = vpack.c.bf16 %v965_v61, %v959_v60  ;;  %v3104_v61 = vpack.c.bf16 %v1004_v52, %v998_v50  ;;  %v1061_v52 = vld [vmem:[#allocation10 + $0x880] sm:$0xff] }
 0x1ec   :  { %v3090_v9 = vpack.c.bf16 %v955_v2, %v949_v1  ;;  %v1026_v1 = vld [vmem:[#allocation10 + $0x768] sm:$0xff]  ;;  %v1055_v50 = vld [vmem:[#allocation10 + $0x850] sm:$0xff] }
 0x1ed   :  { %v1010_v2 = vld [vmem:[#allocation10 + $0x6e8] sm:$0xff] }
 0x1ee   :  { %2823 = vmatpush1.bf16.msra.mxu1 %v2822_v11  ;;  %3075 = vmatpush1.bf16.msra.mxu0 %v3074_v12  ;;  %v977_v11 = vld [vmem:[#allocation10 + $0x5e0] sm:$0xff]  ;;  %v2840_v12 = vpack.c.bf16 %v978_v4, %v972_v3  ;;  %v1016_v3 = vld [vmem:[#allocation10 + $0x718] sm:$0xff] }
 0x1ef   :  { %2825 = vmatprep.subr.bf16.mxu1 %v2824_v17  ;;  %3077 = vmatprep.subr.bf16.mxu0 %v3076_v18  ;;  %v967_v17 = vld [vmem:[#allocation10 + $0x590] sm:$0xff]  ;;  %v984_v18 = vld [vmem:[#allocation10 + $0x618] sm:$0xff]  ;;  %v2842_v22 = vpack.c.bf16 %v977_v11, %v971_v10  ;;  %v1009_v10 = vld [vmem:[#allocation10 + $0x6e0] sm:$0xff]  ;;  %v3108_v11 = vpack.c.bf16 %v1016_v3, %v1010_v2 }
 0x1f0   :  { %v3094_v23 = vpack.c.bf16 %v967_v17, %v961_v16  ;;  %v2844_v24 = vpack.c.bf16 %v990_v19, %v984_v18  ;;  %v1038_v16 = vld [vmem:[#allocation10 + $0x7c8] sm:$0xff]  ;;  %v1028_v18 = vld [vmem:[#allocation10 + $0x778] sm:$0xff]  ;;  %v1067_v2 = vld [vmem:[#allocation10 + $0x8b0] sm:$0xff] }
 0x1f1   :  { %v1022_v17 = vld [vmem:[#allocation10 + $0x748] sm:$0xff]  ;;  %v1073_v3 = vld [vmem:[#allocation10 + $0x8e0] sm:$0xff] }
 0x1f2   :  { %2827 = vmatpush1.bf16.msra.mxu1 %v2826_v25  ;;  %3079 = vmatpush1.bf16.msra.mxu0 %v3078_v26  ;;  %v3096_v25 = vpack.c.bf16 %v980_v21, %v974_v20  ;;  %v983_v26 = vld [vmem:[#allocation10 + $0x610] sm:$0xff]  ;;  %v1037_v21 = vld [vmem:[#allocation10 + $0x7c0] sm:$0xff] }
 0x1f3   :  { %2829 = vmatprep.subr.bf16.mxu1 %v2828_v32  ;;  %3081 = vmatprep.subr.bf16.mxu0 %v3080_v35  ;;  %v979_v32 = vld [vmem:[#allocation10 + $0x5f0] sm:$0xff]  ;;  %v996_v35 = vld [vmem:[#allocation10 + $0x678] sm:$0xff]  ;;  %v2846_v41 = vpack.c.bf16 %v989_v27, %v983_v26  ;;  %v1050_v26 = vld [vmem:[#allocation10 + $0x828] sm:$0xff] }
 0x1f4   :  { %v3098_v42 = vpack.c.bf16 %v979_v32, %v973_v28  ;;  %v2848_v51 = vpack.c.bf16 %v1002_v29, %v996_v35  ;;  %v1034_v27 = vld [vmem:[#allocation10 + $0x7a8] sm:$0xff]  ;;  %v1040_v28 = vld [vmem:[#allocation10 + $0x7d8] sm:$0xff] }
 0x1f6   :  { %2831 = vmatpush1.bf16.msra.mxu1 %v2830_v43  ;;  %3083 = vmatpush1.bf16.msra.mxu0 %v3082_v44  ;;  %v995_v43 = vld [vmem:[#allocation10 + $0x670] sm:$0xff]  ;;  %v1001_v44 = vld [vmem:[#allocation10 + $0x6a0] sm:$0xff] }
 0x1f7   :  { %2833 = vmatprep.subr.bf16.mxu1 %v2832_v47  ;;  %3085 = vmatprep.subr.bf16.mxu0 %v3084_v48  ;;  %v991_v47 = vld [vmem:[#allocation10 + $0x650] sm:$0xff]  ;;  %v1008_v48 = vld [vmem:[#allocation10 + $0x6d8] sm:$0xff]  ;;  %v2850_v53 = vpack.c.bf16 %v1001_v44, %v995_v43  ;;  %v1062_v44 = vld [vmem:[#allocation10 + $0x888] sm:$0xff] }
 0x1f8   :  { %v3102_v54 = vpack.c.bf16 %v991_v47, %v985_v46  ;;  %v2852_v60 = vpack.c.bf16 %v1014_v49, %v1008_v48  ;;  %v1056_v43 = vld [vmem:[#allocation10 + $0x858] sm:$0xff]  ;;  %v2866_v47 = vpack.c.bf16 %v1049_v40, %v1043_v39  ;;  %v1110_v40 = vld [vmem:[#allocation10 + $0xa08] sm:$0xff] }
 0x1f9   :  { %v1052_v46 = vld [vmem:[#allocation10 + $0x838] sm:$0xff]  ;;  %v2868_v49 = vpack.c.bf16 %v1062_v44, %v1056_v43 }
 0x1fa   :  { %2835 = vmatpush1.bf16.msra.mxu1 %v2834_v58  ;;  %3087 = vmatpush1.bf16.msra.mxu0 %v3086_v59  ;;  %v1013_v58 = vld [vmem:[#allocation10 + $0x700] sm:$0xff]  ;;  %v1104_v39 = vld [vmem:[#allocation10 + $0x9d8] sm:$0xff] }
 0x1fb   :  { %2837 = vmatprep.subr.bf16.mxu1 %v2836_v62  ;;  %3089 = vmatprep.subr.bf16.mxu0 %v3088_v63  ;;  %v997_v59 = vld [vmem:[#allocation10 + $0x680] sm:$0xff]  ;;  %v1003_v62 = vld [vmem:[#allocation10 + $0x6b0] sm:$0xff]  ;;  %v1020_v63 = vld [vmem:[#allocation10 + $0x738] sm:$0xff]  ;;  %v2854_v4 = vpack.c.bf16 %v1013_v58, %v1007_v55  ;;  %v2884_v44 = vpack.c.bf16 %v1110_v40, %v1104_v39 }
 0x1fc   :  { %v3106_v5 = vpack.c.bf16 %v1003_v62, %v997_v59  ;;  %v2856_v6 = vpack.c.bf16 %v1026_v1, %v1020_v63  ;;  %v1051_v55 = vld [vmem:[#allocation10 + $0x830] sm:$0xff]  ;;  %v1068_v58 = vld [vmem:[#allocation10 + $0x8b8] sm:$0xff]  ;;  %v1074_v59 = vld [vmem:[#allocation10 + $0x8e8] sm:$0xff]  ;;  %v2870_v62 = vpack.c.bf16 %v1061_v52, %v1055_v50 }
 0x1fd   :  { %v2872_v1 = vpack.c.bf16 %v1074_v59, %v1068_v58  ;;  %v1116_v50 = vld [vmem:[#allocation10 + $0xa38] sm:$0xff]  ;;  %v1122_v52 = vld [vmem:[#allocation10 + $0xa68] sm:$0xff] }
 0x1fe   :  { %2839 = vmatpush1.bf16.msra.mxu1 %v2838_v0  ;;  %3091 = vmatpush1.bf16.msra.mxu0 %v3090_v9  ;;  %v1019_v0 = vld [vmem:[#allocation10 + $0x730] sm:$0xff]  ;;  %v1025_v9 = vld [vmem:[#allocation10 + $0x760] sm:$0xff]  ;;  %v2888_v59 = vpack.c.bf16 %v1122_v52, %v1116_v50 }
 0x1ff   :  { %2841 = vmatprep.subr.bf16.mxu1 %v2840_v12  ;;  %3093 = vmatprep.subr.bf16.mxu0 %v3092_v14  ;;  %v1015_v12 = vld [vmem:[#allocation10 + $0x710] sm:$0xff]  ;;  %v1032_v14 = vld [vmem:[#allocation10 + $0x798] sm:$0xff] }
 0x200   :  { %v3110_v19 = vpack.c.bf16 %v1015_v12, %v1009_v10  ;;  %v2860_v20 = vpack.c.bf16 %v1038_v16, %v1032_v14  ;;  %v1070_v10 = vld [vmem:[#allocation10 + $0x8c8] sm:$0xff]  ;;  %v2874_v12 = vpack.c.bf16 %v1073_v3, %v1067_v2  ;;  %v1128_v2 = vld [vmem:[#allocation10 + $0xa98] sm:$0xff] }
 0x201   :  { %v1134_v3 = vld [vmem:[#allocation10 + $0xac8] sm:$0xff] }
 0x202   :  { %2843 = vmatpush1.bf16.msra.mxu1 %v2842_v22  ;;  %3095 = vmatpush1.bf16.msra.mxu0 %v3094_v23  ;;  %v1021_v22 = vld [vmem:[#allocation10 + $0x740] sm:$0xff]  ;;  %v3112_v23 = vpack.c.bf16 %v1028_v18, %v1022_v17  ;;  %v1079_v17 = vld [vmem:[#allocation10 + $0x910] sm:$0xff] }
 0x203   :  { %2845 = vmatprep.subr.bf16.mxu1 %v2844_v24  ;;  %3097 = vmatprep.subr.bf16.mxu0 %v3096_v25  ;;  %v1027_v24 = vld [vmem:[#allocation10 + $0x770] sm:$0xff]  ;;  %v1044_v25 = vld [vmem:[#allocation10 + $0x7f8] sm:$0xff]  ;;  %v1085_v18 = vld [vmem:[#allocation10 + $0x940] sm:$0xff] }
 0x204   :  { %v3114_v35 = vpack.c.bf16 %v1027_v24, %v1021_v22  ;;  %v2864_v29 = vpack.c.bf16 %v1050_v26, %v1044_v25  ;;  %v1082_v22 = vld [vmem:[#allocation10 + $0x928] sm:$0xff]  ;;  %v2878_v24 = vpack.c.bf16 %v1085_v18, %v1079_v17  ;;  %v1140_v17 = vld [vmem:[#allocation10 + $0xaf8] sm:$0xff] }
 0x205   :  { %1938 = vmatmul.mubr.f32.vlgmr.msra.gmra.mrb[6].mxu1 %v3750_v57  ;;  %v1146_v18 = vld [vmem:[#allocation10 + $0xb28] sm:$0xff] }
 0x206   :  { %2847 = vmatpush1.bf16.msra.mxu1 %v2846_v41  ;;  %2008 = vmatprep.mubr.f32.mxu1 %v3758_v13  ;;  %v1033_v41 = vld [vmem:[#allocation10 + $0x7a0] sm:$0xff] }
 0x207   :  { %3099 = vmatpush1.bf16.msra.mxu0 %v3098_v42  ;;  %2849 = vmatprep.subr.bf16.mxu1 %v2848_v51  ;;  %v3116_v42 = vpack.c.bf16 %v1040_v28, %v1034_v27  ;;  %v1039_v51 = vld [vmem:[#allocation10 + $0x7d0] sm:$0xff]  ;;  %v1097_v28 = vld [vmem:[#allocation10 + $0x9a0] sm:$0xff] }
 0x208   :  { %3101 = vmatprep.subr.bf16.mxu0 %v3100_v45  ;;  %v1046_v45 = vld [vmem:[#allocation10 + $0x808] sm:$0xff]  ;;  %v3118_v48 = vpack.c.bf16 %v1039_v51, %v1033_v41  ;;  %v1091_v27 = vld [vmem:[#allocation10 + $0x970] sm:$0xff] }
 0x209   :  { %v1094_v41 = vld [vmem:[#allocation10 + $0x988] sm:$0xff]  ;;  %v2882_v51 = vpack.c.bf16 %v1097_v28, %v1091_v27  ;;  %v1152_v27 = vld [vmem:[#allocation10 + $0xb58] sm:$0xff] }
 0x20a   :  { %2222 = vmatmul.mubr.f32.vlgmr.msra.gmra.mrb[6].mxu0 %v3750_v57  ;;  %2851 = vmatpush1.bf16.msra.mxu1 %v2850_v53  ;;  %v2858_v57 = vpack.c.bf16 %v1025_v9, %v1019_v0  ;;  %v1045_v53 = vld [vmem:[#allocation10 + $0x800] sm:$0xff]  ;;  %v1080_v0 = vld [vmem:[#allocation10 + $0x918] sm:$0xff]  ;;  %v1086_v9 = vld [vmem:[#allocation10 + $0x948] sm:$0xff] }
 0x20b   :  { %3103 = vmatpush1.bf16.msra.mxu0 %v3102_v54  ;;  %2292 = vmatprep.mubr.f32.mxu0 %v3758_v13  ;;  %v1031_v13 = vld [vmem:[#allocation10 + $0x790] sm:$0xff]  ;;  %v3120_v54 = vpack.c.bf16 %v1052_v46, %v1046_v45  ;;  %v3122_v63 = vpack.c.bf16 %v1051_v55, %v1045_v53  ;;  %v2876_v16 = vpack.c.bf16 %v1086_v9, %v1080_v0  ;;  %v1109_v46 = vld [vmem:[#allocation10 + $0xa00] sm:$0xff]  ;;  %v1106_v53 = vld [vmem:[#allocation10 + $0x9e8] sm:$0xff] }
 0x20c   :  { %2853 = vmatprep.subr.bf16.mxu1 %v2852_v60  ;;  %3105 = vmatprep.subr.bf16.mxu0 %v3104_v61  ;;  %v2862_v32 = vpack.c.bf16 %v1037_v21, %v1031_v13  ;;  %v1058_v60 = vld [vmem:[#allocation10 + $0x868] sm:$0xff]  ;;  %v1064_v61 = vld [vmem:[#allocation10 + $0x898] sm:$0xff]  ;;  %v1103_v45 = vld [vmem:[#allocation10 + $0x9d0] sm:$0xff]  ;;  %v2892_v9 = vpack.c.bf16 %v1134_v3, %v1128_v2 }
 0x20d   :  { %v1092_v13 = vld [vmem:[#allocation10 + $0x978] sm:$0xff]  ;;  %v1098_v21 = vld [vmem:[#allocation10 + $0x9a8] sm:$0xff]  ;;  %v2886_v55 = vpack.c.bf16 %v1109_v46, %v1103_v45 }
 0x20e   :  { %2855 = vmatpush1.bf16.msra.mxu1 %v2854_v4  ;;  %v1057_v4 = vld [vmem:[#allocation10 + $0x860] sm:$0xff]  ;;  %v2880_v26 = vpack.c.bf16 %v1098_v21, %v1092_v13  ;;  %v2896_v21 = vpack.c.bf16 %v1146_v18, %v1140_v17  ;;  %v1158_v28 = vld [vmem:[#allocation10 + $0xb88] sm:$0xff]  ;;  %v1164_v45 = vld [vmem:[#allocation10 + $0xbb8] sm:$0xff] }
 0x20f   :  { %3107 = vmatpush1.bf16.msra.mxu0 %v3106_v5  ;;  %2857 = vmatprep.subr.bf16.mxu1 %v2856_v6  ;;  %v3124_v5 = vpack.c.bf16 %v1064_v61, %v1058_v60  ;;  %v1063_v6 = vld [vmem:[#allocation10 + $0x890] sm:$0xff]  ;;  %v1121_v61 = vld [vmem:[#allocation10 + $0xa60] sm:$0xff]  ;;  %v2900_v40 = vpack.c.bf16 %v1158_v28, %v1152_v27  ;;  %v1170_v46 = vld [vmem:[#allocation10 + $0xbe8] sm:$0xff] }
 0x210   :  { %3109 = vmatprep.subr.bf16.mxu0 %v3108_v11  ;;  %v1076_v11 = vld [vmem:[#allocation10 + $0x8f8] sm:$0xff]  ;;  %v3126_v14 = vpack.c.bf16 %v1063_v6, %v1057_v4  ;;  %v1115_v60 = vld [vmem:[#allocation10 + $0xa30] sm:$0xff]  ;;  %v1118_v4 = vld [vmem:[#allocation10 + $0xa48] sm:$0xff]  ;;  %v2904_v52 = vpack.c.bf16 %v1170_v46, %v1164_v45 }
 0x211   :  { %v2890_v6 = vpack.c.bf16 %v1121_v61, %v1115_v60  ;;  %v1176_v60 = vld [vmem:[#allocation10 + $0xc18] sm:$0xff]  ;;  %v1182_v61 = vld [vmem:[#allocation10 + $0xc48] sm:$0xff]  ;;  %v1199_v28 = vld [vmem:[#allocation10 + $0xcd0] sm:$0xff] }
 0x212   :  { %2859 = vmatpush1.bf16.msra.mxu1 %v2858_v57  ;;  %v1069_v57 = vld [vmem:[#allocation10 + $0x8c0] sm:$0xff]  ;;  %v2908_v3 = vpack.c.bf16 %v1182_v61, %v1176_v60 }
 0x213   :  { %3111 = vmatpush1.bf16.msra.mxu0 %v3110_v19  ;;  %2861 = vmatprep.subr.bf16.mxu1 %v2860_v20  ;;  %v3128_v19 = vpack.c.bf16 %v1076_v11, %v1070_v10  ;;  %v1075_v20 = vld [vmem:[#allocation10 + $0x8f0] sm:$0xff]  ;;  %v1133_v11 = vld [vmem:[#allocation10 + $0xac0] sm:$0xff] }
 0x214   :  { %3113 = vmatprep.subr.bf16.mxu0 %v3112_v23  ;;  %v1088_v23 = vld [vmem:[#allocation10 + $0x958] sm:$0xff]  ;;  %v3130_v25 = vpack.c.bf16 %v1075_v20, %v1069_v57  ;;  %v1127_v10 = vld [vmem:[#allocation10 + $0xa90] sm:$0xff]  ;;  %v1130_v57 = vld [vmem:[#allocation10 + $0xaa8] sm:$0xff] }
 0x215   :  { %v2894_v20 = vpack.c.bf16 %v1133_v11, %v1127_v10  ;;  %v1188_v10 = vld [vmem:[#allocation10 + $0xc78] sm:$0xff]  ;;  %v1194_v11 = vld [vmem:[#allocation10 + $0xca8] sm:$0xff]  ;;  %v1229_v61 = vld [vmem:[#allocation10 + $0xdc0] sm:$0xff] }
 0x216   :  { %2863 = vmatpush1.bf16.msra.mxu1 %v2862_v32  ;;  %v1081_v32 = vld [vmem:[#allocation10 + $0x920] sm:$0xff]  ;;  %v2912_v18 = vpack.c.bf16 %v1194_v11, %v1188_v10  ;;  %v1235_v10 = vld [vmem:[#allocation10 + $0xdf0] sm:$0xff] }
 0x217   :  { %3115 = vmatpush1.bf16.msra.mxu0 %v3114_v35  ;;  %2865 = vmatprep.subr.bf16.mxu1 %v2864_v29  ;;  %v3132_v35 = vpack.c.bf16 %v1088_v23, %v1082_v22  ;;  %v1087_v29 = vld [vmem:[#allocation10 + $0x950] sm:$0xff]  ;;  %v1145_v23 = vld [vmem:[#allocation10 + $0xb20] sm:$0xff] }
 0x218   :  { %3117 = vmatprep.subr.bf16.mxu0 %v3116_v42  ;;  %v1100_v42 = vld [vmem:[#allocation10 + $0x9b8] sm:$0xff]  ;;  %v3134_v43 = vpack.c.bf16 %v1087_v29, %v1081_v32  ;;  %v1139_v22 = vld [vmem:[#allocation10 + $0xaf0] sm:$0xff]  ;;  %v1142_v32 = vld [vmem:[#allocation10 + $0xb08] sm:$0xff] }
 0x219   :  { %v2898_v29 = vpack.c.bf16 %v1145_v23, %v1139_v22  ;;  %v1200_v22 = vld [vmem:[#allocation10 + $0xcd8] sm:$0xff]  ;;  %v1206_v23 = vld [vmem:[#allocation10 + $0xd08] sm:$0xff]  ;;  %v1241_v11 = vld [vmem:[#allocation10 + $0xe20] sm:$0xff] }
 0x21a   :  { %2867 = vmatpush1.bf16.msra.mxu1 %v2866_v47  ;;  %v1093_v47 = vld [vmem:[#allocation10 + $0x980] sm:$0xff] }
 0x21b   :  { %3119 = vmatpush1.bf16.msra.mxu0 %v3118_v48  ;;  %2869 = vmatprep.subr.bf16.mxu1 %v2868_v49  ;;  %v3136_v48 = vpack.c.bf16 %v1100_v42, %v1094_v41  ;;  %v1099_v49 = vld [vmem:[#allocation10 + $0x9b0] sm:$0xff]  ;;  %v1157_v42 = vld [vmem:[#allocation10 + $0xb80] sm:$0xff] }
 0x21c   :  { %3121 = vmatprep.subr.bf16.mxu0 %v3120_v54  ;;  %v1112_v54 = vld [vmem:[#allocation10 + $0xa18] sm:$0xff]  ;;  %v3138_v58 = vpack.c.bf16 %v1099_v49, %v1093_v47  ;;  %v1151_v41 = vld [vmem:[#allocation10 + $0xb50] sm:$0xff]  ;;  %v1154_v47 = vld [vmem:[#allocation10 + $0xb68] sm:$0xff] }
 0x21d   :  { %v2902_v49 = vpack.c.bf16 %v1157_v42, %v1151_v41  ;;  %v1212_v41 = vld [vmem:[#allocation10 + $0xd38] sm:$0xff]  ;;  %v1218_v42 = vld [vmem:[#allocation10 + $0xd68] sm:$0xff] }
 0x21e   :  { %2871 = vmatpush1.bf16.msra.mxu1 %v2870_v62  ;;  %v1105_v62 = vld [vmem:[#allocation10 + $0x9e0] sm:$0xff]  ;;  %v2920_v46 = vpack.c.bf16 %v1218_v42, %v1212_v41  ;;  %v1259_v41 = vld [vmem:[#allocation10 + $0xeb0] sm:$0xff] }
 0x21f   :  { %3123 = vmatpush1.bf16.msra.mxu0 %v3122_v63  ;;  %2873 = vmatprep.subr.bf16.mxu1 %v2872_v1  ;;  %v3140_v63 = vpack.c.bf16 %v1112_v54, %v1106_v53  ;;  %v1111_v1 = vld [vmem:[#allocation10 + $0xa10] sm:$0xff]  ;;  %v1169_v54 = vld [vmem:[#allocation10 + $0xbe0] sm:$0xff] }
 0x220   :  { %3125 = vmatprep.subr.bf16.mxu0 %v3124_v5  ;;  %v1124_v5 = vld [vmem:[#allocation10 + $0xa78] sm:$0xff]  ;;  %v3142_v0 = vpack.c.bf16 %v1111_v1, %v1105_v62  ;;  %v1163_v53 = vld [vmem:[#allocation10 + $0xbb0] sm:$0xff]  ;;  %v1166_v62 = vld [vmem:[#allocation10 + $0xbc8] sm:$0xff] }
 0x221   :  { %v2906_v1 = vpack.c.bf16 %v1169_v54, %v1163_v53  ;;  %v1224_v53 = vld [vmem:[#allocation10 + $0xd98] sm:$0xff]  ;;  %v1230_v54 = vld [vmem:[#allocation10 + $0xdc8] sm:$0xff]  ;;  %v1265_v42 = vld [vmem:[#allocation10 + $0xee0] sm:$0xff] }
 0x222   :  { %2875 = vmatpush1.bf16.msra.mxu1 %v2874_v12  ;;  %v1117_v12 = vld [vmem:[#allocation10 + $0xa40] sm:$0xff]  ;;  %v2924_v60 = vpack.c.bf16 %v1230_v54, %v1224_v53  ;;  %v1271_v53 = vld [vmem:[#allocation10 + $0xf10] sm:$0xff] }
 0x223   :  { %3127 = vmatpush1.bf16.msra.mxu0 %v3126_v14  ;;  %2877 = vmatprep.subr.bf16.mxu1 %v2876_v16  ;;  %v3144_v14 = vpack.c.bf16 %v1124_v5, %v1118_v4  ;;  %v1123_v16 = vld [vmem:[#allocation10 + $0xa70] sm:$0xff]  ;;  %v1181_v5 = vld [vmem:[#allocation10 + $0xc40] sm:$0xff] }
 0x224   :  { %3129 = vmatprep.subr.bf16.mxu0 %v3128_v19  ;;  %v1136_v19 = vld [vmem:[#allocation10 + $0xad8] sm:$0xff]  ;;  %v3146_v13 = vpack.c.bf16 %v1123_v16, %v1117_v12  ;;  %v1175_v4 = vld [vmem:[#allocation10 + $0xc10] sm:$0xff]  ;;  %v1178_v12 = vld [vmem:[#allocation10 + $0xc28] sm:$0xff] }
 0x225   :  { %v2910_v16 = vpack.c.bf16 %v1181_v5, %v1175_v4  ;;  %v1226_v4 = vld [vmem:[#allocation10 + $0xda8] sm:$0xff]  ;;  %v1232_v5 = vld [vmem:[#allocation10 + $0xdd8] sm:$0xff]  ;;  %v1277_v54 = vld [vmem:[#allocation10 + $0xf40] sm:$0xff] }
 0x226   :  { %2879 = vmatpush1.bf16.msra.mxu1 %v2878_v24  ;;  %v1129_v24 = vld [vmem:[#allocation10 + $0xaa0] sm:$0xff] }
 0x227   :  { %3131 = vmatpush1.bf16.msra.mxu0 %v3130_v25  ;;  %2881 = vmatprep.subr.bf16.mxu1 %v2880_v26  ;;  %v3148_v25 = vpack.c.bf16 %v1136_v19, %v1130_v57  ;;  %v1135_v26 = vld [vmem:[#allocation10 + $0xad0] sm:$0xff]  ;;  %v1193_v19 = vld [vmem:[#allocation10 + $0xca0] sm:$0xff] }
 0x228   :  { %3133 = vmatprep.subr.bf16.mxu0 %v3132_v35  ;;  %v1148_v35 = vld [vmem:[#allocation10 + $0xb38] sm:$0xff]  ;;  %v3150_v39 = vpack.c.bf16 %v1135_v26, %v1129_v24  ;;  %v1187_v57 = vld [vmem:[#allocation10 + $0xc70] sm:$0xff]  ;;  %v1190_v24 = vld [vmem:[#allocation10 + $0xc88] sm:$0xff] }
 0x229   :  { %v2914_v26 = vpack.c.bf16 %v1193_v19, %v1187_v57  ;;  %v1238_v57 = vld [vmem:[#allocation10 + $0xe08] sm:$0xff]  ;;  %v1244_v19 = vld [vmem:[#allocation10 + $0xe38] sm:$0xff] }
 0x22a   :  { %2883 = vmatpush1.bf16.msra.mxu1 %v2882_v51  ;;  %v1141_v51 = vld [vmem:[#allocation10 + $0xb00] sm:$0xff] }
 0x22b   :  { %3135 = vmatpush1.bf16.msra.mxu0 %v3134_v43  ;;  %2885 = vmatprep.subr.bf16.mxu1 %v2884_v44  ;;  %v3152_v43 = vpack.c.bf16 %v1148_v35, %v1142_v32  ;;  %v1147_v44 = vld [vmem:[#allocation10 + $0xb30] sm:$0xff]  ;;  %v1205_v32 = vld [vmem:[#allocation10 + $0xd00] sm:$0xff] }
 0x22c   :  { %3137 = vmatprep.subr.bf16.mxu0 %v3136_v48  ;;  %v1160_v48 = vld [vmem:[#allocation10 + $0xb98] sm:$0xff]  ;;  %v3154_v50 = vpack.c.bf16 %v1147_v44, %v1141_v51  ;;  %v1189_v35 = vld [vmem:[#allocation10 + $0xc80] sm:$0xff]  ;;  %v1202_v51 = vld [vmem:[#allocation10 + $0xce8] sm:$0xff]  ;;  %v2918_v44 = vpack.c.bf16 %v1205_v32, %v1199_v28 }
 0x22d   :  { %v1266_v28 = vld [vmem:[#allocation10 + $0xee8] sm:$0xff] }
 0x22e   :  { %2887 = vmatpush1.bf16.msra.mxu1 %v2886_v55  ;;  %v1153_v55 = vld [vmem:[#allocation10 + $0xb60] sm:$0xff]  ;;  %v1250_v32 = vld [vmem:[#allocation10 + $0xe68] sm:$0xff] }
 0x22f   :  { %3139 = vmatpush1.bf16.msra.mxu0 %v3138_v58  ;;  %2889 = vmatprep.subr.bf16.mxu1 %v2888_v59  ;;  %v3156_v58 = vpack.c.bf16 %v1160_v48, %v1154_v47  ;;  %v1159_v59 = vld [vmem:[#allocation10 + $0xb90] sm:$0xff]  ;;  %v1217_v48 = vld [vmem:[#allocation10 + $0xd60] sm:$0xff] }
 0x230   :  { %3141 = vmatprep.subr.bf16.mxu0 %v3140_v63  ;;  %v1172_v63 = vld [vmem:[#allocation10 + $0xbf8] sm:$0xff]  ;;  %v3158_v2 = vpack.c.bf16 %v1159_v59, %v1153_v55  ;;  %v1211_v47 = vld [vmem:[#allocation10 + $0xd30] sm:$0xff]  ;;  %v1214_v55 = vld [vmem:[#allocation10 + $0xd48] sm:$0xff] }
 0x232   :  { %2891 = vmatpush1.bf16.msra.mxu1 %v2890_v6  ;;  %v1165_v6 = vld [vmem:[#allocation10 + $0xbc0] sm:$0xff] }
 0x233   :  { %3143 = vmatpush1.bf16.msra.mxu0 %v3142_v0  ;;  %2893 = vmatprep.subr.bf16.mxu1 %v2892_v9  ;;  %v3160_v0 = vpack.c.bf16 %v1172_v63, %v1166_v62  ;;  %v1171_v9 = vld [vmem:[#allocation10 + $0xbf0] sm:$0xff]  ;;  %v1213_v62 = vld [vmem:[#allocation10 + $0xd40] sm:$0xff] }
 0x234   :  { %3145 = vmatprep.subr.bf16.mxu0 %v3144_v14  ;;  %v1184_v14 = vld [vmem:[#allocation10 + $0xc58] sm:$0xff]  ;;  %v3162_v17 = vpack.c.bf16 %v1171_v9, %v1165_v6 }
 0x236   :  { %2895 = vmatpush1.bf16.msra.mxu1 %v2894_v20  ;;  %v3164_v20 = vpack.c.bf16 %v1184_v14, %v1178_v12  ;;  %v1225_v12 = vld [vmem:[#allocation10 + $0xda0] sm:$0xff]  ;;  %v3180_v14 = vpack.c.bf16 %v1232_v5, %v1226_v4 }
 0x237   :  { %3147 = vmatpush1.bf16.msra.mxu0 %v3146_v13  ;;  %2897 = vmatprep.subr.bf16.mxu1 %v2896_v21  ;;  %v1177_v13 = vld [vmem:[#allocation10 + $0xc20] sm:$0xff]  ;;  %v1183_v21 = vld [vmem:[#allocation10 + $0xc50] sm:$0xff] }
 0x238   :  { %3149 = vmatprep.subr.bf16.mxu0 %v3148_v25  ;;  %v1196_v25 = vld [vmem:[#allocation10 + $0xcb8] sm:$0xff]  ;;  %v3166_v27 = vpack.c.bf16 %v1183_v21, %v1177_v13  ;;  %v1273_v4 = vld [vmem:[#allocation10 + $0xf20] sm:$0xff] }
 0x23a   :  { %2899 = vmatpush1.bf16.msra.mxu1 %v2898_v29  ;;  %v2916_v29 = vpack.c.bf16 %v1206_v23, %v1200_v22  ;;  %v1247_v22 = vld [vmem:[#allocation10 + $0xe50] sm:$0xff]  ;;  %v1253_v23 = vld [vmem:[#allocation10 + $0xe80] sm:$0xff] }
 0x23b   :  { %3151 = vmatpush1.bf16.msra.mxu0 %v3150_v39  ;;  %2901 = vmatprep.subr.bf16.mxu1 %v2900_v40  ;;  %v3168_v39 = vpack.c.bf16 %v1196_v25, %v1190_v24  ;;  %v1195_v40 = vld [vmem:[#allocation10 + $0xcb0] sm:$0xff]  ;;  %v1237_v24 = vld [vmem:[#allocation10 + $0xe00] sm:$0xff]  ;;  %v3184_v25 = vpack.c.bf16 %v1244_v19, %v1238_v57 }
 0x23c   :  { %3153 = vmatprep.subr.bf16.mxu0 %v3152_v43  ;;  %v1208_v43 = vld [vmem:[#allocation10 + $0xd18] sm:$0xff]  ;;  %v3170_v45 = vpack.c.bf16 %v1195_v40, %v1189_v35  ;;  %v1285_v57 = vld [vmem:[#allocation10 + $0xf80] sm:$0xff] }
 0x23d   :  { %v1256_v35 = vld [vmem:[#allocation10 + $0xe98] sm:$0xff] }
 0x23e   :  { %2903 = vmatpush1.bf16.msra.mxu1 %v2902_v49  ;;  %v1201_v49 = vld [vmem:[#allocation10 + $0xce0] sm:$0xff] }
 0x23f   :  { %3155 = vmatpush1.bf16.msra.mxu0 %v3154_v50  ;;  %2905 = vmatprep.subr.bf16.mxu1 %v2904_v52  ;;  %v3172_v50 = vpack.c.bf16 %v1208_v43, %v1202_v51  ;;  %v1207_v52 = vld [vmem:[#allocation10 + $0xd10] sm:$0xff]  ;;  %v1249_v51 = vld [vmem:[#allocation10 + $0xe60] sm:$0xff]  ;;  %v3188_v43 = vpack.c.bf16 %v1256_v35, %v1250_v32 }
 0x240   :  { %3157 = vmatprep.subr.bf16.mxu0 %v3156_v58  ;;  %v1220_v58 = vld [vmem:[#allocation10 + $0xd78] sm:$0xff]  ;;  %v3174_v59 = vpack.c.bf16 %v1207_v52, %v1201_v49  ;;  %v2938_v49 = vpack.c.bf16 %v1265_v42, %v1259_v41  ;;  %v1297_v32 = vld [vmem:[#allocation10 + $0xfe0] sm:$0xff]  ;;  %v1310_v41 = vld [vmem:[#allocation10 + $0x1048] sm:$0xff] }
 0x241   :  { %v3176_v63 = vpack.c.bf16 %v1220_v58, %v1214_v55  ;;  %v1261_v55 = vld [vmem:[#allocation10 + $0xec0] sm:$0xff]  ;;  %v1316_v42 = vld [vmem:[#allocation10 + $0x1078] sm:$0xff] }
 0x242   :  { %2907 = vmatpush1.bf16.msra.mxu1 %v2906_v1  ;;  %v1219_v1 = vld [vmem:[#allocation10 + $0xd70] sm:$0xff] }
 0x243   :  { %3159 = vmatpush1.bf16.msra.mxu0 %v3158_v2  ;;  %2909 = vmatprep.subr.bf16.mxu1 %v2908_v3  ;;  %v1236_v2 = vld [vmem:[#allocation10 + $0xdf8] sm:$0xff]  ;;  %v1242_v3 = vld [vmem:[#allocation10 + $0xe28] sm:$0xff] }
 0x244   :  { %3161 = vmatprep.subr.bf16.mxu0 %v3160_v0  ;;  %v3178_v0 = vpack.c.bf16 %v1219_v1, %v1213_v62  ;;  %v2928_v9 = vpack.c.bf16 %v1242_v3, %v1236_v2  ;;  %v2942_v62 = vpack.c.bf16 %v1277_v54, %v1271_v53  ;;  %v1283_v2 = vld [vmem:[#allocation10 + $0xf70] sm:$0xff]  ;;  %v1289_v3 = vld [vmem:[#allocation10 + $0xfa0] sm:$0xff]  ;;  %v1322_v53 = vld [vmem:[#allocation10 + $0x10a8] sm:$0xff] }
 0x245   :  { %2009 = vmatmul.mubr.f32.vlgmr.msra.gmra.mrb[6].mxu1 %v3771_v56  ;;  %v1328_v54 = vld [vmem:[#allocation10 + $0x10d8] sm:$0xff] }
 0x246   :  { %2911 = vmatpush1.bf16.msra.mxu1 %v2910_v16  ;;  %2079 = vmatprep.mubr.f32.mxu1 %v3756_v8  ;;  %v1231_v16 = vld [vmem:[#allocation10 + $0xdd0] sm:$0xff] }
 0x247   :  { %3163 = vmatpush1.bf16.msra.mxu0 %v3162_v17  ;;  %2913 = vmatprep.subr.bf16.mxu1 %v2912_v18  ;;  %v1248_v17 = vld [vmem:[#allocation10 + $0xe58] sm:$0xff]  ;;  %v1254_v18 = vld [vmem:[#allocation10 + $0xe88] sm:$0xff]  ;;  %v3182_v13 = vpack.c.bf16 %v1231_v16, %v1225_v12  ;;  %v2946_v12 = vpack.c.bf16 %v1289_v3, %v1283_v2 }
 0x248   :  { %3165 = vmatprep.subr.bf16.mxu0 %v3164_v20  ;;  %v2930_v20 = vpack.c.bf16 %v1241_v11, %v1235_v10  ;;  %v2932_v21 = vpack.c.bf16 %v1254_v18, %v1248_v17  ;;  %v1286_v10 = vld [vmem:[#allocation10 + $0xf88] sm:$0xff]  ;;  %v1292_v11 = vld [vmem:[#allocation10 + $0xfb8] sm:$0xff]  ;;  %v1295_v17 = vld [vmem:[#allocation10 + $0xfd0] sm:$0xff] }
 0x249   :  { %v1301_v18 = vld [vmem:[#allocation10 + $0x1000] sm:$0xff]  ;;  %v3200_v19 = vpack.c.bf16 %v1292_v11, %v1286_v10  ;;  %v1334_v2 = vld [vmem:[#allocation10 + $0x1108] sm:$0xff]  ;;  %v1340_v3 = vld [vmem:[#allocation10 + $0x1138] sm:$0xff] }
 0x24a   :  { %2293 = vmatmul.mubr.f32.vlgmr.msra.gmra.mrb[6].mxu0 %v3771_v56  ;;  %2915 = vmatpush1.bf16.msra.mxu1 %v2914_v26  ;;  %v2922_v56 = vpack.c.bf16 %v1217_v48, %v1211_v47  ;;  %v1243_v26 = vld [vmem:[#allocation10 + $0xe30] sm:$0xff]  ;;  %v1262_v47 = vld [vmem:[#allocation10 + $0xec8] sm:$0xff]  ;;  %v1268_v48 = vld [vmem:[#allocation10 + $0xef8] sm:$0xff]  ;;  %v3216_v11 = vpack.c.bf16 %v1340_v3, %v1334_v2 }
 0x24b   :  { %3167 = vmatpush1.bf16.msra.mxu0 %v3166_v27  ;;  %2363 = vmatprep.mubr.f32.mxu0 %v3756_v8  ;;  %v1223_v8 = vld [vmem:[#allocation10 + $0xd90] sm:$0xff]  ;;  %v1260_v27 = vld [vmem:[#allocation10 + $0xeb8] sm:$0xff]  ;;  %v3192_v58 = vpack.c.bf16 %v1268_v48, %v1262_v47  ;;  %v1309_v47 = vld [vmem:[#allocation10 + $0x1040] sm:$0xff]  ;;  %v3208_v48 = vpack.c.bf16 %v1316_v42, %v1310_v41 }
 0x24c   :  { %2917 = vmatprep.subr.bf16.mxu1 %v2916_v29  ;;  %3169 = vmatprep.subr.bf16.mxu0 %v3168_v39  ;;  %v2926_v6 = vpack.c.bf16 %v1229_v61, %v1223_v8  ;;  %v2934_v29 = vpack.c.bf16 %v1253_v23, %v1247_v22  ;;  %v3186_v39 = vpack.c.bf16 %v1243_v26, %v1237_v24  ;;  %v1274_v8 = vld [vmem:[#allocation10 + $0xf28] sm:$0xff]  ;;  %v1280_v61 = vld [vmem:[#allocation10 + $0xf58] sm:$0xff]  ;;  %v1333_v10 = vld [vmem:[#allocation10 + $0x1100] sm:$0xff] }
 0x24d   :  { %v2936_v40 = vpack.c.bf16 %v1266_v28, %v1260_v27  ;;  %v3196_v5 = vpack.c.bf16 %v1280_v61, %v1274_v8  ;;  %v1298_v22 = vld [vmem:[#allocation10 + $0xfe8] sm:$0xff]  ;;  %v1304_v23 = vld [vmem:[#allocation10 + $0x1018] sm:$0xff]  ;;  %v2950_v24 = vpack.c.bf16 %v1301_v18, %v1295_v17  ;;  %v1307_v27 = vld [vmem:[#allocation10 + $0x1030] sm:$0xff]  ;;  %v3212_v61 = vpack.c.bf16 %v1328_v54, %v1322_v53 }
 0x24e   :  { %2919 = vmatpush1.bf16.msra.mxu1 %v2918_v44  ;;  %v1255_v44 = vld [vmem:[#allocation10 + $0xe90] sm:$0xff]  ;;  %v1313_v28 = vld [vmem:[#allocation10 + $0x1060] sm:$0xff]  ;;  %v3204_v35 = vpack.c.bf16 %v1304_v23, %v1298_v22  ;;  %v1346_v17 = vld [vmem:[#allocation10 + $0x1168] sm:$0xff] }
 0x24f   :  { %3171 = vmatpush1.bf16.msra.mxu0 %v3170_v45  ;;  %2921 = vmatprep.subr.bf16.mxu1 %v2920_v46  ;;  %v1272_v45 = vld [vmem:[#allocation10 + $0xf18] sm:$0xff]  ;;  %v1278_v46 = vld [vmem:[#allocation10 + $0xf48] sm:$0xff]  ;;  %v1321_v8 = vld [vmem:[#allocation10 + $0x10a0] sm:$0xff] }
 0x250   :  { %3173 = vmatprep.subr.bf16.mxu0 %v3172_v50  ;;  %v3190_v50 = vpack.c.bf16 %v1255_v44, %v1249_v51  ;;  %v2940_v52 = vpack.c.bf16 %v1278_v46, %v1272_v45  ;;  %v2954_v51 = vpack.c.bf16 %v1313_v28, %v1307_v27  ;;  %v1319_v45 = vld [vmem:[#allocation10 + $0x1090] sm:$0xff]  ;;  %v1325_v46 = vld [vmem:[#allocation10 + $0x10c0] sm:$0xff]  ;;  %v1352_v18 = vld [vmem:[#allocation10 + $0x1198] sm:$0xff] }
 0x251   :  { %v1345_v22 = vld [vmem:[#allocation10 + $0x1160] sm:$0xff]  ;;  %v3220_v23 = vpack.c.bf16 %v1352_v18, %v1346_v17  ;;  %v1358_v27 = vld [vmem:[#allocation10 + $0x11c8] sm:$0xff]  ;;  %v1364_v28 = vld [vmem:[#allocation10 + $0x11f8] sm:$0xff] }
 0x252   :  { %2923 = vmatpush1.bf16.msra.mxu1 %v2922_v56  ;;  %v1267_v56 = vld [vmem:[#allocation10 + $0xef0] sm:$0xff]  ;;  %v1357_v41 = vld [vmem:[#allocation10 + $0x11c0] sm:$0xff]  ;;  %v3224_v42 = vpack.c.bf16 %v1364_v28, %v1358_v27  ;;  %v1428_v28 = vld [vmem:[#allocation10 + $0x13f8] sm:$0xff] }
 0x253   :  { %3175 = vmatpush1.bf16.msra.mxu0 %v3174_v59  ;;  %2925 = vmatprep.subr.bf16.mxu1 %v2924_v60  ;;  %v1284_v59 = vld [vmem:[#allocation10 + $0xf78] sm:$0xff]  ;;  %v1290_v60 = vld [vmem:[#allocation10 + $0xfa8] sm:$0xff]  ;;  %v1369_v54 = vld [vmem:[#allocation10 + $0x1220] sm:$0xff] }
 0x254   :  { %3177 = vmatprep.subr.bf16.mxu0 %v3176_v63  ;;  %v3194_v63 = vpack.c.bf16 %v1267_v56, %v1261_v55  ;;  %v2944_v1 = vpack.c.bf16 %v1290_v60, %v1284_v59  ;;  %v2958_v55 = vpack.c.bf16 %v1325_v46, %v1319_v45  ;;  %v1331_v59 = vld [vmem:[#allocation10 + $0x10f0] sm:$0xff]  ;;  %v1337_v60 = vld [vmem:[#allocation10 + $0x1120] sm:$0xff]  ;;  %v1370_v45 = vld [vmem:[#allocation10 + $0x1228] sm:$0xff] }
 0x255   :  { %v1376_v46 = vld [vmem:[#allocation10 + $0x1258] sm:$0xff]  ;;  %v1393_v17 = vld [vmem:[#allocation10 + $0x12e0] sm:$0xff]  ;;  %v1411_v27 = vld [vmem:[#allocation10 + $0x1370] sm:$0xff] }
 0x256   :  { %2927 = vmatpush1.bf16.msra.mxu1 %v2926_v6  ;;  %v1279_v6 = vld [vmem:[#allocation10 + $0xf50] sm:$0xff]  ;;  %v3228_v53 = vpack.c.bf16 %v1376_v46, %v1370_v45 }
 0x257   :  { %3179 = vmatpush1.bf16.msra.mxu0 %v3178_v0  ;;  %2929 = vmatprep.subr.bf16.mxu1 %v2928_v9  ;;  %v1296_v0 = vld [vmem:[#allocation10 + $0xfd8] sm:$0xff]  ;;  %v1302_v9 = vld [vmem:[#allocation10 + $0x1008] sm:$0xff]  ;;  %v1423_v46 = vld [vmem:[#allocation10 + $0x13d0] sm:$0xff] }
 0x258   :  { %3181 = vmatprep.subr.bf16.mxu0 %v3180_v14  ;;  %v3198_v14 = vpack.c.bf16 %v1279_v6, %v1273_v4  ;;  %v2948_v16 = vpack.c.bf16 %v1302_v9, %v1296_v0  ;;  %v2962_v4 = vpack.c.bf16 %v1337_v60, %v1331_v59  ;;  %v1343_v0 = vld [vmem:[#allocation10 + $0x1150] sm:$0xff]  ;;  %v1349_v9 = vld [vmem:[#allocation10 + $0x1180] sm:$0xff]  ;;  %v1382_v59 = vld [vmem:[#allocation10 + $0x1288] sm:$0xff] }
 0x259   :  { %v1388_v60 = vld [vmem:[#allocation10 + $0x12b8] sm:$0xff] }
 0x25a   :  { %2931 = vmatpush1.bf16.msra.mxu1 %v2930_v20  ;;  %v1291_v20 = vld [vmem:[#allocation10 + $0xfb0] sm:$0xff]  ;;  %v3232_v3 = vpack.c.bf16 %v1388_v60, %v1382_v59  ;;  %v1429_v59 = vld [vmem:[#allocation10 + $0x1400] sm:$0xff] }
 0x25b   :  { %3183 = vmatpush1.bf16.msra.mxu0 %v3182_v13  ;;  %2933 = vmatprep.subr.bf16.mxu1 %v2932_v21  ;;  %v1308_v13 = vld [vmem:[#allocation10 + $0x1038] sm:$0xff]  ;;  %v1314_v21 = vld [vmem:[#allocation10 + $0x1068] sm:$0xff] }
 0x25c   :  { %3185 = vmatprep.subr.bf16.mxu0 %v3184_v25  ;;  %v3202_v25 = vpack.c.bf16 %v1291_v20, %v1285_v57  ;;  %v2952_v26 = vpack.c.bf16 %v1314_v21, %v1308_v13  ;;  %v2966_v57 = vpack.c.bf16 %v1349_v9, %v1343_v0  ;;  %v1355_v13 = vld [vmem:[#allocation10 + $0x11b0] sm:$0xff]  ;;  %v1361_v21 = vld [vmem:[#allocation10 + $0x11e0] sm:$0xff]  ;;  %v1394_v0 = vld [vmem:[#allocation10 + $0x12e8] sm:$0xff] }
 0x25d   :  { %v1400_v9 = vld [vmem:[#allocation10 + $0x1318] sm:$0xff] }
 0x25e   :  { %2935 = vmatpush1.bf16.msra.mxu1 %v2934_v29  ;;  %v1303_v29 = vld [vmem:[#allocation10 + $0x1010] sm:$0xff]  ;;  %v3236_v18 = vpack.c.bf16 %v1400_v9, %v1394_v0 }
 0x25f   :  { %3187 = vmatpush1.bf16.msra.mxu0 %v3186_v39  ;;  %2937 = vmatprep.subr.bf16.mxu1 %v2936_v40  ;;  %v1320_v39 = vld [vmem:[#allocation10 + $0x1098] sm:$0xff]  ;;  %v1326_v40 = vld [vmem:[#allocation10 + $0x10c8] sm:$0xff] }
 0x260   :  { %3189 = vmatprep.subr.bf16.mxu0 %v3188_v43  ;;  %v3206_v43 = vpack.c.bf16 %v1303_v29, %v1297_v32  ;;  %v2956_v44 = vpack.c.bf16 %v1326_v40, %v1320_v39  ;;  %v2970_v32 = vpack.c.bf16 %v1361_v21, %v1355_v13  ;;  %v1367_v39 = vld [vmem:[#allocation10 + $0x1210] sm:$0xff]  ;;  %v1373_v40 = vld [vmem:[#allocation10 + $0x1240] sm:$0xff]  ;;  %v1406_v13 = vld [vmem:[#allocation10 + $0x1348] sm:$0xff] }
 0x261   :  { %v1412_v21 = vld [vmem:[#allocation10 + $0x1378] sm:$0xff] }
 0x262   :  { %2939 = vmatpush1.bf16.msra.mxu1 %v2938_v49  ;;  %v1315_v49 = vld [vmem:[#allocation10 + $0x1070] sm:$0xff] }
 0x263   :  { %3191 = vmatpush1.bf16.msra.mxu0 %v3190_v50  ;;  %2941 = vmatprep.subr.bf16.mxu1 %v2940_v52  ;;  %v1332_v50 = vld [vmem:[#allocation10 + $0x10f8] sm:$0xff]  ;;  %v1338_v52 = vld [vmem:[#allocation10 + $0x1128] sm:$0xff] }
 0x264   :  { %3193 = vmatprep.subr.bf16.mxu0 %v3192_v58  ;;  %v3210_v58 = vpack.c.bf16 %v1315_v49, %v1309_v47  ;;  %v2960_v56 = vpack.c.bf16 %v1338_v52, %v1332_v50  ;;  %v2974_v47 = vpack.c.bf16 %v1373_v40, %v1367_v39  ;;  %v1379_v50 = vld [vmem:[#allocation10 + $0x1270] sm:$0xff]  ;;  %v1385_v52 = vld [vmem:[#allocation10 + $0x12a0] sm:$0xff] }
 0x265   :  { %v3792_v40 = vld [vmem:[#allocation12] sm:$0x3f] }
 0x266   :  { %2943 = vmatpush1.bf16.msra.mxu1 %v2942_v62  ;;  %v1327_v62 = vld [vmem:[#allocation10 + $0x10d0] sm:$0xff] }
 0x267   :  { %3195 = vmatpush1.bf16.msra.mxu0 %v3194_v63  ;;  %2945 = vmatprep.subr.bf16.mxu1 %v2944_v1  ;;  %v1344_v63 = vld [vmem:[#allocation10 + $0x1158] sm:$0xff]  ;;  %v1350_v1 = vld [vmem:[#allocation10 + $0x1188] sm:$0xff] }
 0x268   :  { %3197 = vmatprep.subr.bf16.mxu0 %v3196_v5  ;;  %v3214_v5 = vpack.c.bf16 %v1327_v62, %v1321_v8  ;;  %v2964_v6 = vpack.c.bf16 %v1350_v1, %v1344_v63  ;;  %v2978_v8 = vpack.c.bf16 %v1385_v52, %v1379_v50  ;;  %v1391_v62 = vld [vmem:[#allocation10 + $0x12d0] sm:$0xff]  ;;  %v1397_v63 = vld [vmem:[#allocation10 + $0x1300] sm:$0xff]  ;;  %v1436_v50 = vld [vmem:[#allocation10 + $0x1438] sm:$0xff] }
 0x269   :  { %v1381_v1 = vld [vmem:[#allocation10 + $0x1280] sm:$0xff] }
 0x26a   :  { %2947 = vmatpush1.bf16.msra.mxu1 %v2946_v12  ;;  %v1339_v12 = vld [vmem:[#allocation10 + $0x1130] sm:$0xff] }
 0x26b   :  { %3199 = vmatpush1.bf16.msra.mxu0 %v3198_v14  ;;  %2949 = vmatprep.subr.bf16.mxu1 %v2948_v16  ;;  %v1356_v14 = vld [vmem:[#allocation10 + $0x11b8] sm:$0xff]  ;;  %v1362_v16 = vld [vmem:[#allocation10 + $0x11e8] sm:$0xff] }
 0x26c   :  { %3201 = vmatprep.subr.bf16.mxu0 %v3200_v19  ;;  %v3218_v19 = vpack.c.bf16 %v1339_v12, %v1333_v10  ;;  %v2968_v20 = vpack.c.bf16 %v1362_v16, %v1356_v14  ;;  %v2982_v10 = vpack.c.bf16 %v1397_v63, %v1391_v62  ;;  %v1403_v14 = vld [vmem:[#allocation10 + $0x1330] sm:$0xff]  ;;  %v1409_v16 = vld [vmem:[#allocation10 + $0x1360] sm:$0xff]  ;;  %v1452_v63 = vld [vmem:[#allocation10 + $0x14b8] sm:$0xff] }
 0x26d   :  { %v1435_v62 = vld [vmem:[#allocation10 + $0x1430] sm:$0xff] }
 0x26e   :  { %2951 = vmatpush1.bf16.msra.mxu1 %v2950_v24  ;;  %v1351_v24 = vld [vmem:[#allocation10 + $0x1190] sm:$0xff]  ;;  %v3250_v9 = vpack.c.bf16 %v1435_v62, %v1429_v59  ;;  %v1478_v59 = vld [vmem:[#allocation10 + $0x1588] sm:$0xff] }
 0x26f   :  { %3203 = vmatpush1.bf16.msra.mxu0 %v3202_v25  ;;  %2953 = vmatprep.subr.bf16.mxu1 %v2952_v26  ;;  %v1368_v25 = vld [vmem:[#allocation10 + $0x1218] sm:$0xff]  ;;  %v1374_v26 = vld [vmem:[#allocation10 + $0x1248] sm:$0xff] }
 0x270   :  { %3205 = vmatprep.subr.bf16.mxu0 %v3204_v35  ;;  %v3222_v35 = vpack.c.bf16 %v1351_v24, %v1345_v22  ;;  %v2972_v29 = vpack.c.bf16 %v1374_v26, %v1368_v25  ;;  %v1421_v24 = vld [vmem:[#allocation10 + $0x13c0] sm:$0xff]  ;;  %v3240_v26 = vpack.c.bf16 %v1412_v21, %v1406_v13 }
 0x271   :  { %v1405_v25 = vld [vmem:[#allocation10 + $0x1340] sm:$0xff] }
 0x272   :  { %2955 = vmatpush1.bf16.msra.mxu1 %v2954_v51  ;;  %v1363_v51 = vld [vmem:[#allocation10 + $0x11f0] sm:$0xff] }
 0x273   :  { %3207 = vmatpush1.bf16.msra.mxu0 %v3206_v43  ;;  %2957 = vmatprep.subr.bf16.mxu1 %v2956_v44  ;;  %v1380_v43 = vld [vmem:[#allocation10 + $0x1278] sm:$0xff]  ;;  %v1386_v44 = vld [vmem:[#allocation10 + $0x12a8] sm:$0xff] }
 0x274   :  { %3209 = vmatprep.subr.bf16.mxu0 %v3208_v48  ;;  %v3226_v48 = vpack.c.bf16 %v1363_v51, %v1357_v41  ;;  %v2976_v49 = vpack.c.bf16 %v1386_v44, %v1380_v43  ;;  %v3242_v41 = vpack.c.bf16 %v1411_v27, %v1405_v25  ;;  %v1427_v51 = vld [vmem:[#allocation10 + $0x13f0] sm:$0xff]  ;;  %v1433_v43 = vld [vmem:[#allocation10 + $0x1420] sm:$0xff] }
 0x275   :  { %v1417_v44 = vld [vmem:[#allocation10 + $0x13a0] sm:$0xff]  ;;  %v2994_v52 = vpack.c.bf16 %v1433_v43, %v1427_v51  ;;  %v1482_v51 = vld [vmem:[#allocation10 + $0x15a8] sm:$0xff] }
 0x276   :  { %2959 = vmatpush1.bf16.msra.mxu1 %v2958_v55  ;;  %v1375_v55 = vld [vmem:[#allocation10 + $0x1250] sm:$0xff] }
 0x277   :  { %3211 = vmatpush1.bf16.msra.mxu0 %v3210_v58  ;;  %2961 = vmatprep.subr.bf16.mxu1 %v2960_v56  ;;  %v1392_v58 = vld [vmem:[#allocation10 + $0x12d8] sm:$0xff]  ;;  %v1398_v56 = vld [vmem:[#allocation10 + $0x1308] sm:$0xff] }
 0x278   :  { %3213 = vmatprep.subr.bf16.mxu0 %v3212_v61  ;;  %v3230_v61 = vpack.c.bf16 %v1375_v55, %v1369_v54  ;;  %v2980_v2 = vpack.c.bf16 %v1398_v56, %v1392_v58  ;;  %v3246_v54 = vpack.c.bf16 %v1423_v46, %v1417_v44  ;;  %v1439_v58 = vld [vmem:[#allocation10 + $0x1450] sm:$0xff]  ;;  %v1445_v56 = vld [vmem:[#allocation10 + $0x1480] sm:$0xff]  ;;  %v1466_v44 = vld [vmem:[#allocation10 + $0x1528] sm:$0xff] }
 0x27a   :  { %2963 = vmatpush1.bf16.msra.mxu1 %v2962_v4  ;;  %v1387_v4 = vld [vmem:[#allocation10 + $0x12b0] sm:$0xff] }
 0x27b   :  { %3215 = vmatpush1.bf16.msra.mxu0 %v3214_v5  ;;  %2965 = vmatprep.subr.bf16.mxu1 %v2964_v6  ;;  %v1404_v5 = vld [vmem:[#allocation10 + $0x1338] sm:$0xff]  ;;  %v1410_v6 = vld [vmem:[#allocation10 + $0x1368] sm:$0xff] }
 0x27c   :  { %3217 = vmatprep.subr.bf16.mxu0 %v3216_v11  ;;  %v3234_v11 = vpack.c.bf16 %v1387_v4, %v1381_v1  ;;  %v2984_v12 = vpack.c.bf16 %v1410_v6, %v1404_v5  ;;  %v1458_v1 = vld [vmem:[#allocation10 + $0x14e8] sm:$0xff]  ;;  %v1448_v4 = vld [vmem:[#allocation10 + $0x1498] sm:$0xff]  ;;  %v2998_v6 = vpack.c.bf16 %v1445_v56, %v1439_v58 }
 0x27d   :  { %v3798_v5 = vld [vmem:[#allocation13] sm:$0x3f] }
 0x27e   :  { %2967 = vmatpush1.bf16.msra.mxu1 %v2966_v57  ;;  %v1399_v57 = vld [vmem:[#allocation10 + $0x1310] sm:$0xff]  ;;  %v2452_v21 = vrot.slane %v3798_v5, %v3730_v30  ;;  %v1494_v58 = vld [vmem:[#allocation10 + $0x1608] sm:$0xff] }
 0x27f   :  { %3219 = vmatpush1.bf16.msra.mxu0 %v3218_v19  ;;  %2969 = vmatprep.subr.bf16.mxu1 %v2968_v20  ;;  %v1416_v19 = vld [vmem:[#allocation10 + $0x1398] sm:$0xff]  ;;  %v1422_v20 = vld [vmem:[#allocation10 + $0x13c8] sm:$0xff]  ;;  %v3238_v22 = vpack.c.bf16 %v1399_v57, %v1393_v17  ;;  %v1447_v57 = vld [vmem:[#allocation10 + $0x1490] sm:$0xff] }
 0x280   :  { %3221 = vmatprep.subr.bf16.mxu0 %v3220_v23  ;;  %v2988_v23 = vpack.c.bf16 %v1422_v20, %v1416_v19  ;;  %v1464_v19 = vld [vmem:[#allocation10 + $0x1518] sm:$0xff]  ;;  %v1470_v20 = vld [vmem:[#allocation10 + $0x1548] sm:$0xff] }
 0x282   :  { %2971 = vmatpush1.bf16.msra.mxu1 %v2970_v32  ;;  %v1434_v32 = vld [vmem:[#allocation10 + $0x1428] sm:$0xff] }
 0x283   :  { %3223 = vmatpush1.bf16.msra.mxu0 %v3222_v35  ;;  %2973 = vmatprep.subr.bf16.mxu1 %v2972_v29  ;;  %v1418_v35 = vld [vmem:[#allocation10 + $0x13a8] sm:$0xff]  ;;  %v1424_v29 = vld [vmem:[#allocation10 + $0x13d8] sm:$0xff] }
 0x284   :  { %3225 = vmatprep.subr.bf16.mxu0 %v3224_v42  ;;  %v2992_v42 = vpack.c.bf16 %v1434_v32, %v1428_v28  ;;  %v3244_v45 = vpack.c.bf16 %v1424_v29, %v1418_v35  ;;  %v3004_v28 = vpack.c.bf16 %v1470_v20, %v1464_v19  ;;  %v1463_v32 = vld [vmem:[#allocation10 + $0x1510] sm:$0xff]  ;;  %v1469_v35 = vld [vmem:[#allocation10 + $0x1540] sm:$0xff]  ;;  %v1512_v20 = vld [vmem:[#allocation10 + $0x1698] sm:$0xff] }
 0x285   :  { %2080 = vmatmul.mubr.f32.vlgmr.msra.gmra.mrb[6].mxu1 %v3760_v15  ;;  %v1453_v29 = vld [vmem:[#allocation10 + $0x14c0] sm:$0xff]  ;;  %v3006_v46 = vpack.c.bf16 %v1469_v35, %v1463_v32  ;;  %v1495_v19 = vld [vmem:[#allocation10 + $0x1610] sm:$0xff]  ;;  %v1524_v32 = vld [vmem:[#allocation10 + $0x16f8] sm:$0xff] }
 0x286   :  { %2975 = vmatpush1.bf16.msra.mxu1 %v2974_v47  ;;  %2150 = vmatprep.mubr.f32.mxu1 %v3767_v38  ;;  %v1440_v47 = vld [vmem:[#allocation10 + $0x1458] sm:$0xff]  ;;  %v1530_v35 = vld [vmem:[#allocation10 + $0x1728] sm:$0xff] }
 0x287   :  { %3227 = vmatpush1.bf16.msra.mxu0 %v3226_v48  ;;  %2977 = vmatprep.subr.bf16.mxu1 %v2976_v49  ;;  %v1446_v48 = vld [vmem:[#allocation10 + $0x1488] sm:$0xff] }
 0x288   :  { %3229 = vmatprep.subr.bf16.mxu0 %v3228_v53  ;;  %v1430_v49 = vld [vmem:[#allocation10 + $0x1408] sm:$0xff]  ;;  %v1562_v53 = vrot.slane %v3792_v40, %v3730_v30  ;;  %v2996_v55 = vpack.c.bf16 %v1446_v48, %v1440_v47 }
 0x28a   :  { %2364 = vmatmul.mubr.f32.vlgmr.msra.gmra.mrb[6].mxu0 %v3760_v15  ;;  %2979 = vmatpush1.bf16.msra.mxu1 %v2978_v8  ;;  %v2986_v15 = vpack.c.bf16 %v1409_v16, %v1403_v14  ;;  %v1566_v8 = vrot.slane %v3792_v40, %v3732_v31  ;;  %v1441_v14 = vld [vmem:[#allocation10 + $0x1460] sm:$0xff] }
 0x28b   :  { %3231 = vmatpush1.bf16.msra.mxu0 %v3230_v61  ;;  %2434 = vmatprep.mubr.f32.mxu0 %v3767_v38  ;;  %v1415_v38 = vld [vmem:[#allocation10 + $0x1390] sm:$0xff]  ;;  %v3248_v61 = vpack.c.bf16 %v1436_v50, %v1430_v49  ;;  %v3254_v27 = vpack.c.bf16 %v1447_v57, %v1441_v14  ;;  %v1481_v50 = vld [vmem:[#allocation10 + $0x15a0] sm:$0xff] }
 0x28c   :  { %2981 = vmatprep.subr.bf16.mxu1 %v2980_v2  ;;  %3233 = vmatprep.subr.bf16.mxu0 %v3232_v3  ;;  %v2990_v39 = vpack.c.bf16 %v1421_v24, %v1415_v38  ;;  %v1442_v3 = vld [vmem:[#allocation10 + $0x1468] sm:$0xff]  ;;  %v2456_v24 = vrot.slane %v3798_v5, %v3732_v31  ;;  %v1475_v49 = vld [vmem:[#allocation10 + $0x1570] sm:$0xff] }
 0x28e   :  { %2983 = vmatpush1.bf16.msra.mxu1 %v2982_v10  ;;  %v3000_v10 = vpack.c.bf16 %v1458_v1, %v1452_v63  ;;  %v1487_v63 = vld [vmem:[#allocation10 + $0x15d0] sm:$0xff]  ;;  %v1493_v1 = vld [vmem:[#allocation10 + $0x1600] sm:$0xff] }
 0x28f   :  { %3235 = vmatpush1.bf16.msra.mxu0 %v3234_v11  ;;  %2985 = vmatprep.subr.bf16.mxu1 %v2984_v12  ;;  %v1451_v11 = vld [vmem:[#allocation10 + $0x14b0] sm:$0xff]  ;;  %v1457_v12 = vld [vmem:[#allocation10 + $0x14e0] sm:$0xff] }
 0x290   :  { %3237 = vmatprep.subr.bf16.mxu0 %v3236_v18  ;;  %v3252_v18 = vpack.c.bf16 %v1448_v4, %v1442_v3  ;;  %v3002_v25 = vpack.c.bf16 %v1457_v12, %v1451_v11  ;;  %v1483_v4 = vld [vmem:[#allocation10 + $0x15b0] sm:$0xff]  ;;  %v3014_v11 = vpack.c.bf16 %v1493_v1, %v1487_v63  ;;  %v1544_v63 = vld [vmem:[#allocation10 + $0x1798] sm:$0xff] }
 0x292   :  { %2987 = vmatpush1.bf16.msra.mxu1 %v2986_v15 }
 0x293   :  { %3239 = vmatpush1.bf16.msra.mxu0 %v3238_v22  ;;  %2989 = vmatprep.subr.bf16.mxu1 %v2988_v23  ;;  %v1454_v22 = vld [vmem:[#allocation10 + $0x14c8] sm:$0xff]  ;;  %v1460_v23 = vld [vmem:[#allocation10 + $0x14f8] sm:$0xff] }
 0x294   :  { %3241 = vmatprep.subr.bf16.mxu0 %v3240_v26  ;;  %v3256_v30 = vpack.c.bf16 %v1460_v23, %v1454_v22 }
 0x296   :  { %2991 = vmatpush1.bf16.msra.mxu1 %v2990_v39 }
 0x297   :  { %3243 = vmatpush1.bf16.msra.mxu0 %v3242_v41  ;;  %2993 = vmatprep.subr.bf16.mxu1 %v2992_v42  ;;  %v1459_v41 = vld [vmem:[#allocation10 + $0x14f0] sm:$0xff]  ;;  %v1476_v42 = vld [vmem:[#allocation10 + $0x1578] sm:$0xff] }
 0x298   :  { %v1726_v60 = vpop.f32.mrb[4].mxu1  ;;  %3245 = vmatprep.subr.bf16.mxu0 %v3244_v45  ;;  %v1472_v45 = vld [vmem:[#allocation10 + $0x1558] sm:$0xff]  ;;  %v3258_v47 = vpack.c.bf16 %v1459_v41, %v1453_v29  ;;  %v3008_v48 = vpack.c.bf16 %v1482_v51, %v1476_v42  ;;  %v1514_v29 = vld [vmem:[#allocation10 + $0x16a8] sm:$0xff]  ;;  %v3024_v42 = vpack.c.bf16 %v1530_v35, %v1524_v32  ;;  %v1523_v51 = vld [vmem:[#allocation10 + $0x16f0] sm:$0xff]  ;;  %v2464_v32 = vrot.slane %v3798_v5, %v3742_v37 }
 0x299   :  { %v1728_v2 = vpop.f32.mrb[5].mxu1  ;;  %v3292_v0 = vadd.f32 %v1726_v60, %v1562_v53  ;;  %v3260_v53 = vpack.c.bf16 %v1472_v45, %v1466_v44  ;;  %v1484_v60 = vld [vmem:[#allocation10 + $0x15b8] sm:$0xff]  ;;  %v1513_v44 = vld [vmem:[#allocation10 + $0x16a0] sm:$0xff] }
 0x29a   :  { %2995 = vmatpush1.bf16.msra.mxu1 %v2994_v52  ;;  %v3294_v16 = vadd.f32 %v1728_v2, %v1566_v8  ;;  %v1465_v52 = vld [vmem:[#allocation10 + $0x1520] sm:$0xff]  ;;  %v3010_v8 = vpack.c.bf16 %v1481_v50, %v1475_v49  ;;  %v3264_v3 = vpack.c.bf16 %v1484_v60, %v1478_v59  ;;  %v1532_v49 = vld [vmem:[#allocation10 + $0x1738] sm:$0xff]  ;;  %v1531_v60 = vld [vmem:[#allocation10 + $0x1730] sm:$0xff] }
 0x29b   :  { %3247 = vmatpush1.bf16.msra.mxu0 %v3246_v54  ;;  %2997 = vmatprep.subr.bf16.mxu1 %v2996_v55  ;;  %v1471_v54 = vld [vmem:[#allocation10 + $0x1550] sm:$0xff]  ;;  %v1488_v55 = vld [vmem:[#allocation10 + $0x15d8] sm:$0xff]  ;;  %v1477_v2 = vld [vmem:[#allocation10 + $0x1580] sm:$0xff] }
 0x29c   :  { %v1868_v17 = vpop.f32.mrb[4].mxu0  ;;  %3249 = vmatprep.subr.bf16.mxu0 %v3248_v61  ;;  %v3262_v61 = vpack.c.bf16 %v1471_v54, %v1465_v52  ;;  %v3012_v62 = vpack.c.bf16 %v1494_v58, %v1488_v55  ;;  %v3266_v12 = vpack.c.bf16 %v1483_v4, %v1477_v2  ;;  %v1535_v54 = vld [vmem:[#allocation10 + $0x1750] sm:$0xff]  ;;  %v1541_v55 = vld [vmem:[#allocation10 + $0x1780] sm:$0xff] }
 0x29d   :  { %v3293_v13 = vadd.f32 %v3292_v0, %v1868_v17  ;;  %v1870_v15 = vpop.f32.mrb[5].mxu0  ;;  %v1506_v0 = vld [vmem:[#allocation10 + $0x1668] sm:$0xff]  ;;  %v1505_v17 = vld [vmem:[#allocation10 + $0x1660] sm:$0xff]  ;;  %v3030_v1 = vpack.c.bf16 %v1541_v55, %v1535_v54  ;;  %v1547_v4 = vld [vmem:[#allocation10 + $0x17b0] sm:$0xff] }
 0x29e   :  { %v3295_v38 = vadd.f32 %v3294_v16, %v1870_v15  ;;  %2999 = vmatpush1.bf16.msra.mxu1 %v2998_v6  ;;  %v1500_v6 = vld [vmem:[#allocation10 + $0x1638] sm:$0xff]  ;;  %v1499_v16 = vld [vmem:[#allocation10 + $0x1630] sm:$0xff]  ;;  %v1525_v58 = vld [vmem:[#allocation10 + $0x1700] sm:$0xff] }
 0x29f   :  { %v2441_v26 = vmax.f32 %v3293_v13, 0.0  ;;  %3251 = vmatpush1.bf16.msra.mxu0 %v3250_v9  ;;  %3001 = vmatprep.subr.bf16.mxu1 %v3000_v10  ;;  %v1490_v9 = vld [vmem:[#allocation10 + $0x15e8] sm:$0xff]  ;;  %v1496_v10 = vld [vmem:[#allocation10 + $0x1618] sm:$0xff]  ;;  %v3016_v14 = vpack.c.bf16 %v1506_v0, %v1500_v6  ;;  %v3018_v22 = vpack.c.bf16 %v1505_v17, %v1499_v16  ;;  %v3282_v2 = vpack.c.bf16 %v1531_v60, %v1525_v58  ;;  %v1553_v6 = vld [vmem:[#allocation10 + $0x17e0] sm:$0xff] }
 0x2a0   :  { %v2442_v39 = vmax.f32 %v3295_v38, 0.0  ;;  %3253 = vmatprep.subr.bf16.mxu0 %v3252_v18  ;;  %v1489_v18 = vld [vmem:[#allocation10 + $0x15e0] sm:$0xff]  ;;  %v3268_v57 = vpack.c.bf16 %v1496_v10, %v1490_v9  ;;  %v1518_v13 = vld [vmem:[#allocation10 + $0x16c8] sm:$0xff]  ;;  %v1508_v15 = vld [vmem:[#allocation10 + $0x1678] sm:$0xff] }
 0x2a1   :  { %v2479_v43 = vmul.f32 %v2452_v21, %v2441_v26  ;;  %v1502_v21 = vld [vmem:[#allocation10 + $0x1648] sm:$0xff]  ;;  %v3270_v23 = vpack.c.bf16 %v1495_v19, %v1489_v18  ;;  %v3020_v38 = vpack.c.bf16 %v1518_v13, %v1512_v20  ;;  %v1501_v26 = vld [vmem:[#allocation10 + $0x1640] sm:$0xff]  ;;  %v1543_v10 = vld [vmem:[#allocation10 + $0x1790] sm:$0xff]  ;;  %v1570_v20 = vrot.slane %v3792_v40, %v3737_v34 }
 0x2a2   :  { %v2480_v31 = vmul.f32 %v2456_v24, %v2442_v39  ;;  %3003 = vmatpush1.bf16.msra.mxu1 %v3002_v25  ;;  %v1511_v24 = vld [vmem:[#allocation10 + $0x1690] sm:$0xff]  ;;  %v1517_v25 = vld [vmem:[#allocation10 + $0x16c0] sm:$0xff]  ;;  %v1520_v39 = vld [vmem:[#allocation10 + $0x16d8] sm:$0xff]  ;;  %v1574_v13 = vrot.slane %v3792_v40, %v3742_v37 }
 0x2a3   :  { %3255 = vmatpush1.bf16.msra.mxu0 %v3254_v27  ;;  %3005 = vmatprep.subr.bf16.mxu1 %v3004_v28  ;;  %v3272_v27 = vpack.c.bf16 %v1508_v15, %v1502_v21  ;;  %v1507_v28 = vld [vmem:[#allocation10 + $0x1670] sm:$0xff]  ;;  %v3276_v45 = vpack.c.bf16 %v1520_v39, %v1514_v29  ;;  %v1537_v9 = vld [vmem:[#allocation10 + $0x1760] sm:$0xff]  ;;  %v2468_v29 = vrot.slane %v3798_v5, %v3735_v33  ;;  %v2523_v37 = vld [vmem:[#allocation15] ss:$0 sm:$0xff] }
 0x2a4   :  { %3257 = vmatprep.subr.bf16.mxu0 %v3256_v30  ;;  %v3804_v56 = vadd.f32 %v2480_v31, %v2479_v43  ;;  %v3022_v30 = vpack.c.bf16 %v1517_v25, %v1511_v24  ;;  %v3274_v41 = vpack.c.bf16 %v1507_v28, %v1501_v26  ;;  %v1529_v43 = vld [vmem:[#allocation10 + $0x1720] sm:$0xff]  ;;  %v1519_v31 = vld [vmem:[#allocation10 + $0x16d0] sm:$0xff]  ;;  %v3286_v16 = vpack.c.bf16 %v1543_v10, %v1537_v9 }
 0x2a5   :  { %v3026_v50 = vpack.c.bf16 %v1529_v43, %v1523_v51  ;;  %v3278_v52 = vpack.c.bf16 %v1519_v31, %v1513_v44  ;;  %v1549_v18 = vld [vmem:[#allocation10 + $0x17c0] sm:$0xff]  ;;  %v1578_v24 = vrot.slane %v3792_v40, %v3735_v33 }
 0x2a6   :  { %3007 = vmatpush1.bf16.msra.mxu1 %v3006_v46  ;;  %v1536_v46 = vld [vmem:[#allocation10 + $0x1758] sm:$0xff] }
 0x2a7   :  { %3259 = vmatpush1.bf16.msra.mxu0 %v3258_v47  ;;  %3009 = vmatprep.subr.bf16.mxu1 %v3008_v48  ;;  %v1542_v47 = vld [vmem:[#allocation10 + $0x1788] sm:$0xff] }
 0x2a8   :  { %3261 = vmatprep.subr.bf16.mxu0 %v3260_v53  ;;  %v1526_v48 = vld [vmem:[#allocation10 + $0x1708] sm:$0xff]  ;;  %v3028_v53 = vpack.c.bf16 %v1542_v47, %v1536_v46 }
 0x2a9   :  { %v3280_v59 = vpack.c.bf16 %v1532_v49, %v1526_v48 }
 0x2aa   :  { %3011 = vmatpush1.bf16.msra.mxu1 %v3010_v8  ;;  %v1548_v8 = vld [vmem:[#allocation10 + $0x17b8] sm:$0xff] }
 0x2ab   :  { %3263 = vmatpush1.bf16.msra.mxu0 %v3262_v61  ;;  %3013 = vmatprep.subr.bf16.mxu1 %v3012_v62  ;;  %v1554_v61 = vld [vmem:[#allocation10 + $0x17e8] sm:$0xff] }
 0x2ac   :  { %3265 = vmatprep.subr.bf16.mxu0 %v3264_v3  ;;  %v1538_v62 = vld [vmem:[#allocation10 + $0x1768] sm:$0xff]  ;;  %v3032_v3 = vpack.c.bf16 %v1554_v61, %v1548_v8 }
 0x2ad   :  { %v3284_v0 = vpack.c.bf16 %v1544_v63, %v1538_v62 }
 0x2ae   :  { %3015 = vmatpush1.bf16.msra.mxu1 %v3014_v11  ;;  %v1550_v11 = vld [vmem:[#allocation10 + $0x17c8] sm:$0xff] }
 0x2af   :  { %3267 = vmatpush1.bf16.msra.mxu0 %v3266_v12  ;;  %3017 = vmatprep.subr.bf16.mxu1 %v3016_v14  ;;  %v1556_v12 = vld [vmem:[#allocation10 + $0x17f8] sm:$0xff]  ;;  %v3034_v14 = vpack.c.bf16 %v1553_v6, %v1547_v4 }
 0x2b0   :  { %3269 = vmatprep.subr.bf16.mxu0 %v3268_v57  ;;  %v3288_v17 = vpack.c.bf16 %v1556_v12, %v1550_v11  ;;  %v1555_v57 = vld [vmem:[#allocation10 + $0x17f0] sm:$0xff] }
 0x2b1   :  { %v3290_v19 = vpack.c.bf16 %v1555_v57, %v1549_v18 }
 0x2b2   :  { %3019 = vmatpush1.bf16.msra.mxu1 %v3018_v22 }
 0x2b3   :  { %3271 = vmatpush1.bf16.msra.mxu0 %v3270_v23  ;;  %3021 = vmatprep.subr.bf16.mxu1 %v3020_v38  ;;  %v2460_v23 = vrot.slane %v3798_v5, %v3737_v34 }
 0x2b4   :  { %3273 = vmatprep.subr.bf16.mxu0 %v3272_v27 }
 0x2b6   :  { %3023 = vmatpush1.bf16.msra.mxu1 %v3022_v30  ;;  %v2472_v30 = vrot.slane %v3798_v5, %v3740_v36 }
 0x2b7   :  { %3275 = vmatpush1.bf16.msra.mxu0 %v3274_v41  ;;  %3025 = vmatprep.subr.bf16.mxu1 %v3024_v42 }
 0x2b8   :  { %3277 = vmatprep.subr.bf16.mxu0 %v3276_v45 }
 0x2ba   :  { %3027 = vmatpush1.bf16.msra.mxu1 %v3026_v50 }
 0x2bb   :  { %3279 = vmatpush1.bf16.msra.mxu0 %v3278_v52  ;;  %3029 = vmatprep.subr.bf16.mxu1 %v3028_v53 }
 0x2bc   :  { %3281 = vmatprep.subr.bf16.mxu0 %v3280_v59 }
 0x2be   :  { %3031 = vmatpush1.bf16.msra.mxu1 %v3030_v1 }
 0x2bf   :  { %3283 = vmatpush1.bf16.msra.mxu0 %v3282_v2  ;;  %3033 = vmatprep.subr.bf16.mxu1 %v3032_v3 }
 0x2c0   :  { %3285 = vmatprep.subr.bf16.mxu0 %v3284_v0 }
 0x2c2   :  { %3035 = vmatpush1.bf16.msra.mxu1 %v3034_v14 }
 0x2c3   :  { %3287 = vmatpush1.bf16.msra.mxu0 %v3286_v16 }
 0x2c4   :  { %3289 = vmatprep.subr.bf16.mxu0 %v3288_v17 }
 0x2c5   :  { %2151 = vmatmul.mubr.f32.vlgmr.msra.gmra.mrb[6].mxu1 %v3775_v7 }
 0x2c7   :  { %3291 = vmatpush1.bf16.msra.mxu0 %v3290_v19 }
 0x2ca   :  { %2435 = vmatmul.mubr.f32.vlgmr.msra.gmra.mrb[6].mxu0 %v3775_v7  ;;  %v1582_v7 = vrot.slane %v3792_v40, %v3740_v36 }
 0x398   :  { %v2152_v21 = vpop.f32.mrb[6].mxu1 }
 0x399   :  { %v3296_v15 = vadd.f32 %v2152_v21, %v1570_v20  ;;  %v2154_v22 = vpop.f32.mrb[7].mxu1 }
 0x39a   :  { %v3297_v38 = vadd.f32 %v2154_v22, %v1574_v13 }
 0x39b   :  { %v2443_v25 = vmax.f32 %v3296_v15, 0.0 }
 0x39c   :  { %v2444_v28 = vmax.f32 %v3297_v38, 0.0 }
 0x39d   :  { %v2436_v26 = vpop.f32.mrb[6].mxu0  ;;  %v2481_v27 = vmul.f32 %v2460_v23, %v2443_v25 }
 0x39e   :  { %v3298_v35 = vadd.f32 %v2436_v26, %v1578_v24  ;;  %v2438_v39 = vpop.f32.mrb[7].mxu0  ;;  %v2482_v40 = vmul.f32 %v2464_v32, %v2444_v28 }
 0x39f   :  { %v3299_v34 = vadd.f32 %v2438_v39, %v1582_v7  ;;  %v2486_v41 = vadd.f32 %v3804_v56, %v2481_v27 }
 0x3a0   :  { %v2445_v42 = vmax.f32 %v3298_v35, 0.0 }
 0x3a1   :  { %v2446_v51 = vmax.f32 %v3299_v34, 0.0  ;;  %2487 = vadd.xlane.f32.xlu0 %v2486_v41 }
 0x3a2   :  { %v2483_v43 = vmul.f32 %v2468_v29, %v2445_v42 }
 0x3a3   :  { %v2484_v44 = vmul.f32 %v2472_v30, %v2446_v51 }
 0x3a4   :  { %v2497_v45 = vadd.f32 %v2483_v43, %v2482_v40 }
 0x3a6   :  { %v2498_v31 = vadd.f32 %v2497_v45, %v2484_v44 }
 0x3a8   :  { %2499 = vadd.xlane.f32.xlu0 %v2498_v31 }
 0x42e   :  { %v2488_v46 = vpop.xlane.xlu0 %2487 }
 0x42f   :  { %v2496_v33 = vadd.f32 %v2523_v37, %v2488_v46 }
 0x431   :  { %2503 = vst.msk [vmem:[%s3840_s9] sm:$0xff] %vm2502_vm1, %v2496_v33 }
 0x435   :  { %v2500_v36 = vpop.xlane.xlu0 %2499 }
 0x436   :  { %v2501_v5 = vadd.f32 %v2523_v37, %v2500_v36 }
 0x438   :  { %2505 = vst.msk [vmem:[%s3840_s9] sm:$0xff] %vm2504_vm2, %v2501_v5 }
 0x439   :  { %2510 = vsyncpa [#allocation3], 1 }
 0x43a   :  { %2511 = vsyncpa [#allocation5], 1 }
 0x43b   :  { %2512 = vsyncpa [#allocation8], 1 }
 0x43c   :  { %2513 = vsyncpa [#allocation11], 1 }
 0x43d   :  { %2514 = vsyncpa [#allocation14], 1 }

</bundles_post_ra>
